<compile_context>
chip_gen: v7x
topology: tpu7x:2x2x1
jax: 0.10.0
libtpu: 0.0.40
codegen_flags: <defaults>
</compile_context>

<pallas_src>
import functools
import math

import jax
import jax.numpy as jnp
from jax import lax
from jax.experimental import pallas as pl
from jax.experimental.pallas import tpu as pltpu

_BF16 = jnp.bfloat16
_F32 = jnp.float32
_NEG_SLOPE = 0.01  # F.leaky_relu default


# ----------------------------- elementwise helpers (f32) --------------------

def _leaky_relu(x):
    return jnp.where(x >= 0, x, _NEG_SLOPE * x)


def _softplus(x):
    # Stable softplus.  (log1p(e) considered per review; argument 1+e is in
    # [1,2] so log(1+e) has no cancellation and stays on ops guaranteed to
    # lower on Mosaic.)
    return jnp.maximum(x, 0.0) + jnp.log(1.0 + jnp.exp(-jnp.abs(x)))


def _sigmoid(x):
    # Stable sigmoid: exp + approx reciprocal both use the EUP slot,
    # no f32 divide on the VALU, no overflow for very negative x.
    e = jnp.exp(-jnp.abs(x))
    r = pl.reciprocal(1.0 + e, approx=True)
    return jnp.where(x >= 0, r, 1.0 - r)


# ----------------------------- tiling helpers --------------------------------

def _pick_block(n, target):
    for b in (target, 512, 256, 128, 64, 32, 16, 8):
        if b <= n and n % b == 0:
            return b
    return n


def _compiler_params(block_bytes, semantics):
    # double-buffered blocks + headroom; floor 32 MiB, cap 64 MiB (v7x-safe).
    limit = int(min(64 * 2**20, max(32 * 2**20, 4 * int(block_bytes))))
    return pltpu.CompilerParams(dimension_semantics=semantics,
                                vmem_limit_bytes=limit)


# ----------------------------- kernels ---------------------------------------

def _gc1_kernel(x_ref, adj_ref, w1_ref, b1_ref, h1_ref, acc_ref):
    """hidden1[i] = leaky_relu(sum_k adj[i,k] @ (x[k] @ W1) + b1)."""
    k = pl.program_id(1)

    @pl.when(k == 0)
    def _():
        acc_ref[...] = jnp.zeros_like(acc_ref)

    s = jnp.dot(x_ref[...], w1_ref[...], preferred_element_type=_F32)
    acc_ref[...] += jnp.dot(adj_ref[...], s.astype(_BF16),
                            preferred_element_type=_F32)

    @pl.when(k == pl.num_programs(1) - 1)
    def _():
        h1_ref[...] = _leaky_relu(acc_ref[...] + b1_ref[...]).astype(h1_ref.dtype)


def _gc2_decode_kernel(h1_ref, adj_ref, w23_ref, b23_ref,
                       wfc_ref, bns_ref, bnb_ref, wh_ref, bh_ref,
                       mu_ref, lv_ref, mubf_ref, out_ref, heads_ref,
                       acc_ref, *, h2, in_f,
                       theta_min, theta_max, mean_min, mean_max):
    """gc2 || gc2s (packed) + fc1/BN + [pi|theta|mean] heads per row block."""
    k = pl.program_id(1)

    @pl.when(k == 0)
    def _():
        acc_ref[...] = jnp.zeros_like(acc_ref)

    # packed [W_gc2 | W_gc2s]: one support matmul + one adj pass for mu & logvar
    s = jnp.dot(h1_ref[...], w23_ref[...], preferred_element_type=_F32)
    acc_ref[...] += jnp.dot(adj_ref[...], s.astype(_BF16),
                            preferred_element_type=_F32)

    @pl.when(k == pl.num_programs(1) - 1)
    def _():
        ml = _leaky_relu(acc_ref[...] + b23_ref[...])        # [mu | logvar]
        mu = ml[:, :h2]
        mu_ref[...] = mu
        lv_ref[...] = ml[:, h2:]
        mu_bf = mu.astype(_BF16)
        mubf_ref[...] = mu_bf                                # feeds dc call

        # fc1: Linear (no bias) + folded eval BatchNorm + leaky_relu
        o = jnp.dot(mu_bf, wfc_ref[...], preferred_element_type=_F32)
        o = _leaky_relu(o * bns_ref[...] + bnb_ref[...])
        out_ref[...] = o

        # decoder heads packed into one matmul: [pi | theta | mean]
        h = jnp.dot(o.astype(_BF16), wh_ref[...],
                    preferred_element_type=_F32) + bh_ref[...]
        heads_ref[:, :in_f] = _sigmoid(h[:, :in_f])
        heads_ref[:, in_f:2 * in_f] = jnp.clip(
            _softplus(h[:, in_f:2 * in_f]), theta_min, theta_max)
        # clamp pre-activation so exp never overflows before the clip
        heads_ref[:, 2 * in_f:] = jnp.clip(
            jnp.exp(jnp.minimum(h[:, 2 * in_f:], math.log(mean_max) + 1.0)),
            mean_min, mean_max)


def _dc_kernel(a_ref, b_ref, dc_ref):
    """dc[i, j] = mu[i] @ mu[j].T  (contract last axes of both, no transpose)."""
    dc_ref[...] = lax.dot_general(
        a_ref[...], b_ref[...], (((1,), (1,)), ((), ())),
        preferred_element_type=_F32).astype(dc_ref.dtype)


# ----------------------------- parameter packing ------------------------------

def pack_params(params, bn_eps=1e-5):
    """Pack / fold weights ONCE (not per forward call)."""
    w1, b1 = params["gc1"]
    w2, b2 = params["gc2"]
    w2s, b2s = params["gc2s"]
    wfc = params["fc1"]["w"]
    gamma, beta = params["fc1"]["bn_gamma"], params["fc1"]["bn_beta"]
    rmean, rvar = params["fc1"]["bn_mean"], params["fc1"]["bn_var"]
    scale = gamma / jnp.sqrt(rvar + bn_eps)
    wpi, bpi = params["pi"]
    wth, bth = params["theta"]
    wmn, bmn = params["mean"]
    return {
        "w1": w1.astype(_BF16),
        "b1": b1.reshape(1, -1).astype(_F32),
        "w23": jnp.concatenate([w2, w2s], axis=1).astype(_BF16),
        "b23": jnp.concatenate([b2, b2s], axis=1).reshape(1, -1).astype(_F32),
        "wfc": wfc.astype(_BF16),
        "bn_scale": scale.reshape(1, -1).astype(_F32),
        "bn_shift": (beta - rmean * scale).reshape(1, -1).astype(_F32),
        "wh": jnp.concatenate([wpi, wth, wmn], axis=1).astype(_BF16),
        "bh": jnp.concatenate([bpi, bth, bmn], axis=1).reshape(1, -1).astype(_F32),
    }


# ----------------------------- forward wrapper --------------------------------

def staci_forward(packed, x, adj, *,
                  block_m=256, block_k=256, block_dc=256,
                  dc_dtype=jnp.bfloat16,
                  mean_min=1e-5, mean_max=1e6,
                  theta_min=1e-5, theta_max=1e6):
    w1, b1 = packed["w1"], packed["b1"]
    w23, b23 = packed["w23"], packed["b23"]
    wfc, bns, bnb = packed["wfc"], packed["bn_scale"], packed["bn_shift"]
    wh, bh = packed["wh"], packed["bh"]

    n, in_f = x.shape
    h1d = w1.shape[1]
    h2 = w23.shape[1] // 2
    hd = wfc.shape[1]

    bm = _pick_block(n, block_m)
    bk = _pick_block(n, block_k)
    bdc = _pick_block(n, block_dc)

    x_bf = x.astype(_BF16)
    adj_bf = adj.astype(_BF16)

    # ----------------------------- call A: gc1 -------------------------------
    a_blk = (bk * in_f * 2 + bm * bk * 2 + w1.size * 2 + b1.size * 4
             + bm * h1d * 2 + bm * h1d * 4)
    h1_arr = pl.pallas_call(
        _gc1_kernel,
        grid=(n // bm, n // bk),
        in_specs=[
            pl.BlockSpec((bk, in_f), lambda i, k: (k, 0)),
            pl.BlockSpec((bm, bk), lambda i, k: (i, k)),
            pl.BlockSpec((in_f, h1d), lambda i, k: (0, 0)),
            pl.BlockSpec((1, h1d), lambda i, k: (0, 0)),
        ],
        out_specs=pl.BlockSpec((bm, h1d), lambda i, k: (i, 0)),
        out_shape=jax.ShapeDtypeStruct((n, h1d), _BF16),
        scratch_shapes=[pltpu.VMEM((bm, h1d), _F32)],
        compiler_params=_compiler_params(a_blk, ("parallel", "arbitrary")),
        cost_estimate=pl.CostEstimate(
            flops=2 * n * n * h1d + 2 * n * (n // bm) * in_f * h1d,
            transcendentals=0,
            bytes_accessed=2 * n * n + (n // bm) * n * in_f * 2 + 2 * n * h1d),
    )(x_bf, adj_bf, w1, b1)

    # ------------------ call B: gc2||gc2s + fc1/BN + heads --------------------
    kern_b = functools.partial(
        _gc2_decode_kernel, h2=h2, in_f=in_f,
        theta_min=theta_min, theta_max=theta_max,
        mean_min=mean_min, mean_max=mean_max)
    b_blk = (bk * h1d * 2 + bm * bk * 2 + w23.size * 2 + b23.size * 4
             + wfc.size * 2 + (bns.size + bnb.size) * 4
             + wh.size * 2 + bh.size * 4
             + bm * h2 * (4 + 4 + 2) + bm * hd * 4 + bm * 3 * in_f * 4
             + bm * 2 * h2 * 4)
    mu, logvar, mu_bf, output, heads = pl.pallas_call(
        kern_b,
        grid=(n // bm, n // bk),
        in_specs=[
            pl.BlockSpec((bk, h1d), lambda i, k: (k, 0)),
            pl.BlockSpec((bm, bk), lambda i, k: (i, k)),
            pl.BlockSpec((h1d, 2 * h2), lambda i, k: (0, 0)),
            pl.BlockSpec((1, 2 * h2), lambda i, k: (0, 0)),
            pl.BlockSpec((h2, hd), lambda i, k: (0, 0)),
            pl.BlockSpec((1, hd), lambda i, k: (0, 0)),
            pl.BlockSpec((1, hd), lambda i, k: (0, 0)),
            pl.BlockSpec((hd, 3 * in_f), lambda i, k: (0, 0)),
            pl.BlockSpec((1, 3 * in_f), lambda i, k: (0, 0)),
        ],
        out_specs=(
            pl.BlockSpec((bm, h2), lambda i, k: (i, 0)),
            pl.BlockSpec((bm, h2), lambda i, k: (i, 0)),
            pl.BlockSpec((bm, h2), lambda i, k: (i, 0)),
            pl.BlockSpec((bm, hd), lambda i, k: (i, 0)),
            pl.BlockSpec((bm, 3 * in_f), lambda i, k: (i, 0)),
        ),
        out_shape=(
            jax.ShapeDtypeStruct((n, h2), _F32),           # mu
            jax.ShapeDtypeStruct((n, h2), _F32),           # logvar
            jax.ShapeDtypeStruct((n, h2), _BF16),          # mu (bf16, for dc)
            jax.ShapeDtypeStruct((n, hd), _F32),           # output
            jax.ShapeDtypeStruct((n, 3 * in_f), _F32),     # [pi|theta|mean]
        ),
        scratch_shapes=[pltpu.VMEM((bm, 2 * h2), _F32)],
        compiler_params=_compiler_params(b_blk, ("parallel", "arbitrary")),
        cost_estimate=pl.CostEstimate(
            flops=(2 * n * n * 2 * h2 + 2 * n * (n // bm) * h1d * 2 * h2
                   + 2 * n * h2 * hd + 2 * n * hd * 3 * in_f),
            transcendentals=3 * n * in_f,
            bytes_accessed=(2 * n * n + (n // bm) * n * h1d * 2
                            + n * (4 * 2 * h2 + 2 * h2 + 4 * hd + 4 * 3 * in_f))),
    )(h1_arr, adj_bf, w23, b23, wfc, bns, bnb, wh, bh)

    # --------------------- call C: dc = mu @ mu.T (tiled) ---------------------
    dc_item = jnp.dtype(dc_dtype).itemsize
    c_blk = 2 * bdc * h2 * 2 + bdc * bdc * dc_item
    dc = pl.pallas_call(
        _dc_kernel,
        grid=(n // bdc, n // bdc),
        in_specs=[
            pl.BlockSpec((bdc, h2), lambda i, j: (i, 0)),
            pl.BlockSpec((bdc, h2), lambda i, j: (j, 0)),
        ],
        out_specs=pl.BlockSpec((bdc, bdc), lambda i, j: (i, j)),
        out_shape=jax.ShapeDtypeStruct((n, n), dc_dtype),
        compiler_params=_compiler_params(c_blk, ("parallel", "parallel")),
        cost_estimate=pl.CostEstimate(
            flops=2 * n * n * h2, transcendentals=0,
            bytes_accessed=n * n * dc_item + 2 * (n // bdc) * n * h2 * 2),
    )(mu_bf, mu_bf)

    z = mu
    pi_res = heads[:, :in_f]
    theta_res = heads[:, in_f:2 * in_f]
    mean_res = heads[:, 2 * in_f:]
    return dc, mu, logvar, z, (output, pi_res, theta_res, mean_res)


# ----------------------------- pure-JAX reference -----------------------------

def staci_reference(params, x, adj, mean_min=1e-5, mean_max=1e6,
                    theta_min=1e-5, theta_max=1e6, bn_eps=1e-5):
    def lrelu(v):
        return jnp.where(v >= 0, v, _NEG_SLOPE * v)

    w1, b1 = params["gc1"]
    w2, b2 = params["gc2"]
    w2s, b2s = params["gc2s"]
    wfc = params["fc1"]["w"]
    g, be = params["fc1"]["bn_gamma"], params["fc1"]["bn_beta"]
    rm, rv = params["fc1"]["bn_mean"], params["fc1"]["bn_var"]
    wpi, bpi = params["pi"]
    wth, bth = params["theta"]
    wmn, bmn = params["mean"]

    h1 = lrelu(adj @ (x @ w1) + b1)
    mu = lrelu(adj @ (h1 @ w2) + b2)
    lv = lrelu(adj @ (h1 @ w2s) + b2s)
    z = mu
    dc = z @ z.T
    o = lrelu((z @ wfc - rm) / jnp.sqrt(rv + bn_eps) * g + be)
    pi = jax.nn.sigmoid(o @ wpi + bpi)
    th = jnp.clip(jax.nn.softplus(o @ wth + bth), theta_min, theta_max)
    mn = jnp.clip(jnp.exp(o @ wmn + bmn), mean_min, mean_max)
    return dc, mu, lv, z, (o, pi, th, mn)


# ----------------------------- parameter init ---------------------------------

def _init_gc(key, in_dim, out_dim):
    r = math.sqrt(6.0 / (in_dim + out_dim))
    kw, kb = jax.random.split(key)
    w = jax.random.uniform(kw, (in_dim, out_dim), jnp.float32, -r, r)
    b = jax.random.uniform(kb, (1, out_dim), jnp.float32, -r, r)
    return w, b


def _init_linear(key, in_dim, out_dim, bias=True):
    r = 1.0 / math.sqrt(in_dim)
    kw, kb = jax.random.split(key)
    w = jax.random.uniform(kw, (in_dim, out_dim), jnp.float32, -r, r)
    b = (jax.random.uniform(kb, (1, out_dim), jnp.float32, -r, r)
         if bias else jnp.zeros((1, out_dim), jnp.float32))
    return w, b


def init_params(key, in_features, hidden_dim1, hidden_dim2, hidden_decoder):
    keys = jax.random.split(key, 7)
    wfc, _ = _init_linear(keys[3], hidden_dim2, hidden_decoder, bias=False)
    return {
        "gc1":  _init_gc(keys[0], in_features, hidden_dim1),
        "gc2":  _init_gc(keys[1], hidden_dim1, hidden_dim2),
        "gc2s": _init_gc(keys[2], hidden_dim1, hidden_dim2),
        "fc1": {
            "w": wfc,
            "bn_gamma": jnp.ones((hidden_decoder,), jnp.float32),
            "bn_beta":  jnp.zeros((hidden_decoder,), jnp.float32),
            "bn_mean":  jnp.zeros((hidden_decoder,), jnp.float32),
            "bn_var":   jnp.ones((hidden_decoder,), jnp.float32),
        },
        "pi":    _init_linear(keys[4], hidden_decoder, in_features, bias=True),
        "theta": _init_linear(keys[5], hidden_decoder, in_features, bias=True),
        "mean":  _init_linear(keys[6], hidden_decoder, in_features, bias=True),
    }


# ----------------------------------- main --------------------------------------

if __name__ == "__main__":
    # Small shapes chosen so every grid has >= 2 blocks per axis and every
    # output slab is lane-dense (hidden_dim2 a multiple of 128 per review).
    N = 256
    in_features = 128
    hidden_dim1 = 128
    hidden_dim2 = 128
    hidden_decoder = 128

    key = jax.random.PRNGKey(0)
    k_x, k_adj, k_p = jax.random.split(key, 3)

    x = jax.random.normal(k_x, (N, in_features), jnp.float32)

    # Symmetrically-normalized adjacency with self-loops (dense stand-in for
    # the torch.sparse adjacency).
    a = (jax.random.uniform(k_adj, (N, N)) < 0.05).astype(jnp.float32)
    a = jnp.maximum(a, a.T) + jnp.eye(N, dtype=jnp.float32)
    dinv = 1.0 / jnp.sqrt(a.sum(axis=1))
    adj = a * dinv[:, None] * dinv[None, :]

    params = init_params(k_p, in_features, hidden_dim1, hidden_dim2,
                         hidden_decoder)
    packed = pack_params(params)        # pack / fold weights once

    fwd = jax.jit(functools.partial(staci_forward,
                                    block_m=128, block_k=128, block_dc=128))
    dc, mu, logvar, z, (output, pi_res, theta_res, mean_res) = fwd(packed, x, adj)
    jax.block_until_ready((dc, mu, logvar, z,
                           output, pi_res, theta_res, mean_res))

    # shape checks
    assert dc.shape == (N, N)
    assert mu.shape == (N, hidden_dim2)
    assert logvar.shape == (N, hidden_dim2)
    assert z.shape == (N, hidden_dim2)
    assert output.shape == (N, hidden_decoder)
    assert pi_res.shape == (N, in_features)
    assert theta_res.shape == (N, in_features)
    assert mean_res.shape == (N, in_features)

    # activation-range sanity (approx reciprocal in sigmoid -> tiny slack)
    assert float(jnp.min(pi_res)) >= 0.0 and float(jnp.max(pi_res)) <= 1.0 + 1e-2
    assert float(jnp.min(theta_res)) >= 1e-5 and float(jnp.min(mean_res)) >= 1e-5
    assert bool(jnp.all(jnp.isfinite(dc.astype(jnp.float32))))

    # numerical check against pure-JAX f32 reference (bf16 MXU path -> loose tol)
    r_dc, r_mu, r_lv, _, (r_out, r_pi, r_th, r_mn) = staci_reference(params, x, adj)

    def relerr(got, want):
        got = jnp.asarray(got, jnp.float32)
        want = jnp.asarray(want, jnp.float32)
        return float(jnp.linalg.norm(got - want) / (jnp.linalg.norm(want) + 1e-6))

    assert relerr(mu, r_mu) < 0.05, relerr(mu, r_mu)
    assert relerr(logvar, r_lv) < 0.05, relerr(logvar, r_lv)
    assert relerr(output, r_out) < 0.05, relerr(output, r_out)
    assert relerr(pi_res, r_pi) < 0.05, relerr(pi_res, r_pi)
    assert relerr(theta_res, r_th) < 0.05, relerr(theta_res, r_th)
    assert relerr(mean_res, r_mn) < 0.05, relerr(mean_res, r_mn)
    assert relerr(dc, r_dc) < 0.10, relerr(dc, r_dc)   # dc stored bf16

    print("KERNEL_OK")
</pallas_src>

<mosaic_0001>
module attributes {stable_mosaic.version = 11 : i64} {
  func.func @_gc1_kernel(%arg0: i32, %arg1: i32, %arg2: memref<128x128xbf16, #tpu.memory_space<vmem>>, %arg3: memref<128x128xbf16, #tpu.memory_space<vmem>>, %arg4: memref<128x128xbf16, #tpu.memory_space<vmem>>, %arg5: memref<1x128xf32, #tpu.memory_space<vmem>>, %arg6: memref<128x128xbf16, #tpu.memory_space<vmem>>, %arg7: memref<128x128xf32, #tpu.memory_space<vmem>>) attributes {dimension_semantics = [#tpu.dimension_semantics<parallel>, #tpu.dimension_semantics<arbitrary>], iteration_bounds = array<i64: 2, 2>, scalar_prefetch = 0 : i64, scratch_operands = 1 : i64, tpu.core_type = #tpu.core_type<tc>, window_params = [{transform_indices = @transform_0, window_bounds = array<i64: 128, 128>}, {transform_indices = @transform_1, window_bounds = array<i64: 128, 128>}, {pipeline_mode = #tpu.pipeline_mode<synchronous>, transform_indices = @transform_2, window_bounds = array<i64: 128, 128>}, {pipeline_mode = #tpu.pipeline_mode<synchronous>, transform_indices = @transform_3, window_bounds = array<i64: 1, 128>}, {transform_indices = @transform_4, window_bounds = array<i64: 128, 128>}]} {
    %c0_i32 = arith.constant 0 : i32
    %0 = arith.cmpi eq, %arg1, %c0_i32 : i32
    %1 = arith.extui %0 : i1 to i32
    %c0_i32_0 = arith.constant 0 : i32
    %2 = arith.cmpi ne, %1, %c0_i32_0 : i32
    scf.if %2 {
      %cst_12 = arith.constant 0.000000e+00 : f32
      %15 = vector.broadcast %cst_12 : f32 to vector<128x128xf32>
      %c0_13 = arith.constant 0 : index
      %c0_14 = arith.constant 0 : index
      %16 = vector.load %arg7[%c0_13, %c0_14] : memref<128x128xf32, #tpu.memory_space<vmem>>, vector<128x128xf32>
      tpu.vector_store %arg7[%c0_13, %c0_14], %15 {strides = array<i32>} : memref<128x128xf32, #tpu.memory_space<vmem>>, vector<128x128xf32>,
    } else {
    }
    %c0 = arith.constant 0 : index
    %c0_1 = arith.constant 0 : index
    %3 = vector.load %arg2[%c0, %c0_1] : memref<128x128xbf16, #tpu.memory_space<vmem>>, vector<128x128xbf16>
    %c0_2 = arith.constant 0 : index
    %c0_3 = arith.constant 0 : index
    %4 = vector.load %arg4[%c0_2, %c0_3] : memref<128x128xbf16, #tpu.memory_space<vmem>>, vector<128x128xbf16>
    %cst = arith.constant dense<0.000000e+00> : vector<128x128xf32>
    %5 = tpu.matmul %3, %4, %cst {dimension_numbers = #tpu.dot_dimension_numbers<[1], [0], [0], [1], [0, 0, 1, 1], [], []>} : vector<128x128xbf16>, vector<128x128xbf16>, vector<128x128xf32> -> vector<128x128xf32>
    %c0_4 = arith.constant 0 : index
    %c0_5 = arith.constant 0 : index
    %6 = vector.load %arg7[%c0_4, %c0_5] : memref<128x128xf32, #tpu.memory_space<vmem>>, vector<128x128xf32>
    %c0_6 = arith.constant 0 : index
    %c0_7 = arith.constant 0 : index
    %7 = vector.load %arg3[%c0_6, %c0_7] : memref<128x128xbf16, #tpu.memory_space<vmem>>, vector<128x128xbf16>
    %8 = arith.truncf %5 : vector<128x128xf32> to vector<128x128xbf16>
    %cst_8 = arith.constant dense<0.000000e+00> : vector<128x128xf32>
    %9 = tpu.matmul %7, %8, %cst_8 {dimension_numbers = #tpu.dot_dimension_numbers<[1], [0], [0], [1], [0, 0, 1, 1], [], []>} : vector<128x128xbf16>, vector<128x128xbf16>, vector<128x128xf32> -> vector<128x128xf32>
    %10 = arith.addf %6, %9 : vector<128x128xf32>
    %c0_9 = arith.constant 0 : index
    %c0_10 = arith.constant 0 : index
    %11 = vector.load %arg7[%c0_9, %c0_10] : memref<128x128xf32, #tpu.memory_space<vmem>>, vector<128x128xf32>
    tpu.vector_store %arg7[%c0_9, %c0_10], %10 {strides = array<i32>} : memref<128x128xf32, #tpu.memory_space<vmem>>, vector<128x128xf32>,
    %c1_i32 = arith.constant 1 : i32
    %12 = arith.cmpi eq, %arg1, %c1_i32 : i32
    %13 = arith.extui %12 : i1 to i32
    %c0_i32_11 = arith.constant 0 : i32
    %14 = arith.cmpi ne, %13, %c0_i32_11 : i32
    scf.if %14 {
      %c0_12 = arith.constant 0 : index
      %c0_13 = arith.constant 0 : index
      %15 = vector.load %arg7[%c0_12, %c0_13] : memref<128x128xf32, #tpu.memory_space<vmem>>, vector<128x128xf32>
      %c0_14 = arith.constant 0 : index
      %c0_15 = arith.constant 0 : index
      %16 = vector.load %arg5[%c0_14, %c0_15] : memref<1x128xf32, #tpu.memory_space<vmem>>, vector<1x128xf32>
      %17 = vector.broadcast %16 : vector<1x128xf32> to vector<128x128xf32>
      %18 = arith.addf %15, %17 : vector<128x128xf32>
      %cst_16 = arith.constant 0.000000e+00 : f32
      %19 = vector.broadcast %cst_16 : f32 to vector<128x128xf32>
      %20 = arith.cmpf oge, %18, %19 : vector<128x128xf32>
      %cst_17 = arith.constant 0.00999999977 : f32
      %21 = vector.broadcast %cst_17 : f32 to vector<128x128xf32>
      %22 = arith.mulf %21, %18 : vector<128x128xf32>
      %23 = arith.select %20, %18, %22 : vector<128x128xi1>, vector<128x128xf32>
      %24 = arith.truncf %23 : vector<128x128xf32> to vector<128x128xbf16>
      %c0_18 = arith.constant 0 : index
      %c0_19 = arith.constant 0 : index
      %25 = vector.load %arg6[%c0_18, %c0_19] : memref<128x128xbf16, #tpu.memory_space<vmem>>, vector<128x128xbf16>
      tpu.vector_store %arg6[%c0_18, %c0_19], %24 {strides = array<i32>} : memref<128x128xbf16, #tpu.memory_space<vmem>>, vector<128x128xbf16>,
    } else {
    }
    return
  }
  func.func @transform_0(%arg0: i32, %arg1: i32) -> (i32, i32) {
    %c0_i32 = arith.constant 0 : i32
    %c0_i32_0 = arith.constant 0 : i32
    return %arg1, %c0_i32 : i32, i32
  }
  func.func @transform_1(%arg0: i32, %arg1: i32) -> (i32, i32) {
    %c0_i32 = arith.constant 0 : i32
    return %arg0, %arg1 : i32, i32
  }
  func.func @transform_2(%arg0: i32, %arg1: i32) -> (i32, i32) {
    %c0_i32 = arith.constant 0 : i32
    %c0_i32_0 = arith.constant 0 : i32
    %c0_i32_1 = arith.constant 0 : i32
    return %c0_i32, %c0_i32_0 : i32, i32
  }
  func.func @transform_3(%arg0: i32, %arg1: i32) -> (i32, i32) {
    %c0_i32 = arith.constant 0 : i32
    %c0_i32_0 = arith.constant 0 : i32
    %c0_i32_1 = arith.constant 0 : i32
    return %c0_i32, %c0_i32_0 : i32, i32
  }
  func.func @transform_4(%arg0: i32, %arg1: i32) -> (i32, i32) {
    %c0_i32 = arith.constant 0 : i32
    %c0_i32_0 = arith.constant 0 : i32
    return %arg0, %c0_i32 : i32, i32
  }
}

module attributes {stable_mosaic.version = 11 : i64} {
  func.func @_gc2_decode_kernel(%arg0: i32, %arg1: i32, %arg2: memref<128x128xbf16, #tpu.memory_space<vmem>>, %arg3: memref<128x128xbf16, #tpu.memory_space<vmem>>, %arg4: memref<128x256xbf16, #tpu.memory_space<vmem>>, %arg5: memref<1x256xf32, #tpu.memory_space<vmem>>, %arg6: memref<128x128xbf16, #tpu.memory_space<vmem>>, %arg7: memref<1x128xf32, #tpu.memory_space<vmem>>, %arg8: memref<1x128xf32, #tpu.memory_space<vmem>>, %arg9: memref<128x384xbf16, #tpu.memory_space<vmem>>, %arg10: memref<1x384xf32, #tpu.memory_space<vmem>>, %arg11: memref<128x128xf32, #tpu.memory_space<vmem>>, %arg12: memref<128x128xf32, #tpu.memory_space<vmem>>, %arg13: memref<128x128xbf16, #tpu.memory_space<vmem>>, %arg14: memref<128x128xf32, #tpu.memory_space<vmem>>, %arg15: memref<128x384xf32, #tpu.memory_space<vmem>>, %arg16: memref<128x256xf32, #tpu.memory_space<vmem>>) attributes {dimension_semantics = [#tpu.dimension_semantics<parallel>, #tpu.dimension_semantics<arbitrary>], iteration_bounds = array<i64: 2, 2>, scalar_prefetch = 0 : i64, scratch_operands = 1 : i64, tpu.core_type = #tpu.core_type<tc>, window_params = [{transform_indices = @transform_0, window_bounds = array<i64: 128, 128>}, {transform_indices = @transform_1, window_bounds = array<i64: 128, 128>}, {pipeline_mode = #tpu.pipeline_mode<synchronous>, transform_indices = @transform_2, window_bounds = array<i64: 128, 256>}, {pipeline_mode = #tpu.pipeline_mode<synchronous>, transform_indices = @transform_3, window_bounds = array<i64: 1, 256>}, {pipeline_mode = #tpu.pipeline_mode<synchronous>, transform_indices = @transform_4, window_bounds = array<i64: 128, 128>}, {pipeline_mode = #tpu.pipeline_mode<synchronous>, transform_indices = @transform_5, window_bounds = array<i64: 1, 128>}, {pipeline_mode = #tpu.pipeline_mode<synchronous>, transform_indices = @transform_6, window_bounds = array<i64: 1, 128>}, {pipeline_mode = #tpu.pipeline_mode<synchronous>, transform_indices = @transform_7, window_bounds = array<i64: 128, 384>}, {pipeline_mode = #tpu.pipeline_mode<synchronous>, transform_indices = @transform_8, window_bounds = array<i64: 1, 384>}, {transform_indices = @transform_9, window_bounds = array<i64: 128, 128>}, {transform_indices = @transform_10, window_bounds = array<i64: 128, 128>}, {transform_indices = @transform_11, window_bounds = array<i64: 128, 128>}, {transform_indices = @transform_12, window_bounds = array<i64: 128, 128>}, {transform_indices = @transform_13, window_bounds = array<i64: 128, 384>}]} {
    %c0_i32 = arith.constant 0 : i32
    %0 = arith.cmpi eq, %arg1, %c0_i32 : i32
    %1 = arith.extui %0 : i1 to i32
    %c0_i32_0 = arith.constant 0 : i32
    %2 = arith.cmpi ne, %1, %c0_i32_0 : i32
    scf.if %2 {
      %cst_12 = arith.constant 0.000000e+00 : f32
      %15 = vector.broadcast %cst_12 : f32 to vector<128x256xf32>
      %c0_13 = arith.constant 0 : index
      %c0_14 = arith.constant 0 : index
      %16 = vector.load %arg16[%c0_13, %c0_14] : memref<128x256xf32, #tpu.memory_space<vmem>>, vector<128x256xf32>
      tpu.vector_store %arg16[%c0_13, %c0_14], %15 {strides = array<i32>} : memref<128x256xf32, #tpu.memory_space<vmem>>, vector<128x256xf32>,
    } else {
    }
    %c0 = arith.constant 0 : index
    %c0_1 = arith.constant 0 : index
    %3 = vector.load %arg2[%c0, %c0_1] : memref<128x128xbf16, #tpu.memory_space<vmem>>, vector<128x128xbf16>
    %c0_2 = arith.constant 0 : index
    %c0_3 = arith.constant 0 : index
    %4 = vector.load %arg4[%c0_2, %c0_3] : memref<128x256xbf16, #tpu.memory_space<vmem>>, vector<128x256xbf16>
    %cst = arith.constant dense<0.000000e+00> : vector<128x256xf32>
    %5 = tpu.matmul %3, %4, %cst {dimension_numbers = #tpu.dot_dimension_numbers<[1], [0], [0], [1], [0, 0, 1, 1], [], []>} : vector<128x128xbf16>, vector<128x256xbf16>, vector<128x256xf32> -> vector<128x256xf32>
    %c0_4 = arith.constant 0 : index
    %c0_5 = arith.constant 0 : index
    %6 = vector.load %arg16[%c0_4, %c0_5] : memref<128x256xf32, #tpu.memory_space<vmem>>, vector<128x256xf32>
    %c0_6 = arith.constant 0 : index
    %c0_7 = arith.constant 0 : index
    %7 = vector.load %arg3[%c0_6, %c0_7] : memref<128x128xbf16, #tpu.memory_space<vmem>>, vector<128x128xbf16>
    %8 = arith.truncf %5 : vector<128x256xf32> to vector<128x256xbf16>
    %cst_8 = arith.constant dense<0.000000e+00> : vector<128x256xf32>
    %9 = tpu.matmul %7, %8, %cst_8 {dimension_numbers = #tpu.dot_dimension_numbers<[1], [0], [0], [1], [0, 0, 1, 1], [], []>} : vector<128x128xbf16>, vector<128x256xbf16>, vector<128x256xf32> -> vector<128x256xf32>
    %10 = arith.addf %6, %9 : vector<128x256xf32>
    %c0_9 = arith.constant 0 : index
    %c0_10 = arith.constant 0 : index
    %11 = vector.load %arg16[%c0_9, %c0_10] : memref<128x256xf32, #tpu.memory_space<vmem>>, vector<128x256xf32>
    tpu.vector_store %arg16[%c0_9, %c0_10], %10 {strides = array<i32>} : memref<128x256xf32, #tpu.memory_space<vmem>>, vector<128x256xf32>,
    %c1_i32 = arith.constant 1 : i32
    %12 = arith.cmpi eq, %arg1, %c1_i32 : i32
    %13 = arith.extui %12 : i1 to i32
    %c0_i32_11 = arith.constant 0 : i32
    %14 = arith.cmpi ne, %13, %c0_i32_11 : i32
    scf.if %14 {
      %c0_12 = arith.constant 0 : index
      %c0_13 = arith.constant 0 : index
      %15 = vector.load %arg16[%c0_12, %c0_13] : memref<128x256xf32, #tpu.memory_space<vmem>>, vector<128x256xf32>
      %c0_14 = arith.constant 0 : index
      %c0_15 = arith.constant 0 : index
      %16 = vector.load %arg5[%c0_14, %c0_15] : memref<1x256xf32, #tpu.memory_space<vmem>>, vector<1x256xf32>
      %17 = vector.broadcast %16 : vector<1x256xf32> to vector<128x256xf32>
      %18 = arith.addf %15, %17 : vector<128x256xf32>
      %cst_16 = arith.constant 0.000000e+00 : f32
      %19 = vector.broadcast %cst_16 : f32 to vector<128x256xf32>
      %20 = arith.cmpf oge, %18, %19 : vector<128x256xf32>
      %cst_17 = arith.constant 0.00999999977 : f32
      %21 = vector.broadcast %cst_17 : f32 to vector<128x256xf32>
      %22 = arith.mulf %21, %18 : vector<128x256xf32>
      %23 = arith.select %20, %18, %22 : vector<128x256xi1>, vector<128x256xf32>
      %24 = vector.extract_strided_slice %23 {offsets = [0, 0], sizes = [128, 128], strides = [1, 1]} : vector<128x256xf32> to vector<128x128xf32>
      %c0_18 = arith.constant 0 : index
      %c0_19 = arith.constant 0 : index
      %25 = vector.load %arg11[%c0_18, %c0_19] : memref<128x128xf32, #tpu.memory_space<vmem>>, vector<128x128xf32>
      tpu.vector_store %arg11[%c0_18, %c0_19], %24 {strides = array<i32>} : memref<128x128xf32, #tpu.memory_space<vmem>>, vector<128x128xf32>,
      %26 = vector.extract_strided_slice %23 {offsets = [0, 128], sizes = [128, 128], strides = [1, 1]} : vector<128x256xf32> to vector<128x128xf32>
      %c0_20 = arith.constant 0 : index
      %c0_21 = arith.constant 0 : index
      %27 = vector.load %arg12[%c0_20, %c0_21] : memref<128x128xf32, #tpu.memory_space<vmem>>, vector<128x128xf32>
      tpu.vector_store %arg12[%c0_20, %c0_21], %26 {strides = array<i32>} : memref<128x128xf32, #tpu.memory_space<vmem>>, vector<128x128xf32>,
      %28 = arith.truncf %24 : vector<128x128xf32> to vector<128x128xbf16>
      %c0_22 = arith.constant 0 : index
      %c0_23 = arith.constant 0 : index
      %29 = vector.load %arg13[%c0_22, %c0_23] : memref<128x128xbf16, #tpu.memory_space<vmem>>, vector<128x128xbf16>
      tpu.vector_store %arg13[%c0_22, %c0_23], %28 {strides = array<i32>} : memref<128x128xbf16, #tpu.memory_space<vmem>>, vector<128x128xbf16>,
      %c0_24 = arith.constant 0 : index
      %c0_25 = arith.constant 0 : index
      %30 = vector.load %arg6[%c0_24, %c0_25] : memref<128x128xbf16, #tpu.memory_space<vmem>>, vector<128x128xbf16>
      %cst_26 = arith.constant dense<0.000000e+00> : vector<128x128xf32>
      %31 = tpu.matmul %28, %30, %cst_26 {dimension_numbers = #tpu.dot_dimension_numbers<[1], [0], [0], [1], [0, 0, 1, 1], [], []>} : vector<128x128xbf16>, vector<128x128xbf16>, vector<128x128xf32> -> vector<128x128xf32>
      %c0_27 = arith.constant 0 : index
      %c0_28 = arith.constant 0 : index
      %32 = vector.load %arg7[%c0_27, %c0_28] : memref<1x128xf32, #tpu.memory_space<vmem>>, vector<1x128xf32>
      %33 = vector.broadcast %32 : vector<1x128xf32> to vector<128x128xf32>
      %34 = arith.mulf %31, %33 : vector<128x128xf32>
      %c0_29 = arith.constant 0 : index
      %c0_30 = arith.constant 0 : index
      %35 = vector.load %arg8[%c0_29, %c0_30] : memref<1x128xf32, #tpu.memory_space<vmem>>, vector<1x128xf32>
      %36 = vector.broadcast %35 : vector<1x128xf32> to vector<128x128xf32>
      %37 = arith.addf %34, %36 : vector<128x128xf32>
      %cst_31 = arith.constant 0.000000e+00 : f32
      %38 = vector.broadcast %cst_31 : f32 to vector<128x128xf32>
      %39 = arith.cmpf oge, %37, %38 : vector<128x128xf32>
      %cst_32 = arith.constant 0.00999999977 : f32
      %40 = vector.broadcast %cst_32 : f32 to vector<128x128xf32>
      %41 = arith.mulf %40, %37 : vector<128x128xf32>
      %42 = arith.select %39, %37, %41 : vector<128x128xi1>, vector<128x128xf32>
      %c0_33 = arith.constant 0 : index
      %c0_34 = arith.constant 0 : index
      %43 = vector.load %arg14[%c0_33, %c0_34] : memref<128x128xf32, #tpu.memory_space<vmem>>, vector<128x128xf32>
      tpu.vector_store %arg14[%c0_33, %c0_34], %42 {strides = array<i32>} : memref<128x128xf32, #tpu.memory_space<vmem>>, vector<128x128xf32>,
      %44 = arith.truncf %42 : vector<128x128xf32> to vector<128x128xbf16>
      %c0_35 = arith.constant 0 : index
      %c0_36 = arith.constant 0 : index
      %45 = vector.load %arg9[%c0_35, %c0_36] : memref<128x384xbf16, #tpu.memory_space<vmem>>, vector<128x384xbf16>
      %cst_37 = arith.constant dense<0.000000e+00> : vector<128x384xf32>
      %46 = tpu.matmul %44, %45, %cst_37 {dimension_numbers = #tpu.dot_dimension_numbers<[1], [0], [0], [1], [0, 0, 1, 1], [], []>} : vector<128x128xbf16>, vector<128x384xbf16>, vector<128x384xf32> -> vector<128x384xf32>
      %c0_38 = arith.constant 0 : index
      %c0_39 = arith.constant 0 : index
      %47 = vector.load %arg10[%c0_38, %c0_39] : memref<1x384xf32, #tpu.memory_space<vmem>>, vector<1x384xf32>
      %48 = vector.broadcast %47 : vector<1x384xf32> to vector<128x384xf32>
      %49 = arith.addf %46, %48 : vector<128x384xf32>
      %50 = vector.extract_strided_slice %49 {offsets = [0, 0], sizes = [128, 128], strides = [1, 1]} : vector<128x384xf32> to vector<128x128xf32>
      %51 = math.absf %50 : vector<128x128xf32>
      %cst_40 = arith.constant 0.000000e+00 : f32
      %52 = vector.broadcast %cst_40 : f32 to vector<128x128xf32>
      %53 = arith.subf %52, %51 : vector<128x128xf32>
      %54 = math.exp %53 : vector<128x128xf32>
      %cst_41 = arith.constant 1.000000e+00 : f32
      %55 = vector.broadcast %cst_41 : f32 to vector<128x128xf32>
      %56 = arith.addf %55, %54 : vector<128x128xf32>
      %57 = tpu.reciprocal %56 {approx = true} : vector<128x128xf32> -> vector<128x128xf32>
      %cst_42 = arith.constant 0.000000e+00 : f32
      %58 = vector.broadcast %cst_42 : f32 to vector<128x128xf32>
      %59 = arith.cmpf oge, %50, %58 : vector<128x128xf32>
      %cst_43 = arith.constant 1.000000e+00 : f32
      %60 = vector.broadcast %cst_43 : f32 to vector<128x128xf32>
      %61 = arith.subf %60, %57 : vector<128x128xf32>
      %62 = arith.select %59, %57, %61 : vector<128x128xi1>, vector<128x128xf32>
      %c0_44 = arith.constant 0 : index
      %c0_45 = arith.constant 0 : index
      %63 = vector.load %arg15[%c0_44, %c0_45] : memref<128x384xf32, #tpu.memory_space<vmem>>, vector<128x128xf32>
      tpu.vector_store %arg15[%c0_44, %c0_45], %62 {strides = array<i32>} : memref<128x384xf32, #tpu.memory_space<vmem>>, vector<128x128xf32>,
      %64 = vector.extract_strided_slice %49 {offsets = [0, 128], sizes = [128, 128], strides = [1, 1]} : vector<128x384xf32> to vector<128x128xf32>
      %cst_46 = arith.constant 0.000000e+00 : f32
      %65 = vector.broadcast %cst_46 : f32 to vector<128x128xf32>
      %66 = arith.maximumf %64, %65 : vector<128x128xf32>
      %67 = math.absf %64 : vector<128x128xf32>
      %cst_47 = arith.constant 0.000000e+00 : f32
      %68 = vector.broadcast %cst_47 : f32 to vector<128x128xf32>
      %69 = arith.subf %68, %67 : vector<128x128xf32>
      %70 = math.exp %69 : vector<128x128xf32>
      %cst_48 = arith.constant 1.000000e+00 : f32
      %71 = vector.broadcast %cst_48 : f32 to vector<128x128xf32>
      %72 = arith.addf %71, %70 : vector<128x128xf32>
      %73 = math.log %72 : vector<128x128xf32>
      %74 = arith.addf %66, %73 : vector<128x128xf32>
      %cst_49 = arith.constant 9.99999974E-6 : f32
      %cst_50 = arith.constant 1.000000e+06 : f32
      %75 = vector.broadcast %cst_49 : f32 to vector<128x128xf32>
      %76 = arith.maximumf %75, %74 : vector<128x128xf32>
      %77 = vector.broadcast %cst_50 : f32 to vector<128x128xf32>
      %78 = arith.minimumf %77, %76 : vector<128x128xf32>
      %c0_51 = arith.constant 0 : index
      %c128 = arith.constant 128 : index
      %79 = vector.load %arg15[%c0_51, %c128] : memref<128x384xf32, #tpu.memory_space<vmem>>, vector<128x128xf32>
      tpu.vector_store %arg15[%c0_51, %c128], %78 {strides = array<i32>} : memref<128x384xf32, #tpu.memory_space<vmem>>, vector<128x128xf32>,
      %80 = vector.extract_strided_slice %49 {offsets = [0, 256], sizes = [128, 128], strides = [1, 1]} : vector<128x384xf32> to vector<128x128xf32>
      %cst_52 = arith.constant 14.8155107 : f32
      %81 = vector.broadcast %cst_52 : f32 to vector<128x128xf32>
      %82 = arith.minimumf %80, %81 : vector<128x128xf32>
      %83 = math.exp %82 : vector<128x128xf32>
      %cst_53 = arith.constant 9.99999974E-6 : f32
      %cst_54 = arith.constant 1.000000e+06 : f32
      %84 = vector.broadcast %cst_53 : f32 to vector<128x128xf32>
      %85 = arith.maximumf %84, %83 : vector<128x128xf32>
      %86 = vector.broadcast %cst_54 : f32 to vector<128x128xf32>
      %87 = arith.minimumf %86, %85 : vector<128x128xf32>
      %c0_55 = arith.constant 0 : index
      %c256 = arith.constant 256 : index
      %88 = vector.load %arg15[%c0_55, %c256] : memref<128x384xf32, #tpu.memory_space<vmem>>, vector<128x128xf32>
      tpu.vector_store %arg15[%c0_55, %c256], %87 {strides = array<i32>} : memref<128x384xf32, #tpu.memory_space<vmem>>, vector<128x128xf32>,
    } else {
    }
    return
  }
  func.func @transform_0(%arg0: i32, %arg1: i32) -> (i32, i32) {
    %c0_i32 = arith.constant 0 : i32
    %c0_i32_0 = arith.constant 0 : i32
    return %arg1, %c0_i32 : i32, i32
  }
  func.func @transform_1(%arg0: i32, %arg1: i32) -> (i32, i32) {
    %c0_i32 = arith.constant 0 : i32
    return %arg0, %arg1 : i32, i32
  }
  func.func @transform_2(%arg0: i32, %arg1: i32) -> (i32, i32) {
    %c0_i32 = arith.constant 0 : i32
    %c0_i32_0 = arith.constant 0 : i32
    %c0_i32_1 = arith.constant 0 : i32
    return %c0_i32, %c0_i32_0 : i32, i32
  }
  func.func @transform_3(%arg0: i32, %arg1: i32) -> (i32, i32) {
    %c0_i32 = arith.constant 0 : i32
    %c0_i32_0 = arith.constant 0 : i32
    %c0_i32_1 = arith.constant 0 : i32
    return %c0_i32, %c0_i32_0 : i32, i32
  }
  func.func @transform_4(%arg0: i32, %arg1: i32) -> (i32, i32) {
    %c0_i32 = arith.constant 0 : i32
    %c0_i32_0 = arith.constant 0 : i32
    %c0_i32_1 = arith.constant 0 : i32
    return %c0_i32, %c0_i32_0 : i32, i32
  }
  func.func @transform_5(%arg0: i32, %arg1: i32) -> (i32, i32) {
    %c0_i32 = arith.constant 0 : i32
    %c0_i32_0 = arith.constant 0 : i32
    %c0_i32_1 = arith.constant 0 : i32
    return %c0_i32, %c0_i32_0 : i32, i32
  }
  func.func @transform_6(%arg0: i32, %arg1: i32) -> (i32, i32) {
    %c0_i32 = arith.constant 0 : i32
    %c0_i32_0 = arith.constant 0 : i32
    %c0_i32_1 = arith.constant 0 : i32
    return %c0_i32, %c0_i32_0 : i32, i32
  }
  func.func @transform_7(%arg0: i32, %arg1: i32) -> (i32, i32) {
    %c0_i32 = arith.constant 0 : i32
    %c0_i32_0 = arith.constant 0 : i32
    %c0_i32_1 = arith.constant 0 : i32
    return %c0_i32, %c0_i32_0 : i32, i32
  }
  func.func @transform_8(%arg0: i32, %arg1: i32) -> (i32, i32) {
    %c0_i32 = arith.constant 0 : i32
    %c0_i32_0 = arith.constant 0 : i32
    %c0_i32_1 = arith.constant 0 : i32
    return %c0_i32, %c0_i32_0 : i32, i32
  }
  func.func @transform_9(%arg0: i32, %arg1: i32) -> (i32, i32) {
    %c0_i32 = arith.constant 0 : i32
    %c0_i32_0 = arith.constant 0 : i32
    return %arg0, %c0_i32 : i32, i32
  }
  func.func @transform_10(%arg0: i32, %arg1: i32) -> (i32, i32) {
    %c0_i32 = arith.constant 0 : i32
    %c0_i32_0 = arith.constant 0 : i32
    return %arg0, %c0_i32 : i32, i32
  }
  func.func @transform_11(%arg0: i32, %arg1: i32) -> (i32, i32) {
    %c0_i32 = arith.constant 0 : i32
    %c0_i32_0 = arith.constant 0 : i32
    return %arg0, %c0_i32 : i32, i32
  }
  func.func @transform_12(%arg0: i32, %arg1: i32) -> (i32, i32) {
    %c0_i32 = arith.constant 0 : i32
    %c0_i32_0 = arith.constant 0 : i32
    return %arg0, %c0_i32 : i32, i32
  }
  func.func @transform_13(%arg0: i32, %arg1: i32) -> (i32, i32) {
    %c0_i32 = arith.constant 0 : i32
    %c0_i32_0 = arith.constant 0 : i32
    return %arg0, %c0_i32 : i32, i32
  }
}

module attributes {stable_mosaic.version = 11 : i64} {
  func.func @_dc_kernel(%arg0: i32, %arg1: i32, %arg2: memref<128x128xbf16, #tpu.memory_space<vmem>>, %arg3: memref<128x128xbf16, #tpu.memory_space<vmem>>, %arg4: memref<128x128xbf16, #tpu.memory_space<vmem>>) attributes {dimension_semantics = [#tpu.dimension_semantics<parallel>, #tpu.dimension_semantics<parallel>], iteration_bounds = array<i64: 2, 2>, scalar_prefetch = 0 : i64, scratch_operands = 0 : i64, tpu.core_type = #tpu.core_type<tc>, window_params = [{transform_indices = @transform_0, window_bounds = array<i64: 128, 128>}, {transform_indices = @transform_1, window_bounds = array<i64: 128, 128>}, {transform_indices = @transform_2, window_bounds = array<i64: 128, 128>}]} {
    %c0 = arith.constant 0 : index
    %c0_0 = arith.constant 0 : index
    %0 = vector.load %arg2[%c0, %c0_0] : memref<128x128xbf16, #tpu.memory_space<vmem>>, vector<128x128xbf16>
    %c0_1 = arith.constant 0 : index
    %c0_2 = arith.constant 0 : index
    %1 = vector.load %arg3[%c0_1, %c0_2] : memref<128x128xbf16, #tpu.memory_space<vmem>>, vector<128x128xbf16>
    %cst = arith.constant dense<0.000000e+00> : vector<128x128xf32>
    %2 = tpu.matmul %0, %1, %cst {dimension_numbers = #tpu.dot_dimension_numbers<[1], [1], [0], [0], [0, 0, 1, 0], [], []>} : vector<128x128xbf16>, vector<128x128xbf16>, vector<128x128xf32> -> vector<128x128xf32>
    %3 = arith.truncf %2 : vector<128x128xf32> to vector<128x128xbf16>
    %c0_3 = arith.constant 0 : index
    %c0_4 = arith.constant 0 : index
    %4 = vector.load %arg4[%c0_3, %c0_4] : memref<128x128xbf16, #tpu.memory_space<vmem>>, vector<128x128xbf16>
    tpu.vector_store %arg4[%c0_3, %c0_4], %3 {strides = array<i32>} : memref<128x128xbf16, #tpu.memory_space<vmem>>, vector<128x128xbf16>,
    return
  }
  func.func @transform_0(%arg0: i32, %arg1: i32) -> (i32, i32) {
    %c0_i32 = arith.constant 0 : i32
    %c0_i32_0 = arith.constant 0 : i32
    return %arg0, %c0_i32 : i32, i32
  }
  func.func @transform_1(%arg0: i32, %arg1: i32) -> (i32, i32) {
    %c0_i32 = arith.constant 0 : i32
    %c0_i32_0 = arith.constant 0 : i32
    return %arg1, %c0_i32 : i32, i32
  }
  func.func @transform_2(%arg0: i32, %arg1: i32) -> (i32, i32) {
    %c0_i32 = arith.constant 0 : i32
    return %arg0, %arg1 : i32, i32
  }
}

</mosaic_0001>

<bundles_post_ra>
// kernel: staci_forward.5
= control target key start
LH: loop header
LB: loop body
LE: loop exit
PB: predicated region body
PF: predicated region fallthrough
CT: control target
= control target key end

     0   :  { %7 = vsyncpa [#allocation3], 0  ;;  %s1136_s0 = inlined_call_operand.vmem [shape: bf16[256,128], index: 0, kind: input, shape index: {}, may-alias: {0,1}]   ;;  %s1137_s1 = inlined_call_operand.vmem [shape: bf16[256,128], index: 1, kind: input, shape index: {}, may-alias: {0,1}]   ;;  %s1138_s2 = inlined_call_operand.hbm [shape: bf16[256,256], index: 2, kind: output, shape index: {}]  }
   0x1   :  { %9 = vsyncpa [#allocation3 + $0x1], 0  ;;  %s971_s9 = smov 0   ;;  %s973_s10 = smov 0  }
   0x2   :  { %s975_s11 = smov 0   ;;  %s977_s12 = smov 0  }
   0x3   :  { %s979_s13 = smov 0   ;;  %s981_s14 = smov 0  }
   0x4   :  { %s983_s15 = smov 0   ;;  %s985_s16 = smov 0  }
   0x5 LB: > { %s590_s17 = sadd.s32 4294967295, %s950_s16   ;;  %s591_s18 = sadd.s32 4294967294, %s950_s16   ;;  %s950_s16 = sphi %s985_s16, %s15_s16   ;;  %s946_s15 = sphi %s983_s15, %s1147_s15   ;;  %s942_s14 = sphi %s981_s14, %s1146_s14   ;;  %s938_s13 = sphi %s979_s13, %s1145_s13   ;;  %s934_s12 = sphi %s977_s12, %s1144_s12   ;;  %s930_s11 = sphi %s975_s11, %s1143_s11   ;;  %s926_s10 = sphi %s973_s10, %s1142_s10   ;;  %s922_s9 = sphi %s971_s9, %s1141_s9  }
   0x6   : > { %s24_s19 = sadd.s32 1, %s942_s14  ;;  %s27_s20 = sadd.s32 1, %s946_s15 }
   0x7   : > { %p25_p0 = scmp.ge.s32.totalorder %s24_s19, 2  ;;  %p98_p1 = scmp.ne.s32.totalorder %s930_s11, %s926_s10 }
   0x8   : > { %p99_p2 = scmp.eq.s32.totalorder %s590_s17, 3  ;;  %p104_p5 = scmp.ne.s32.totalorder %s926_s10, %s922_s9 }
   0x9   : > { %s1149_s19 = smov (%p25_p0, %s24_s19), 0  ;;  %s1151_s20 = smov (!%p25_p0, %s27_s20), %s946_s15 }
   0xa   : > { %s84_s21 = ssub.s32 %s942_s14, %s1149_s19  ;;  %p1022_p3 = por %p99_p2, %p98_p1 }
   0xb   : > { %p29_p4 = scmp.ge.s32.totalorder %s1151_s20, 2  ;;  %p105_p6 = scmp.eq.s32.totalorder %s591_s18, 3 }
   0xc   : > { %p594_p7 = scmp.ge.s32.totalorder %s950_s16, 1  ;;  %p141_p9 = scmp.lt.s32.totalorder %s950_s16, 5 }
   0xd   : > { %s1153_s20 = smov (%p29_p4, %s1151_s20), 0  ;;  %p1031_p8 = por %p105_p6, %p104_p5 }
   0xe   : > { %s83_s24 = ssub.s32 %s946_s15, %s1153_s20  ;;  %s88_s25 = sadd.s32 1, %s930_s11 }
   0xf   : > { %s85_s26 = sor.u32 %s84_s21, %s83_s24  ;;  %p142_p10 = pnand %p594_p7, %p141_p9 }
  0x10   : > { %p86_p11 = scmp.eq.s32.totalorder %s85_s26, 0  ;;  %s598_s28 = sshll.u32 (!%p142_p10), %s934_s12, 4 }
  0x11   : > { %145 = sbr.rel (%p142_p10) target bundleno = 333 (0x14d), region = 28  ;;  %s596_s29 = sshll.u32 (!%p142_p10), %s938_s13, 4 }
  0x12   : > { %s1040_s27 = scalar_select %p86_p11, %s930_s11, %s88_s25  }
  0x13   : > { %p175_p12 = scmp.lt.s32.totalorder (!%p142_p10), %s598_s28, 31  ;;  %p169_p13 = scmp.lt.s32.totalorder (!%p142_p10), %s596_s29, 31 }
  0x14   : > { %s165_s18 = sand.u32 (!%p142_p10), 1, %s926_s10   ;;  %s654_s24 = sshll.u32 (!%p142_p10), %s938_s13, 5 }
  0x15   : > { %s595_s21 = sshll.u32 (!%p142_p10), %s165_s18, 6  ;;  %s500_s26 = sadd.s32 (!%p142_p10), %s934_s12, %s654_s24 }
  0x16   : > { %s167_s25 = scalar_lea.vmem (!%p142_p10), [#allocation2], %s595_s21  ;;  %s1084_s3 = scalar_lea.sflag (!%p142_p10), [#allocation3], %s165_s18 }
  0x18   : > { %s1155_s28 = smov (!%p175_p12, %s598_s28), 31  ;;  %s1157_s29 = smov (!%p169_p13, %s596_s29), 31 }
  0x19   : > { %s599_s30 = sshll.u32 %s1155_s28, 2  ;;  %s597_s6 = sshll.u32 %s1157_s29, 2 }
  0x1a   : > { %s1047_s5 = scalar_lea.vmem %s1137_s1, %s599_s30  ;;  %s1054_s17 = scalar_lea.vmem %s1136_s0, %s597_s6 }
  0x1b   : > { %v840_v0 = vld [vmem:[%s1047_s5] sm:$0xff]   ;;  %v841_v1 = vld [vmem:[%s1047_s5 + $0x8] sm:$0xff]   ;;  %v842_v2 = vld [vmem:[%s1047_s5 + $0x10] sm:$0xff]   ;;  %s503_s28 = sshll.u32 %s167_s25, 4  ;;  %s635_s29 = sshll.u32 %s500_s26, 6  ;;  %s1075_s28 = int_to_ptr.vmem [resolvable:$true] %s503_s28 }
  0x1c   : > { %718 = vmatprep.subr.bf16.mxu0 %v840_v0  ;;  %750 = vmatprep.subr.bf16.mxu1 %v840_v0  ;;  %v848_v3 = vld [vmem:[%s1054_s17] sm:$0xff]   ;;  %v843_v5 = vld [vmem:[%s1047_s5 + $0x18] sm:$0xff]   ;;  %v845_v7 = vld [vmem:[%s1047_s5 + $0x28] sm:$0xff]   ;;  %s1080_s30 = scalar_lea.hbm %s1138_s2, %s635_s29  ;;  %s856_s4 = scalar_lea.vmem %s1075_s28, 1024 }
  0x1d   : > { %719 = vmatpush3.bf16.xpose.msra.mxu0 %v840_v0  ;;  %758 = vmatpush3.bf16.xpose.msra.mxu1 %v840_v0  ;;  %v849_v4 = vld [vmem:[%s1054_s17 + $0x20] sm:$0xff]   ;;  %v846_v8 = vld [vmem:[%s1047_s5 + $0x30] sm:$0xff]   ;;  %v847_v9 = vld [vmem:[%s1047_s5 + $0x38] sm:$0xff]   ;;  %p857_p0 = scmp.ne.s32.totalorder %s1075_s28, %s856_s4 }
  0x1e   : > { %720 = vmatprep.subr.bf16.mxu0 %v841_v1  ;;  %751 = vmatprep.subr.bf16.mxu1 %v841_v1  ;;  %v844_v6 = vld [vmem:[%s1047_s5 + $0x20] sm:$0xff]   ;;  %v850_v10 = vld [vmem:[%s1054_s17 + $0x8] sm:$0xff]   ;;  %v852_v12 = vld [vmem:[%s1054_s17 + $0x10] sm:$0xff]   ;;  %s952_s5 = smov [#allocation2]  }
  0x1f   : > { %734 = vmatprep.mubr.bf16.mxu0 %v848_v3  ;;  %742 = vmatprep.mubr.bf16.mxu1 %v849_v4  ;;  %v851_v11 = vld [vmem:[%s1054_s17 + $0x28] sm:$0xff]   ;;  %v853_v13 = vld [vmem:[%s1054_s17 + $0x30] sm:$0xff]   ;;  %v854_v14 = vld [vmem:[%s1054_s17 + $0x18] sm:$0xff]   ;;  %p858_p1 = pnand %p857_p0, %p1022_p3  ;;  %s860_s6 = sshll.u32 %s952_s5, 4  ;;  %s861_s6 = int_to_ptr.vmem [resolvable:$false] %s860_s6 }
  0x20   : > { %v855_v15 = vld [vmem:[%s1054_s17 + $0x38] sm:$0xff]   ;;  %s862_s7 = scalar_lea.vmem %s861_s6, 2048  ;;  %p863_p4 = scmp.lt.s32.totalorder %s1075_s28, %s861_s6 }
  0x21   : > { %p859_p2 = pneg %p858_p1  ;;  %p864_p5 = scmp.lt.s32.totalorder %s862_s7, %s856_s4 }
  0x23   : > { %p865_p6 = por %p864_p5, %p863_p4 }
  0x25   : > { %721 = vmatpush3.bf16.xpose.msra.mxu0 %v841_v1  ;;  %759 = vmatpush3.bf16.xpose.msra.mxu1 %v841_v1  ;;  %p866_p7 = pnand %p865_p6, %p859_p2 }
  0x26   : > { %722 = vmatprep.subr.bf16.mxu0 %v842_v2  ;;  %752 = vmatprep.subr.bf16.mxu1 %v842_v2 }
  0x2d   : > { %723 = vmatpush3.bf16.xpose.msra.mxu0 %v842_v2  ;;  %760 = vmatpush3.bf16.xpose.msra.mxu1 %v842_v2 }
  0x2e   : > { %724 = vmatprep.subr.bf16.mxu0 %v843_v5  ;;  %753 = vmatprep.subr.bf16.mxu1 %v843_v5 }
  0x35   : > { %725 = vmatpush3.bf16.xpose.msra.mxu0 %v843_v5  ;;  %761 = vmatpush3.bf16.xpose.msra.mxu1 %v843_v5 }
  0x36   : > { %726 = vmatprep.subr.bf16.mxu0 %v844_v6  ;;  %754 = vmatprep.subr.bf16.mxu1 %v844_v6 }
  0x3d   : > { %727 = vmatpush3.bf16.xpose.msra.mxu0 %v844_v6  ;;  %762 = vmatpush3.bf16.xpose.msra.mxu1 %v844_v6 }
  0x3e   : > { %728 = vmatprep.subr.bf16.mxu0 %v845_v7  ;;  %755 = vmatprep.subr.bf16.mxu1 %v845_v7 }
  0x45   : > { %729 = vmatpush3.bf16.xpose.msra.mxu0 %v845_v7  ;;  %763 = vmatpush3.bf16.xpose.msra.mxu1 %v845_v7 }
  0x46   : > { %730 = vmatprep.subr.bf16.mxu0 %v846_v8  ;;  %756 = vmatprep.subr.bf16.mxu1 %v846_v8 }
  0x4d   : > { %731 = vmatpush3.bf16.xpose.msra.mxu0 %v846_v8  ;;  %764 = vmatpush3.bf16.xpose.msra.mxu1 %v846_v8 }
  0x4e   : > { %732 = vmatprep.subr.bf16.mxu0 %v847_v9  ;;  %757 = vmatprep.subr.bf16.mxu1 %v847_v9 }
  0x55   : > { %733 = vmatpush3.bf16.xpose.msra.mxu0 %v847_v9  ;;  %765 = vmatpush3.bf16.xpose.msra.mxu1 %v847_v9 }
  0x5c   : > { %735 = vmatmul.mubr.bf16.vlgmr.msra.gmra.mrb[0].mxu0 %v850_v10  ;;  %743 = vmatmul.mubr.bf16.vlgmr.msra.gmra.mrb[0].mxu1 %v851_v11 }
  0x5d   : > { %738 = vmatprep.mubr.bf16.mxu0 %v852_v12  ;;  %746 = vmatprep.mubr.bf16.mxu1 %v853_v13 }
  0x64   : > { %739 = vmatmul.mubr.bf16.gmra.mrb[4].mxu0 %v854_v14  ;;  %747 = vmatmul.mubr.bf16.gmra.mrb[4].mxu1 %v855_v15 }
 0x12f   : > { %v736_v16 = vpop.f32.mrb[0].mxu0  ;;  %v744_v17 = vpop.f32.mrb[0].mxu1 }
 0x130   : > { %v344_v18 = vpop.f32.mrb[1].mxu0  ;;  %v376_v19 = vpop.f32.mrb[1].mxu1 }
 0x131   : > { %v737_v20 = vpop.f32.mrb[2].mxu0  ;;  %v745_v21 = vpop.f32.mrb[2].mxu1 }
 0x132   : > { %v663_v22 = vpack.c.bf16 %v737_v20, %v736_v16  ;;  %v683_v23 = vpack.c.bf16 %v745_v21, %v744_v17  ;;  %v347_v24 = vpop.f32.mrb[3].mxu0  ;;  %v379_v25 = vpop.f32.mrb[3].mxu1 }
 0x133   : > { %v658_v26 = vpack.c.bf16 %v347_v24, %v344_v18  ;;  %v678_v27 = vpack.c.bf16 %v379_v25, %v376_v19 }
 0x134   : > { %695 = vst [vmem:[%s167_s25 + $0x8] sm:$0xff] %v663_v22   ;;  %699 = vst [vmem:[%s167_s25 + $0x28] sm:$0xff] %v683_v23  }
 0x135   : > { %659 = vst [vmem:[%s167_s25] sm:$0xff] %v658_v26   ;;  %698 = vst [vmem:[%s167_s25 + $0x20] sm:$0xff] %v678_v27  }
 0x137   : > { %v740_v28 = vpop.f32.mrb[4].mxu0  ;;  %v748_v29 = vpop.f32.mrb[4].mxu1 }
 0x138   : > { %v360_v30 = vpop.f32.mrb[5].mxu0  ;;  %v392_v31 = vpop.f32.mrb[5].mxu1 }
 0x139   : > { %v741_v32 = vpop.f32.mrb[6].mxu0  ;;  %v749_v33 = vpop.f32.mrb[6].mxu1 }
 0x13a   : > { %v673_v34 = vpack.c.bf16 %v741_v32, %v740_v28  ;;  %v693_v35 = vpack.c.bf16 %v749_v33, %v748_v29  ;;  %v363_v36 = vpop.f32.mrb[7].mxu0  ;;  %v395_v37 = vpop.f32.mrb[7].mxu1 }
 0x13b   : > { %v668_v38 = vpack.c.bf16 %v363_v36, %v360_v30  ;;  %v688_v39 = vpack.c.bf16 %v395_v37, %v392_v31 }
 0x13c   : > { %697 = vst [vmem:[%s167_s25 + $0x18] sm:$0xff] %v673_v34   ;;  %701 = vst [vmem:[%s167_s25 + $0x38] sm:$0xff] %v693_v35  }
 0x13d   : > { %696 = vst [vmem:[%s167_s25 + $0x10] sm:$0xff] %v668_v38   ;;  %700 = vst [vmem:[%s167_s25 + $0x30] sm:$0xff] %v688_v39  }
 0x13e   : > { %869 = shalt.err (!%p866_p7)
}
 0x13f   : > { %s870_s8 = scalar_lea.hbm %s1080_s30, 1024  ;;  %s874_s21 = scalar_lea.hbm %s1138_s2, 4096 }
 0x140   : > { %p871_p9 = scmp.ne.s32.totalorder %s1080_s30, %s870_s8  ;;  %p875_p12 = scmp.lt.u32.totalorder %s1080_s30, %s1138_s2 }
 0x141   : > { %p876_p13 = scmp.lt.u32.totalorder %s874_s21, %s870_s8  ;;  %p878_p1 = scmp.lt.u32.totalorder %s870_s8, %s1080_s30 }
 0x142   : > { %p872_p10 = pnand %p871_p9, %p1022_p3 }
 0x143   : > { %p877_p0 = por %p876_p13, %p875_p12 }
 0x144   : > { %p873_p11 = pneg %p872_p10 }
 0x145   : > { %p879_p2 = por %p878_p1, %p877_p0 }
 0x147   : > { %p880_p4 = pnand %p879_p2, %p873_p11 }
 0x149   : > { %883 = shalt.err (!%p880_p4)
}
 0x14a   : > { %s953_s26 = smov 64   ;;  %s954_s29 = smov 128  }
 0x14b   : > { %s955_s12 = smov 4  }
 0x14c   : > { %766 = dma.vmem_to_hbm [thread:$0]  (%p1022_p3), %s1075_s28, 1024, %s1080_s30, %s1084_s3, %s953_s26, %s954_s29, %s955_s12  }
 0x14d PF: > { %p772_p5 = scmp.ge.s32.totalorder %s950_s16, 2  ;;  %s518_s13 = sand.u32 1, %s922_s9  }
 0x14e   : > { %s519_s4 = scalar_lea.sflag [#allocation3], %s518_s13 }
 0x14f   : > { %p769_p6 = pnand %p772_p5, %p1031_p8 }
 0x151   : > { %917 = dma.done.wait (!%p769_p6), %s519_s4, 1024  }
 0x152   : > { %919 = vsyncadd (!%p769_p6), %s519_s4, 4294966272  ;;  %s15_s16 = sadd.s32 1, %s950_s16   ;;  %s1141_s9 = smov %s926_s10 }
 0x153   : > { %p12_p7 = scmp.ge.s32.totalorder %s15_s16, 6   ;;  %s1142_s10 = smov %s930_s11 }
 0x154   : > { %s1143_s11 = smov %s1040_s27  ;;  %s1144_s12 = smov %s942_s14 }
 0x155   : > { %s1145_s13 = smov %s946_s15  ;;  %s1146_s14 = smov %s1149_s19 }
 0x156   : > { %s1147_s15 = smov %s1153_s20  ;;  %14 = sbr.rel (!%p12_p7) target bundleno = 5 (0x5), region = 66 }
 0x15d   :  { %524 = vsyncpa [#allocation3], 1 }
 0x15e   :  { %526 = vsyncpa [#allocation3 + $0x1], 1 }

// kernel: staci_forward.3
= control target key start
LH: loop header
LB: loop body
LE: loop exit
PB: predicated region body
PF: predicated region fallthrough
CT: control target
= control target key end

     0   :  { %s1444_s15 = smov 0   ;;  %s1446_s16 = smov 0   ;;  %s1631_s0 = inlined_call_operand.vmem [shape: bf16[256,128], index: 0, kind: input, shape index: {}]   ;;  %s1632_s1 = inlined_call_operand.vmem [shape: bf16[256,256], index: 1, kind: input, shape index: {}]   ;;  %s1633_s2 = inlined_call_operand.vmem [shape: bf16[128,128], index: 2, kind: input, shape index: {}]   ;;  %s1634_s3 = inlined_call_operand.vmem [shape: f32[1,128], index: 3, kind: input, shape index: {}]   ;;  %s1635_s4 = inlined_call_operand.vmem [shape: bf16[256,128], index: 4, kind: output, shape index: {}]  }
   0x1   :  { %s1448_s17 = smov 0   ;;  %s1450_s18 = smov 0  }
   0x2   :  { %s1452_s19 = smov 0   ;;  %s1454_s20 = smov 0  }
   0x3   :  { %s1456_s21 = smov 0  }
   0x4 LB: > { %s23_s22 = sadd.s32 1, %s1408_s19  ;;  %s26_s23 = sadd.s32 1, %s1412_s20  ;;  %s1416_s21 = sphi %s1456_s21, %s14_s21   ;;  %s1412_s20 = sphi %s1454_s20, %s1641_s20   ;;  %s1408_s19 = sphi %s1452_s19, %s1640_s19   ;;  %s1404_s18 = sphi %s1450_s18, %s1639_s18   ;;  %s1400_s17 = sphi %s1448_s17, %s1638_s17   ;;  %s1396_s16 = sphi %s1446_s16, %s1637_s16   ;;  %s1392_s15 = sphi %s1444_s15, %s1636_s15  }
   0x5   : > { %p24_p0 = scmp.ge.s32.totalorder %s23_s22, 2  ;;  %p68_p1 = scmp.ne.s32.totalorder %s1396_s16, %s1392_s15 }
   0x6   : > { %p69_p2 = scmp.eq.s32.totalorder %s1416_s21, 0  ;;  %s61_s27 = sadd.s32 1, %s1396_s16 }
   0x7   : > { %s1643_s22 = smov (%p24_p0, %s23_s22), 0  ;;  %s1645_s23 = smov (!%p24_p0, %s26_s23), %s1412_s20 }
   0x8   : > { %p70_p3 = por %p69_p2, %p68_p1  ;;  %p28_p4 = scmp.ge.s32.totalorder %s1645_s23, 2 }
   0x9   : > { %s57_s24 = ssub.s32 %s1408_s19, %s1643_s22  ;;  %p1065_p6 = scmp.ge.s32.totalorder %s1416_s21, 4 }
   0xa   : > { %s1647_s23 = smov (%p28_p4, %s1645_s23), 0 }
   0xb   : > { %s56_s25 = ssub.s32 %s1412_s20, %s1647_s23  ;;  %168 = sbr.rel (%p1065_p6) target bundleno = 34 (0x22), region = 24 }
   0xc   : > { %s58_s26 = sor.u32 %s57_s24, %s56_s25 }
   0xd   : > { %p59_p5 = scmp.eq.s32.totalorder %s58_s26, 0 }
   0xf   : > { %s1495_s28 = scalar_select %p59_p5, %s1396_s16, %s61_s27  }
  0x12   : > { %180 = sbr.rel (!%p70_p3) target bundleno = 34 (0x22), region = 32  ;;  %s182_s29 = sand.u32 (%p70_p3), 1, %s1396_s16  }
  0x13   : > { %s1121_s30 = sshll.u32 (%p70_p3), %s1412_s20, 5  ;;  %s1066_s5 = sshll.u32 (%p70_p3), %s182_s29, 6 }
  0x14   : > { %s187_s6 = sadd.s32 (%p70_p3), %s1408_s19, %s1121_s30  ;;  %s184_s11 = scalar_lea.vmem (%p70_p3), [#allocation3], %s1066_s5 }
  0x15   : > { %s1069_s7 = sshll.u32 (%p70_p3), %s187_s6, 2 }
  0x16   : > { %s1504_s10 = scalar_lea.vmem (%p70_p3), %s1632_s1, %s1069_s7 }
  0x17   : > { %v205_v0 = vld [vmem:[%s1504_s10] sm:$0xf] (%p70_p3)  ;;  %v207_v1 = vld [vmem:[%s1504_s10 + $0x8] sm:$0xf] (%p70_p3)  ;;  %v209_v2 = vld [vmem:[%s1504_s10 + $0x10] sm:$0xf] (%p70_p3) }
  0x18   : > { %206 = vst [vmem:[%s184_s11] sm:$0xf] (%p70_p3), %v205_v0  ;;  %208 = vst [vmem:[%s184_s11 + $0x4] sm:$0xf] (%p70_p3), %v207_v1  ;;  %v211_v3 = vld [vmem:[%s1504_s10 + $0x18] sm:$0xf] (%p70_p3) }
  0x19   : > { %210 = vst [vmem:[%s184_s11 + $0x8] sm:$0xf] %v209_v2  ;;  %v213_v4 = vld [vmem:[%s1504_s10 + $0x20] sm:$0xf]  ;;  %v215_v5 = vld [vmem:[%s1504_s10 + $0x28] sm:$0xf] }
  0x1a   : > { %212 = vst [vmem:[%s184_s11 + $0xc] sm:$0xf] %v211_v3  ;;  %214 = vst [vmem:[%s184_s11 + $0x10] sm:$0xf] %v213_v4  ;;  %v217_v6 = vld [vmem:[%s1504_s10 + $0x30] sm:$0xf] }
  0x1b   : > { %216 = vst [vmem:[%s184_s11 + $0x14] sm:$0xf] %v215_v5  ;;  %v219_v7 = vld [vmem:[%s1504_s10 + $0x38] sm:$0xf]  ;;  %v221_v8 = vld [vmem:[%s1504_s10 + $0x40] sm:$0xf] }
  0x1c   : > { %218 = vst [vmem:[%s184_s11 + $0x18] sm:$0xf] %v217_v6  ;;  %220 = vst [vmem:[%s184_s11 + $0x1c] sm:$0xf] %v219_v7  ;;  %v223_v9 = vld [vmem:[%s1504_s10 + $0x48] sm:$0xf] }
  0x1d   : > { %222 = vst [vmem:[%s184_s11 + $0x20] sm:$0xf] %v221_v8  ;;  %v225_v10 = vld [vmem:[%s1504_s10 + $0x50] sm:$0xf]  ;;  %v227_v11 = vld [vmem:[%s1504_s10 + $0x58] sm:$0xf] }
  0x1e   : > { %224 = vst [vmem:[%s184_s11 + $0x24] sm:$0xf] %v223_v9  ;;  %226 = vst [vmem:[%s184_s11 + $0x28] sm:$0xf] %v225_v10  ;;  %v229_v12 = vld [vmem:[%s1504_s10 + $0x60] sm:$0xf] }
  0x1f   : > { %228 = vst [vmem:[%s184_s11 + $0x2c] sm:$0xf] %v227_v11  ;;  %v231_v13 = vld [vmem:[%s1504_s10 + $0x68] sm:$0xf]  ;;  %v233_v14 = vld [vmem:[%s1504_s10 + $0x70] sm:$0xf] }
  0x20   : > { %230 = vst [vmem:[%s184_s11 + $0x30] sm:$0xf] %v229_v12  ;;  %232 = vst [vmem:[%s184_s11 + $0x34] sm:$0xf] %v231_v13  ;;  %v235_v15 = vld [vmem:[%s1504_s10 + $0x78] sm:$0xf] }
  0x21   : > { %234 = vst [vmem:[%s184_s11 + $0x38] sm:$0xf] %v233_v14  ;;  %236 = vst [vmem:[%s184_s11 + $0x3c] sm:$0xf] %v235_v15 }
  0x22 PF: > { %p1070_p7 = scmp.ge.s32.totalorder %s1416_s21, 1  ;;  %p290_p8 = scmp.lt.s32.totalorder %s1416_s21, 5 }
  0x24   : > { %p291_p9 = pnand %p1070_p7, %p290_p8 }
  0x25   : > { %s297_s12 = sand.u32 (!%p291_p9), 1, %s1392_s15   ;;  %s1072_s13 = sshll.u32 (!%p291_p9), %s1400_s17, 4 }
  0x26   : > { %294 = sbr.rel (%p291_p9) target bundleno = 594 (0x252), region = 73  ;;  %s1071_s14 = sshll.u32 (!%p291_p9), %s297_s12, 6 }
  0x27   : > { %p328_p10 = scmp.lt.s32.totalorder (!%p291_p9), %s1072_s13, 31  ;;  %s1074_s24 = sshll.u32 (!%p291_p9), %s1404_s18, 4 }
  0x28   : > { %p335_p11 = scmp.lt.s32.totalorder (!%p291_p9), %s1074_s24, 31  ;;  %s1537_s15 = scalar_lea.vmem (!%p291_p9), [#allocation3], %s1071_s14 }
  0x29   : > { %p1076_p12 = scmp.ne.s32.totalorder (!%p291_p9), %s1400_s17, 0 }
  0x2d   : > { %s1649_s13 = smov (!%p328_p10, %s1072_s13), 31  ;;  %s1651_s24 = smov (!%p335_p11, %s1074_s24), 31 }
  0x2e   : > { %s1073_s25 = sshll.u32 %s1649_s13, 2  ;;  %s1075_s30 = sshll.u32 %s1651_s24, 2  ;;  %v1418_v16 = vmov (!%p1076_p12), 0.0  }
  0x2f   : > { %s1530_s29 = scalar_lea.vmem %s1631_s0, %s1073_s25  ;;  %s1535_s7 = scalar_lea.vmem %s1635_s4, %s1075_s30  ;;  %345 = vst [vmem:[#allocation2] sm:$0xff] (!%p1076_p12), %v1418_v16  ;;  %346 = vst [vmem:[#allocation2 + $0x8] sm:$0xff] (!%p1076_p12), %v1418_v16 }
  0x30   : > { %344 = sbr.rel (%p1076_p12) target bundleno = 55 (0x37), region = 81  ;;  %347 = vst [vmem:[#allocation2 + $0x10] sm:$0xff] (!%p1076_p12), %v1418_v16  ;;  %348 = vst [vmem:[#allocation2 + $0x18] sm:$0xff] (!%p1076_p12), %v1418_v16 }
  0x31   : > { %349 = vst [vmem:[#allocation2 + $0x20] sm:$0xff] (!%p1076_p12), %v1418_v16  ;;  %350 = vst [vmem:[#allocation2 + $0x28] sm:$0xff] (!%p1076_p12), %v1418_v16 }
  0x32   : > { %351 = vst [vmem:[#allocation2 + $0x30] sm:$0xff] (!%p1076_p12), %v1418_v16  ;;  %352 = vst [vmem:[#allocation2 + $0x38] sm:$0xff] (!%p1076_p12), %v1418_v16 }
  0x33   : > { %353 = vst [vmem:[#allocation2 + $0x40] sm:$0xff] (!%p1076_p12), %v1418_v16  ;;  %354 = vst [vmem:[#allocation2 + $0x48] sm:$0xff] (!%p1076_p12), %v1418_v16 }
  0x34   : > { %355 = vst [vmem:[#allocation2 + $0x50] sm:$0xff] (!%p1076_p12), %v1418_v16  ;;  %356 = vst [vmem:[#allocation2 + $0x58] sm:$0xff] (!%p1076_p12), %v1418_v16 }
  0x35   : > { %357 = vst [vmem:[#allocation2 + $0x60] sm:$0xff] (!%p1076_p12), %v1418_v16  ;;  %358 = vst [vmem:[#allocation2 + $0x68] sm:$0xff] (!%p1076_p12), %v1418_v16 }
  0x36   : > { %359 = vst [vmem:[#allocation2 + $0x70] sm:$0xff] (!%p1076_p12), %v1418_v16  ;;  %360 = vst [vmem:[#allocation2 + $0x78] sm:$0xff] (!%p1076_p12), %v1418_v16 }
  0x37 PF: > { %v1338_v17 = vld [vmem:[%s1633_s2] sm:$0xff]   ;;  %v1339_v18 = vld [vmem:[%s1633_s2 + $0x8] sm:$0xff]   ;;  %v1340_v19 = vld [vmem:[%s1633_s2 + $0x10] sm:$0xff]   ;;  %p1101_p13 = scmp.ne.s32.totalorder %s1400_s17, 1 }
  0x38   : > { %1217 = vmatprep.subr.bf16.mxu0 %v1338_v17  ;;  %v1341_v20 = vld [vmem:[%s1633_s2 + $0x18] sm:$0xff]   ;;  %v1346_v21 = vld [vmem:[%s1530_s29] sm:$0xff]   ;;  %v1343_v23 = vld [vmem:[%s1633_s2 + $0x28] sm:$0xff]  }
  0x39   : > { %1218 = vmatpush3.bf16.msra.mxu0 %v1338_v17  ;;  %1233 = vmatprep.mubr.bf16.mxu0 %v1346_v21  ;;  %v1342_v22 = vld [vmem:[%s1633_s2 + $0x20] sm:$0xff]   ;;  %v1344_v24 = vld [vmem:[%s1633_s2 + $0x30] sm:$0xff]   ;;  %v1345_v25 = vld [vmem:[%s1633_s2 + $0x38] sm:$0xff]  }
  0x3a   : > { %1219 = vmatprep.subr.bf16.mxu0 %v1339_v18  ;;  %v1347_v26 = vld [vmem:[%s1530_s29 + $0x8] sm:$0xff]   ;;  %v1348_v27 = vld [vmem:[%s1530_s29 + $0x10] sm:$0xff]   ;;  %v1349_v28 = vld [vmem:[%s1530_s29 + $0x18] sm:$0xff]  }
  0x3b   : > { %v1350_v29 = vld [vmem:[%s1530_s29 + $0x20] sm:$0xff]   ;;  %v1351_v30 = vld [vmem:[%s1530_s29 + $0x28] sm:$0xff]   ;;  %v1352_v31 = vld [vmem:[%s1530_s29 + $0x30] sm:$0xff]  }
  0x3c   : > { %v1353_v32 = vld [vmem:[%s1530_s29 + $0x38] sm:$0xff]   ;;  %v1354_v33 = vld [vmem:[%s1537_s15] sm:$0xff]   ;;  %v1355_v58 = vld [vmem:[%s1537_s15 + $0x8] sm:$0xff]  }
  0x3d   : > { %1220 = vmatpush3.bf16.msra.mxu0 %v1339_v18  ;;  %1265 = vmatprep.mubr.bf16.mxu1 %v1354_v33  ;;  %v1356_v59 = vld [vmem:[%s1537_s15 + $0x10] sm:$0xff]   ;;  %v1357_v60 = vld [vmem:[%s1537_s15 + $0x18] sm:$0xff]   ;;  %v1358_v61 = vld [vmem:[%s1537_s15 + $0x20] sm:$0xff]  }
  0x3e   : > { %1221 = vmatprep.subr.bf16.mxu0 %v1340_v19  ;;  %v1359_v62 = vld [vmem:[%s1537_s15 + $0x28] sm:$0xff]   ;;  %v1360_v63 = vld [vmem:[%s1537_s15 + $0x30] sm:$0xff]   ;;  %v1361_v0 = vld [vmem:[%s1537_s15 + $0x38] sm:$0xff]  }
  0x3f   : > { %v588_v1 = vld [vmem:[#allocation2 + $0x10] sm:$0xff]  ;;  %v586_v2 = vld [vmem:[#allocation2] sm:$0xff]  ;;  %v589_v4 = vld [vmem:[#allocation2 + $0x18] sm:$0xff] }
  0x40   : > { %v587_v7 = vld [vmem:[#allocation2 + $0x8] sm:$0xff]  ;;  %v592_v13 = vld [vmem:[#allocation2 + $0x30] sm:$0xff]  ;;  %v590_v14 = vld [vmem:[#allocation2 + $0x20] sm:$0xff] }
  0x41   : > { %1222 = vmatpush3.bf16.msra.mxu0 %v1340_v19  ;;  %v593_v16 = vld [vmem:[#allocation2 + $0x38] sm:$0xff]  ;;  %v591_v19 = vld [vmem:[#allocation2 + $0x28] sm:$0xff] }
  0x42   : > { %1223 = vmatprep.subr.bf16.mxu0 %v1341_v20 }
  0x45   : > { %1224 = vmatpush3.bf16.msra.mxu0 %v1341_v20 }
  0x46   : > { %1225 = vmatprep.subr.bf16.mxu0 %v1342_v22 }
  0x49   : > { %1226 = vmatpush3.bf16.msra.mxu0 %v1342_v22 }
  0x4a   : > { %1227 = vmatprep.subr.bf16.mxu0 %v1343_v23 }
  0x4d   : > { %1228 = vmatpush3.bf16.msra.mxu0 %v1343_v23 }
  0x4e   : > { %1229 = vmatprep.subr.bf16.mxu0 %v1344_v24 }
  0x51   : > { %1230 = vmatpush3.bf16.msra.mxu0 %v1344_v24 }
  0x52   : > { %1231 = vmatprep.subr.bf16.mxu0 %v1345_v25 }
  0x55   : > { %1232 = vmatpush3.bf16.msra.mxu0 %v1345_v25  ;;  %v596_v25 = vld [vmem:[#allocation2 + $0x50] sm:$0xff] }
  0x58   : > { %1234 = vmatmul.mubr.bf16.vlgmr.msra.gmra.mrb[0].mxu0 %v1347_v26  ;;  %v594_v26 = vld [vmem:[#allocation2 + $0x40] sm:$0xff] }
  0x59   : > { %1237 = vmatprep.mubr.bf16.mxu0 %v1348_v27 }
  0x60   : > { %1238 = vmatmul.mubr.bf16.gmra.mrb[4].mxu0 %v1349_v28  ;;  %v597_v28 = vld [vmem:[#allocation2 + $0x58] sm:$0xff] }
  0x61   : > { %1241 = vmatprep.mubr.bf16.mxu0 %v1350_v29 }
  0x68   : > { %1242 = vmatmul.mubr.bf16.gmra.mrb[8].mxu0 %v1351_v30 }
  0x69   : > { %1245 = vmatprep.mubr.bf16.mxu0 %v1352_v31  ;;  %v595_v31 = vld [vmem:[#allocation2 + $0x48] sm:$0xff] }
  0x70   : > { %1246 = vmatmul.mubr.bf16.gmra.mrb[12].mxu0 %v1353_v32 }
 0x12b   : > { %v1235_v34 = vpop.f32.mrb[0].mxu0 }
 0x12c   : > { %v523_v35 = vpop.f32.mrb[1].mxu0 }
 0x12d   : > { %v1236_v36 = vpop.f32.mrb[2].mxu0 }
 0x12e   : > { %v619_v37 = vpack.c.bf16 %v1236_v36, %v1235_v34  ;;  %v526_v38 = vpop.f32.mrb[3].mxu0 }
 0x12f   : > { %v618_v39 = vpack.c.bf16 %v526_v38, %v523_v35  ;;  %v598_v38 = vld [vmem:[#allocation2 + $0x60] sm:$0xff] }
 0x131   : > { %1249 = vmatprep.subr.bf16.mxu1 %v618_v39 }
 0x132   : > { %1250 = vmatpush3.bf16.msra.mxu1 %v618_v39 }
 0x133   : > { %v1239_v40 = vpop.f32.mrb[4].mxu0  ;;  %1251 = vmatprep.subr.bf16.mxu1 %v619_v37 }
 0x134   : > { %v539_v41 = vpop.f32.mrb[5].mxu0 }
 0x135   : > { %v1240_v42 = vpop.f32.mrb[6].mxu0 }
 0x136   : > { %v621_v43 = vpack.c.bf16 %v1240_v42, %v1239_v40  ;;  %v542_v44 = vpop.f32.mrb[7].mxu0  ;;  %1252 = vmatpush3.bf16.msra.mxu1 %v619_v37  ;;  %v600_v37 = vld [vmem:[#allocation2 + $0x70] sm:$0xff]  ;;  %v601_v40 = vld [vmem:[#allocation2 + $0x78] sm:$0xff] }
 0x137   : > { %v620_v45 = vpack.c.bf16 %v542_v44, %v539_v41 }
 0x139   : > { %1253 = vmatprep.subr.bf16.mxu1 %v620_v45 }
 0x13a   : > { %1254 = vmatpush3.bf16.msra.mxu1 %v620_v45 }
 0x13b   : > { %v1243_v46 = vpop.f32.mrb[8].mxu0  ;;  %1255 = vmatprep.subr.bf16.mxu1 %v621_v43 }
 0x13c   : > { %v555_v47 = vpop.f32.mrb[9].mxu0 }
 0x13d   : > { %v1244_v48 = vpop.f32.mrb[10].mxu0 }
 0x13e   : > { %v623_v49 = vpack.c.bf16 %v1244_v48, %v1243_v46  ;;  %v558_v50 = vpop.f32.mrb[11].mxu0  ;;  %1256 = vmatpush3.bf16.msra.mxu1 %v621_v43  ;;  %v599_v43 = vld [vmem:[#allocation2 + $0x68] sm:$0xff] }
 0x13f   : > { %v622_v51 = vpack.c.bf16 %v558_v50, %v555_v47 }
 0x141   : > { %1257 = vmatprep.subr.bf16.mxu1 %v622_v51 }
 0x142   : > { %1258 = vmatpush3.bf16.msra.mxu1 %v622_v51  ;;  %v1584_v51 = vld [vmem:[%s1634_s3] ss:$0 sm:$0xff] (!%p1101_p13) }
 0x143   : > { %v1247_v52 = vpop.f32.mrb[12].mxu0  ;;  %1259 = vmatprep.subr.bf16.mxu1 %v623_v49 }
 0x144   : > { %v571_v53 = vpop.f32.mrb[13].mxu0 }
 0x145   : > { %v1248_v54 = vpop.f32.mrb[14].mxu0 }
 0x146   : > { %v625_v55 = vpack.c.bf16 %v1248_v54, %v1247_v52  ;;  %v574_v56 = vpop.f32.mrb[15].mxu0  ;;  %1260 = vmatpush3.bf16.msra.mxu1 %v623_v49 }
 0x147   : > { %v624_v57 = vpack.c.bf16 %v574_v56, %v571_v53 }
 0x149   : > { %1261 = vmatprep.subr.bf16.mxu1 %v624_v57 }
 0x14a   : > { %1262 = vmatpush3.bf16.msra.mxu1 %v624_v57 }
 0x14b   : > { %1263 = vmatprep.subr.bf16.mxu1 %v625_v55 }
 0x14e   : > { %1264 = vmatpush3.bf16.msra.mxu1 %v625_v55 }
 0x151   : > { %1266 = vmatmul.mubr.bf16.vlgmr.msra.gmra.mrb[0].mxu1 %v1355_v58 }
 0x152   : > { %1269 = vmatprep.mubr.bf16.mxu1 %v1356_v59 }
 0x159   : > { %1270 = vmatmul.mubr.bf16.gmra.mrb[4].mxu1 %v1357_v60 }
 0x15a   : > { %1273 = vmatprep.mubr.bf16.mxu1 %v1358_v61 }
 0x161   : > { %1274 = vmatmul.mubr.bf16.gmra.mrb[8].mxu1 %v1359_v62 }
 0x162   : > { %1277 = vmatprep.mubr.bf16.mxu1 %v1360_v63 }
 0x169   : > { %1278 = vmatmul.mubr.bf16.gmra.mrb[12].mxu1 %v1361_v0 }
 0x224   : > { %v1267_v3 = vpop.f32.mrb[0].mxu1 }
 0x225   : > { %v773_v5 = vadd.f32 %v1267_v3, %v588_v1  ;;  %v708_v6 = vpop.f32.mrb[1].mxu1 }
 0x226   : > { %v771_v8 = vadd.f32 %v708_v6, %v586_v2  ;;  %v1268_v9 = vpop.f32.mrb[2].mxu1 }
 0x227   : > { %789 = vst [vmem:[#allocation2 + $0x10] sm:$0xff] %v773_v5  ;;  %v774_v10 = vadd.f32 %v1268_v9, %v589_v4  ;;  %v711_v11 = vpop.f32.mrb[3].mxu1 }
 0x228   : > { %787 = vst [vmem:[#allocation2] sm:$0xff] %v771_v8  ;;  %v772_v12 = vadd.f32 %v711_v11, %v587_v7 }
 0x229   : > { %790 = vst [vmem:[#allocation2 + $0x18] sm:$0xff] %v774_v10 }
 0x22a   : > { %788 = vst [vmem:[#allocation2 + $0x8] sm:$0xff] %v772_v12 }
 0x22c   : > { %v1271_v15 = vpop.f32.mrb[4].mxu1 }
 0x22d   : > { %v777_v17 = vadd.f32 %v1271_v15, %v592_v13  ;;  %v724_v18 = vpop.f32.mrb[5].mxu1 }
 0x22e   : > { %v775_v20 = vadd.f32 %v724_v18, %v590_v14  ;;  %v1272_v21 = vpop.f32.mrb[6].mxu1  ;;  %v809_v54 = vld [vmem:[#allocation2 + $0x10] sm:$0xff] (!%p1101_p13) }
 0x22f   : > { %793 = vst [vmem:[#allocation2 + $0x30] sm:$0xff] %v777_v17  ;;  %v778_v22 = vadd.f32 %v1272_v21, %v593_v16  ;;  %v727_v23 = vpop.f32.mrb[7].mxu1  ;;  %v807_v49 = vld [vmem:[#allocation2] sm:$0xff] (!%p1101_p13)  ;;  %v832_v57 = vadd.f32 (!%p1101_p13), %v1584_v51, %v809_v54 }
 0x230   : > { %791 = vst [vmem:[#allocation2 + $0x20] sm:$0xff] %v775_v20  ;;  %v776_v24 = vadd.f32 %v727_v23, %v591_v19  ;;  %v830_v52 = vadd.f32 (!%p1101_p13), %v1584_v51, %v807_v49  ;;  %v810_v55 = vld [vmem:[#allocation2 + $0x18] sm:$0xff] (!%p1101_p13) }
 0x231   : > { %794 = vst [vmem:[#allocation2 + $0x38] sm:$0xff] %v778_v22  ;;  %v808_v50 = vld [vmem:[#allocation2 + $0x8] sm:$0xff] (!%p1101_p13)  ;;  %v833_v58 = vadd.f32 (!%p1101_p13), %v1584_v51, %v810_v55  ;;  %vm848_vm2 = vcmp.ge.f32.partialorder (!%p1101_p13), %v832_v57, 0.0  ;;  %v864_v0 = vmul.f32 (!%p1101_p13), 0.01, %v832_v57 }
 0x232   : > { %792 = vst [vmem:[#allocation2 + $0x28] sm:$0xff] %v776_v24  ;;  %v831_v53 = vadd.f32 (!%p1101_p13), %v1584_v51, %v808_v50  ;;  %vm846_vm0 = vcmp.ge.f32.partialorder (!%p1101_p13), %v830_v52, 0.0  ;;  %v862_v62 = vmul.f32 (!%p1101_p13), 0.01, %v830_v52 }
 0x233   : > { %vm849_vm3 = vcmp.ge.f32.partialorder (!%p1101_p13), %v833_v58, 0.0  ;;  %v865_v1 = vmul.f32 (!%p1101_p13), 0.01, %v833_v58  ;;  %v880_v9 = vsel (!%p1101_p13), %vm848_vm2, %v832_v57, %v864_v0 }
 0x234   : > { %v1275_v27 = vpop.f32.mrb[8].mxu1  ;;  %vm847_vm1 = vcmp.ge.f32.partialorder (!%p1101_p13), %v831_v53, 0.0  ;;  %v863_v63 = vmul.f32 (!%p1101_p13), 0.01, %v831_v53  ;;  %v878_v2 = vsel (!%p1101_p13), %vm846_vm0, %v830_v52, %v862_v62 }
 0x235   : > { %v781_v29 = vadd.f32 %v1275_v27, %v596_v25  ;;  %v740_v30 = vpop.f32.mrb[9].mxu1  ;;  %v881_v10 = vsel (!%p1101_p13), %vm849_vm3, %v833_v58, %v865_v1 }
 0x236   : > { %v779_v32 = vadd.f32 %v740_v30, %v594_v26  ;;  %v1276_v33 = vpop.f32.mrb[10].mxu1  ;;  %v813_v61 = vld [vmem:[#allocation2 + $0x30] sm:$0xff] (!%p1101_p13)  ;;  %v879_v3 = vsel (!%p1101_p13), %vm847_vm1, %v831_v53, %v863_v63  ;;  %v1146_v13 = vpack.c.bf16 (!%p1101_p13), %v881_v10, %v880_v9 }
 0x237   : > { %797 = vst [vmem:[#allocation2 + $0x50] sm:$0xff] %v781_v29  ;;  %v782_v34 = vadd.f32 %v1276_v33, %v597_v28  ;;  %v743_v35 = vpop.f32.mrb[11].mxu1  ;;  %v811_v56 = vld [vmem:[#allocation2 + $0x20] sm:$0xff] (!%p1101_p13)  ;;  %v1141_v8 = vpack.c.bf16 (!%p1101_p13), %v879_v3, %v878_v2  ;;  %v836_v15 = vadd.f32 (!%p1101_p13), %v1584_v51, %v813_v61 }
 0x238   : > { %795 = vst [vmem:[#allocation2 + $0x40] sm:$0xff] %v779_v32  ;;  %v780_v36 = vadd.f32 %v743_v35, %v595_v31  ;;  %v834_v60 = vadd.f32 (!%p1101_p13), %v1584_v51, %v811_v56  ;;  %v814_v5 = vld [vmem:[#allocation2 + $0x38] sm:$0xff] (!%p1101_p13)  ;;  %1178 = vst [vmem:[%s1535_s7 + $0x8] sm:$0xff] (!%p1101_p13), %v1146_v13  }
 0x239   : > { %798 = vst [vmem:[#allocation2 + $0x58] sm:$0xff] %v782_v34  ;;  %v812_v59 = vld [vmem:[#allocation2 + $0x28] sm:$0xff] (!%p1101_p13)  ;;  %1142 = vst [vmem:[%s1535_s7] sm:$0xff] (!%p1101_p13), %v1141_v8   ;;  %v837_v17 = vadd.f32 (!%p1101_p13), %v1584_v51, %v814_v5  ;;  %vm852_vm6 = vcmp.ge.f32.partialorder (!%p1101_p13), %v836_v15, 0.0  ;;  %v868_v21 = vmul.f32 (!%p1101_p13), 0.01, %v836_v15 }
 0x23a   : > { %796 = vst [vmem:[#allocation2 + $0x48] sm:$0xff] %v780_v36  ;;  %v835_v4 = vadd.f32 (!%p1101_p13), %v1584_v51, %v812_v59  ;;  %vm850_vm4 = vcmp.ge.f32.partialorder (!%p1101_p13), %v834_v60, 0.0  ;;  %v866_v11 = vmul.f32 (!%p1101_p13), 0.01, %v834_v60 }
 0x23b   : > { %vm853_vm7 = vcmp.ge.f32.partialorder (!%p1101_p13), %v837_v17, 0.0  ;;  %v869_v25 = vmul.f32 (!%p1101_p13), 0.01, %v837_v17  ;;  %v884_v27 = vsel (!%p1101_p13), %vm852_vm6, %v836_v15, %v868_v21 }
 0x23c   : > { %v1279_v39 = vpop.f32.mrb[12].mxu1  ;;  %806 = sbr.rel (%p1101_p13) target bundleno = 594 (0x252), region = 85  ;;  %vm851_vm5 = vcmp.ge.f32.partialorder (!%p1101_p13), %v835_v4, 0.0  ;;  %v867_v14 = vmul.f32 (!%p1101_p13), 0.01, %v835_v4  ;;  %v882_v16 = vsel (!%p1101_p13), %vm850_vm4, %v834_v60, %v866_v11 }
 0x23d   : > { %v785_v41 = vadd.f32 %v1279_v39, %v600_v37  ;;  %v756_v42 = vpop.f32.mrb[13].mxu1  ;;  %v885_v30 = vsel (!%p1101_p13), %vm853_vm7, %v837_v17, %v869_v25 }
 0x23e   : > { %v783_v44 = vadd.f32 %v756_v42, %v598_v38  ;;  %v1280_v45 = vpop.f32.mrb[14].mxu1  ;;  %v817_v12 = vld [vmem:[#allocation2 + $0x50] sm:$0xff] (!%p1101_p13)  ;;  %v883_v20 = vsel (!%p1101_p13), %vm851_vm5, %v835_v4, %v867_v14  ;;  %v1156_v35 = vpack.c.bf16 (!%p1101_p13), %v885_v30, %v884_v27 }
 0x23f   : > { %801 = vst [vmem:[#allocation2 + $0x70] sm:$0xff] %v785_v41  ;;  %v786_v46 = vadd.f32 %v1280_v45, %v601_v40  ;;  %v759_v47 = vpop.f32.mrb[15].mxu1  ;;  %v815_v6 = vld [vmem:[#allocation2 + $0x40] sm:$0xff] (!%p1101_p13)  ;;  %v840_v23 = vadd.f32 (!%p1101_p13), %v1584_v51, %v817_v12  ;;  %v1151_v24 = vpack.c.bf16 (!%p1101_p13), %v883_v20, %v882_v16 }
 0x240   : > { %799 = vst [vmem:[#allocation2 + $0x60] sm:$0xff] %v783_v44  ;;  %v784_v48 = vadd.f32 %v759_v47, %v599_v43  ;;  %v838_v18 = vadd.f32 (!%p1101_p13), %v1584_v51, %v815_v6  ;;  %v818_v22 = vld [vmem:[#allocation2 + $0x58] sm:$0xff] (!%p1101_p13)  ;;  %1180 = vst [vmem:[%s1535_s7 + $0x18] sm:$0xff] (!%p1101_p13), %v1156_v35  }
 0x241   : > { %802 = vst [vmem:[#allocation2 + $0x78] sm:$0xff] %v786_v46  ;;  %v816_v7 = vld [vmem:[#allocation2 + $0x48] sm:$0xff] (!%p1101_p13)  ;;  %1179 = vst [vmem:[%s1535_s7 + $0x10] sm:$0xff] (!%p1101_p13), %v1151_v24   ;;  %v841_v31 = vadd.f32 (!%p1101_p13), %v1584_v51, %v818_v22  ;;  %vm856_vm10 = vcmp.ge.f32.partialorder (!%p1101_p13), %v840_v23, 0.0  ;;  %v872_v32 = vmul.f32 (!%p1101_p13), 0.01, %v840_v23 }
 0x242   : > { %800 = vst [vmem:[#allocation2 + $0x68] sm:$0xff] %v784_v48  ;;  %v839_v19 = vadd.f32 (!%p1101_p13), %v1584_v51, %v816_v7  ;;  %vm854_vm8 = vcmp.ge.f32.partialorder (!%p1101_p13), %v838_v18, 0.0  ;;  %v870_v28 = vmul.f32 (!%p1101_p13), 0.01, %v838_v18 }
 0x243   : > { %vm857_vm11 = vcmp.ge.f32.partialorder %v841_v31, 0.0  ;;  %v873_v41 = vmul.f32 0.01, %v841_v31  ;;  %v888_v42 = vsel %vm856_vm10, %v840_v23, %v872_v32 }
 0x244   : > { %vm855_vm9 = vcmp.ge.f32.partialorder %v839_v19, 0.0  ;;  %v871_v29 = vmul.f32 0.01, %v839_v19  ;;  %v886_v36 = vsel %vm854_vm8, %v838_v18, %v870_v28 }
 0x245   : > { %v889_v46 = vsel %vm857_vm11, %v841_v31, %v873_v41 }
 0x246   : > { %v821_v34 = vld [vmem:[#allocation2 + $0x70] sm:$0xff]  ;;  %v887_v37 = vsel %vm855_vm9, %v839_v19, %v871_v29  ;;  %v1166_v48 = vpack.c.bf16 %v889_v46, %v888_v42 }
 0x247   : > { %v819_v26 = vld [vmem:[#allocation2 + $0x60] sm:$0xff]  ;;  %v1161_v40 = vpack.c.bf16 %v887_v37, %v886_v36  ;;  %v844_v45 = vadd.f32 %v1584_v51, %v821_v34 }
 0x248   : > { %v842_v38 = vadd.f32 %v1584_v51, %v819_v26  ;;  %v822_v39 = vld [vmem:[#allocation2 + $0x78] sm:$0xff]  ;;  %1182 = vst [vmem:[%s1535_s7 + $0x28] sm:$0xff] %v1166_v48  }
 0x249   : > { %v820_v33 = vld [vmem:[#allocation2 + $0x68] sm:$0xff]  ;;  %1181 = vst [vmem:[%s1535_s7 + $0x20] sm:$0xff] %v1161_v40   ;;  %v845_v47 = vadd.f32 %v1584_v51, %v822_v39  ;;  %vm860_vm14 = vcmp.ge.f32.partialorder %v844_v45, 0.0  ;;  %v876_v52 = vmul.f32 0.01, %v844_v45 }
 0x24a   : > { %v843_v43 = vadd.f32 %v1584_v51, %v820_v33  ;;  %vm858_vm12 = vcmp.ge.f32.partialorder %v842_v38, 0.0  ;;  %v874_v44 = vmul.f32 0.01, %v842_v38 }
 0x24b   : > { %vm861_vm15 = vcmp.ge.f32.partialorder %v845_v47, 0.0  ;;  %v877_v53 = vmul.f32 0.01, %v845_v47  ;;  %v892_v56 = vsel %vm860_vm14, %v844_v45, %v876_v52 }
 0x24c   : > { %vm859_vm13 = vcmp.ge.f32.partialorder %v843_v43, 0.0  ;;  %v875_v49 = vmul.f32 0.01, %v843_v43  ;;  %v890_v50 = vsel %vm858_vm12, %v842_v38, %v874_v44 }
 0x24d   : > { %v893_v57 = vsel %vm861_vm15, %v845_v47, %v877_v53 }
 0x24e   : > { %v891_v54 = vsel %vm859_vm13, %v843_v43, %v875_v49  ;;  %v1176_v58 = vpack.c.bf16 %v893_v57, %v892_v56 }
 0x24f   : > { %v1171_v55 = vpack.c.bf16 %v891_v54, %v890_v50 }
 0x250   : > { %1184 = vst [vmem:[%s1535_s7 + $0x38] sm:$0xff] %v1176_v58  }
 0x251   : > { %1183 = vst [vmem:[%s1535_s7 + $0x30] sm:$0xff] %v1171_v55  }
 0x252 PF: > { %s14_s21 = sadd.s32 1, %s1416_s21   ;;  %s1636_s15 = smov %s1396_s16 }
 0x253   : > { %p11_p0 = scmp.ge.s32.totalorder %s14_s21, 6   ;;  %s1637_s16 = smov %s1495_s28 }
 0x254   : > { %s1638_s17 = smov %s1408_s19  ;;  %s1639_s18 = smov %s1412_s20 }
 0x255   : > { %s1640_s19 = smov %s1643_s22  ;;  %s1641_s20 = smov %s1647_s23 }
 0x256   :  { %13 = sbr.rel (!%p11_p0) target bundleno = 4 (0x4), region = 123 }

// kernel: staci_forward.4
= control target key start
LH: loop header
LB: loop body
LE: loop exit
PB: predicated region body
PF: predicated region fallthrough
CT: control target
= control target key end

     0   :  { %s4697_s0 = inlined_call_operand.vmem [shape: bf16[256,128], index: 0, kind: input, shape index: {}]   ;;  %s4698_s1 = inlined_call_operand.vmem [shape: bf16[256,256], index: 1, kind: input, shape index: {}]   ;;  %s4699_s2 = inlined_call_operand.vmem [shape: bf16[128,256], index: 2, kind: input, shape index: {}]   ;;  %s4700_s3 = inlined_call_operand.vmem [shape: f32[1,256], index: 3, kind: input, shape index: {}]   ;;  %s4701_s4 = inlined_call_operand.vmem [shape: bf16[128,128], index: 4, kind: input, shape index: {}]   ;;  %s4702_s5 = inlined_call_operand.vmem [shape: f32[1,128], index: 5, kind: input, shape index: {}]   ;;  %s4703_s6 = inlined_call_operand.vmem [shape: f32[1,128], index: 6, kind: input, shape index: {}]   ;;  %s4704_s7 = inlined_call_operand.vmem [shape: bf16[128,384], index: 7, kind: input, shape index: {}]   ;;  %s4705_s8 = inlined_call_operand.vmem [shape: f32[1,384], index: 8, kind: input, shape index: {}]   ;;  %s4706_s9 = inlined_call_operand.vmem [shape: f32[256,128], index: 9, kind: output, shape index: {0}]   ;;  %s4707_s10 = inlined_call_operand.hbm [shape: f32[256,128], index: 10, kind: output, shape index: {1}]   ;;  %s4708_s11 = inlined_call_operand.vmem [shape: bf16[256,128], index: 11, kind: output, shape index: {2}]   ;;  %s4709_s12 = inlined_call_operand.hbm [shape: f32[256,128], index: 12, kind: output, shape index: {3}]   ;;  %s4710_s13 = inlined_call_operand.vmem [shape: f32[256,384], index: 13, kind: output, shape index: {4}]  }
   0x1   :  { %4724 = sst [smem:[#allocation22_spill]] %s4698_s1 }
   0x2   :  { %4725 = sst [smem:[#allocation23_spill]] %s4702_s5 }
   0x3   :  { %4726 = sst [smem:[#allocation24_spill]] %s4703_s6 }
   0x4   :  { %4727 = sst [smem:[#allocation25_spill]] %s4705_s8 }
   0x5   :  { %4728 = sst [smem:[#allocation26_spill]] %s4707_s10 }
   0x6   :  { %4729 = sst [smem:[#allocation27_spill]] %s4709_s12 }
   0x7   :  { %19 = vsyncpa [#allocation5], 0 }
   0x8   :  { %21 = vsyncpa [#allocation5 + $0x1], 0 }
   0x9   :  { %22 = vsyncpa [#allocation7], 0 }
   0xa   :  { %24 = vsyncpa [#allocation7 + $0x1], 0  ;;  %s3732_s25 = smov 0   ;;  %s3734_s26 = smov 0  }
   0xb   :  { %s3736_s27 = smov 0   ;;  %s3738_s28 = smov 0  }
   0xc   :  { %s3740_s29 = smov 0   ;;  %s3742_s30 = smov 0  }
   0xd   :  { %s3744_s14 = smov 0   ;;  %s3746_s15 = smov 0  }
   0xe   :  { %s3748_s16 = smov 0   ;;  %s3750_s17 = smov 0  }
   0xf LB: > { %4730 = sst [smem:[#allocation10_spill]] %s3617_s25  ;;  %s2899_s18 = sadd.s32 4294967295, %s3653_s17   ;;  %s3653_s17 = sphi %s3750_s17, %s30_s17   ;;  %s3649_s16 = sphi %s3748_s16, %s4763_s16   ;;  %s3645_s15 = sphi %s3746_s15, %s4762_s15   ;;  %s3641_s14 = sphi %s3744_s14, %s4761_s14   ;;  %s3637_s30 = sphi %s3742_s30, %s4760_s30   ;;  %s3633_s29 = sphi %s3740_s29, %s4759_s29   ;;  %s3629_s28 = sphi %s3738_s28, %s4758_s28   ;;  %s3625_s27 = sphi %s3736_s27, %s4757_s27   ;;  %s3621_s26 = sphi %s3734_s26, %s4756_s26   ;;  %s3617_s25 = sphi %s3732_s25, %s4755_s25  }
  0x10   : > { %4731 = sst [smem:[#allocation11_spill]] %s3621_s26  ;;  %s2900_s19 = sadd.s32 4294967294, %s3653_s17  }
  0x11   : > { %4732 = sst [smem:[#allocation12_spill]] %s3625_s27  ;;  %s39_s20 = sadd.s32 1, %s3645_s15 }
  0x12   : > { %4733 = sst [smem:[#allocation13_spill]] %s3633_s29  ;;  %s42_s21 = sadd.s32 1, %s3649_s16 }
  0x13   : > { %4734 = sst [smem:[#allocation14_spill]] %s3645_s15  ;;  %p40_p0 = scmp.ge.s32.totalorder %s39_s20, 2 }
  0x14   : > { %4735 = sst [smem:[#allocation15_spill]] %s3649_s16  ;;  %s77_s22 = sadd.s32 1, %s3633_s29 }
  0x15   : > { %4736 = sst [smem:[#allocation16_spill]] %s3653_s17  ;;  %p84_p1 = scmp.ne.s32.totalorder %s3633_s29, %s3629_s28 }
  0x16   : > { %p85_p2 = scmp.eq.s32.totalorder %s3653_s17, 0  ;;  %s4765_s20 = smov (%p40_p0, %s39_s20), 0 }
  0x17   : > { %4737 = sst [smem:[#allocation17_spill]] %s4765_s20  ;;  %s4767_s21 = smov (!%p40_p0, %s42_s21), %s3649_s16 }
  0x18   : > { %s73_s23 = ssub.s32 %s3645_s15, %s4765_s20  ;;  %p3795_p3 = por %p85_p2, %p84_p1 }
  0x19   : > { %p44_p4 = scmp.ge.s32.totalorder %s4767_s21, 2  ;;  %s276_s12 = sadd.s32 1, %s3625_s27 }
  0x1a   : > { %p286_p5 = scmp.ne.s32.totalorder %s3625_s27, %s3621_s26  ;;  %p287_p6 = scmp.eq.s32.totalorder %s2899_s18, 3 }
  0x1b   : > { %s4769_s21 = smov (%p44_p4, %s4767_s21), 0  ;;  %p292_p8 = scmp.ne.s32.totalorder %s3621_s26, %s3617_s25 }
  0x1c   : > { %4739 = sst [smem:[#allocation18_spill]] %s4769_s21  ;;  %p3804_p7 = por %p287_p6, %p286_p5 }
  0x1d   : > { %s72_s8 = ssub.s32 %s3649_s16, %s4769_s21  ;;  %p293_p9 = scmp.eq.s32.totalorder %s2900_s19, 3 }
  0x1e   : > { %s74_s20 = sor.u32 %s73_s23, %s72_s8  ;;  %p274_p10 = scmp.eq.s32.totalorder %s72_s8, 0 }
  0x1f   : > { %p75_p11 = scmp.eq.s32.totalorder %s74_s20, 0  ;;  %p3812_p12 = por %p293_p9, %p292_p8 }
  0x20   : > { %s3817_s5 = scalar_select %p274_p10, %s3625_s27, %s276_s12  }
  0x21   : > { %s4741_s6 = scalar_select %p3812_p12, 1, 0 }
  0x22   : > { %4743 = sst [smem:[#allocation20_spill]] %s3817_s5  ;;  %p2902_p13 = scmp.ge.s32.totalorder %s3653_s17, 4 }
  0x23   : > { %4742 = sst [smem:[#allocation19_spill]] %s4741_s6 }
  0x24   : > { %s3820_s18 = scalar_select %p75_p11, %s3633_s29, %s77_s22  }
  0x25   : > { %408 = sbr.rel (%p2902_p13) target bundleno = 64 (0x40), region = 44 }
  0x26   : > { %4744 = sst [smem:[#allocation21_spill]] %s3820_s18 }
  0x2c   : > { %420 = sbr.rel (!%p3795_p3) target bundleno = 64 (0x40), region = 52  ;;  %s422_s19 = sand.u32 (%p3795_p3), 1, %s3633_s29  }
  0x2d   : > { %s3011_s8 = sshll.u32 (%p3795_p3), %s3649_s16, 5  ;;  %s2903_s20 = sshll.u32 (%p3795_p3), %s422_s19, 6 }
  0x2e   : > { %s427_s23 = sadd.s32 (%p3795_p3), %s3645_s15, %s3011_s8  ;;  %s4745_s1 = sld [smem:[#allocation22_spill]] (%p3795_p3) }
  0x2f   : > { %s2906_s21 = sshll.u32 (%p3795_p3), %s427_s23, 2  ;;  %s424_s22 = scalar_lea.vmem (%p3795_p3), [#allocation3], %s2903_s20 }
  0x34   : > { %s3831_s12 = scalar_lea.vmem %s4745_s1, %s2906_s21 }
  0x35   : > { %v445_v0 = vld [vmem:[%s3831_s12] sm:$0xf]  ;;  %v447_v1 = vld [vmem:[%s3831_s12 + $0x8] sm:$0xf]  ;;  %v449_v2 = vld [vmem:[%s3831_s12 + $0x10] sm:$0xf] }
  0x36   : > { %446 = vst [vmem:[%s424_s22] sm:$0xf] %v445_v0  ;;  %448 = vst [vmem:[%s424_s22 + $0x4] sm:$0xf] %v447_v1  ;;  %v451_v3 = vld [vmem:[%s3831_s12 + $0x18] sm:$0xf] }
  0x37   : > { %450 = vst [vmem:[%s424_s22 + $0x8] sm:$0xf] %v449_v2  ;;  %v453_v4 = vld [vmem:[%s3831_s12 + $0x20] sm:$0xf]  ;;  %v455_v5 = vld [vmem:[%s3831_s12 + $0x28] sm:$0xf] }
  0x38   : > { %452 = vst [vmem:[%s424_s22 + $0xc] sm:$0xf] %v451_v3  ;;  %454 = vst [vmem:[%s424_s22 + $0x10] sm:$0xf] %v453_v4  ;;  %v457_v6 = vld [vmem:[%s3831_s12 + $0x30] sm:$0xf] }
  0x39   : > { %456 = vst [vmem:[%s424_s22 + $0x14] sm:$0xf] %v455_v5  ;;  %v459_v7 = vld [vmem:[%s3831_s12 + $0x38] sm:$0xf]  ;;  %v461_v8 = vld [vmem:[%s3831_s12 + $0x40] sm:$0xf] }
  0x3a   : > { %458 = vst [vmem:[%s424_s22 + $0x18] sm:$0xf] %v457_v6  ;;  %460 = vst [vmem:[%s424_s22 + $0x1c] sm:$0xf] %v459_v7  ;;  %v463_v9 = vld [vmem:[%s3831_s12 + $0x48] sm:$0xf] }
  0x3b   : > { %462 = vst [vmem:[%s424_s22 + $0x20] sm:$0xf] %v461_v8  ;;  %v465_v10 = vld [vmem:[%s3831_s12 + $0x50] sm:$0xf]  ;;  %v467_v11 = vld [vmem:[%s3831_s12 + $0x58] sm:$0xf] }
  0x3c   : > { %464 = vst [vmem:[%s424_s22 + $0x24] sm:$0xf] %v463_v9  ;;  %466 = vst [vmem:[%s424_s22 + $0x28] sm:$0xf] %v465_v10  ;;  %v469_v12 = vld [vmem:[%s3831_s12 + $0x60] sm:$0xf] }
  0x3d   : > { %468 = vst [vmem:[%s424_s22 + $0x2c] sm:$0xf] %v467_v11  ;;  %v471_v13 = vld [vmem:[%s3831_s12 + $0x68] sm:$0xf]  ;;  %v473_v14 = vld [vmem:[%s3831_s12 + $0x70] sm:$0xf] }
  0x3e   : > { %470 = vst [vmem:[%s424_s22 + $0x30] sm:$0xf] %v469_v12  ;;  %472 = vst [vmem:[%s424_s22 + $0x34] sm:$0xf] %v471_v13  ;;  %v475_v15 = vld [vmem:[%s3831_s12 + $0x78] sm:$0xf] }
  0x3f   : > { %474 = vst [vmem:[%s424_s22 + $0x38] sm:$0xf] %v473_v14  ;;  %476 = vst [vmem:[%s424_s22 + $0x3c] sm:$0xf] %v475_v15 }
  0x40 PF: > { %p2907_p0 = scmp.ge.s32.totalorder %s3653_s17, 1  ;;  %p530_p1 = scmp.lt.s32.totalorder %s3653_s17, 5 }
  0x42   : > { %p531_p2 = pnand %p2907_p0, %p530_p1 }
  0x43   : > { %s537_s6 = sand.u32 (!%p531_p2), 1, %s3629_s28   ;;  %s3853_s25 = sand.u32 (!%p531_p2), 1, %s3621_s26  }
  0x44   : > { %534 = sbr.rel (%p531_p2) target bundleno = 1298 (0x512), region = 93  ;;  %s2908_s21 = sshll.u32 (!%p531_p2), %s537_s6, 6 }
  0x45   : > { %s2909_s24 = sshll.u32 (!%p531_p2), %s3853_s25, 7  ;;  %s2911_s19 = sshll.u32 (!%p531_p2), %s3637_s30, 4 }
  0x46   : > { %p607_p3 = scmp.lt.s32.totalorder (!%p531_p2), %s2911_s19, 31  ;;  %s2913_s8 = sshll.u32 (!%p531_p2), %s3641_s14, 4 }
  0x47   : > { %p614_p4 = scmp.lt.s32.totalorder (!%p531_p2), %s2913_s8, 31  ;;  %s3880_s23 = scalar_lea.vmem (!%p531_p2), [#allocation4], %s2909_s24 }
  0x48   : > { %s3882_s12 = scalar_lea.vmem (!%p531_p2), [#allocation6], %s2909_s24  ;;  %p2919_p5 = scmp.ne.s32.totalorder (!%p531_p2), %s3637_s30, 0 }
  0x4b   : > { %s4771_s19 = smov (!%p607_p3, %s2911_s19), 31  ;;  %s4773_s8 = smov (!%p614_p4, %s2913_s8), 31 }
  0x4c   : > { %s2912_s20 = sshll.u32 %s4771_s19, 2  ;;  %s2914_s1 = sshll.u32 %s4773_s8, 3  ;;  %v3655_v16 = vmov (!%p2919_p5), 0.0  }
  0x4d   : > { %s3861_s22 = scalar_lea.vmem %s4697_s0, %s2912_s20  ;;  %s3866_s15 = scalar_lea.vmem %s4706_s9, %s2914_s1  ;;  %639 = vst [vmem:[#allocation2] sm:$0xff] (!%p2919_p5), %v3655_v16  ;;  %640 = vst [vmem:[#allocation2 + $0x8] sm:$0xff] (!%p2919_p5), %v3655_v16 }
  0x4e   : > { %s2916_s6 = sshll.u32 %s4773_s8, 2  ;;  %s3173_s27 = smul.u32 24, %s4773_s8  ;;  %641 = vst [vmem:[#allocation2 + $0x10] sm:$0xff] (!%p2919_p5), %v3655_v16  ;;  %642 = vst [vmem:[#allocation2 + $0x18] sm:$0xff] (!%p2919_p5), %v3655_v16 }
  0x4f   : > { %s3871_s5 = scalar_lea.vmem %s4708_s11, %s2916_s6  ;;  %s3878_s20 = scalar_lea.vmem [#allocation3], %s2908_s21  ;;  %643 = vst [vmem:[#allocation2 + $0x20] sm:$0xff] (!%p2919_p5), %v3655_v16  ;;  %644 = vst [vmem:[#allocation2 + $0x28] sm:$0xff] (!%p2919_p5), %v3655_v16 }
  0x50   : > { %s3876_s17 = scalar_lea.vmem %s4710_s13, %s3173_s27  ;;  %638 = sbr.rel (%p2919_p5) target bundleno = 93 (0x5d), region = 101  ;;  %645 = vst [vmem:[#allocation2 + $0x30] sm:$0xff] (!%p2919_p5), %v3655_v16  ;;  %646 = vst [vmem:[#allocation2 + $0x38] sm:$0xff] (!%p2919_p5), %v3655_v16 }
  0x51   : > { %647 = vst [vmem:[#allocation2 + $0x40] sm:$0xff] (!%p2919_p5), %v3655_v16  ;;  %648 = vst [vmem:[#allocation2 + $0x48] sm:$0xff] (!%p2919_p5), %v3655_v16 }
  0x52   : > { %649 = vst [vmem:[#allocation2 + $0x50] sm:$0xff] (!%p2919_p5), %v3655_v16  ;;  %650 = vst [vmem:[#allocation2 + $0x58] sm:$0xff] (!%p2919_p5), %v3655_v16 }
  0x53   : > { %651 = vst [vmem:[#allocation2 + $0x60] sm:$0xff] (!%p2919_p5), %v3655_v16  ;;  %652 = vst [vmem:[#allocation2 + $0x68] sm:$0xff] (!%p2919_p5), %v3655_v16 }
  0x54   : > { %653 = vst [vmem:[#allocation2 + $0x70] sm:$0xff] (!%p2919_p5), %v3655_v16  ;;  %654 = vst [vmem:[#allocation2 + $0x78] sm:$0xff] (!%p2919_p5), %v3655_v16 }
  0x55   : > { %655 = vst [vmem:[#allocation2 + $0x80] sm:$0xff] (!%p2919_p5), %v3655_v16  ;;  %656 = vst [vmem:[#allocation2 + $0x88] sm:$0xff] (!%p2919_p5), %v3655_v16 }
  0x56   : > { %657 = vst [vmem:[#allocation2 + $0x90] sm:$0xff] (!%p2919_p5), %v3655_v16  ;;  %658 = vst [vmem:[#allocation2 + $0x98] sm:$0xff] (!%p2919_p5), %v3655_v16 }
  0x57   : > { %659 = vst [vmem:[#allocation2 + $0xa0] sm:$0xff] %v3655_v16  ;;  %660 = vst [vmem:[#allocation2 + $0xa8] sm:$0xff] %v3655_v16 }
  0x58   : > { %661 = vst [vmem:[#allocation2 + $0xb0] sm:$0xff] %v3655_v16  ;;  %662 = vst [vmem:[#allocation2 + $0xb8] sm:$0xff] %v3655_v16 }
  0x59   : > { %663 = vst [vmem:[#allocation2 + $0xc0] sm:$0xff] %v3655_v16  ;;  %664 = vst [vmem:[#allocation2 + $0xc8] sm:$0xff] %v3655_v16 }
  0x5a   : > { %665 = vst [vmem:[#allocation2 + $0xd0] sm:$0xff] %v3655_v16  ;;  %666 = vst [vmem:[#allocation2 + $0xd8] sm:$0xff] %v3655_v16 }
  0x5b   : > { %667 = vst [vmem:[#allocation2 + $0xe0] sm:$0xff] %v3655_v16  ;;  %668 = vst [vmem:[#allocation2 + $0xe8] sm:$0xff] %v3655_v16 }
  0x5c   : > { %669 = vst [vmem:[#allocation2 + $0xf0] sm:$0xff] %v3655_v16  ;;  %670 = vst [vmem:[#allocation2 + $0xf8] sm:$0xff] %v3655_v16 }
  0x5d PF: > { %v3271_v17 = vld [vmem:[%s4699_s2 + $0x4] ss:$8 sps:$4 sm:$0xff]   ;;  %v3273_v18 = vld [vmem:[%s4699_s2] ss:$8 sps:$4 sm:$0xff]   ;;  %v3656_v19 = vmov 0   ;;  %v3297_v36 = vld [vmem:[%s3861_s22 + $0x10] sm:$0xff]  }
  0x5e   : > { %863 = vmatprep.mubr.bf16.mxu0 %v3656_v19  ;;  %1088 = vmatprep.mubr.bf16.mxu1 %v3656_v19  ;;  %v3274_v20 = vld [vmem:[%s4699_s2 + $0x14] ss:$8 sps:$4 sm:$0xff]   ;;  %v3276_v21 = vld [vmem:[%s4699_s2 + $0x10] ss:$8 sps:$4 sm:$0xff]   ;;  %v3277_v22 = vld [vmem:[%s4699_s2 + $0x24] ss:$8 sps:$4 sm:$0xff]  }
  0x5f   : > { %831 = vmatprep.subr.bf16.mxu0 %v3271_v17  ;;  %v3279_v23 = vld [vmem:[%s4699_s2 + $0x20] ss:$8 sps:$4 sm:$0xff]   ;;  %v3280_v24 = vld [vmem:[%s4699_s2 + $0x34] ss:$8 sps:$4 sm:$0xff]   ;;  %v3282_v25 = vld [vmem:[%s4699_s2 + $0x30] ss:$8 sps:$4 sm:$0xff]  }
  0x60   : > { %832 = vmatpush1.bf16.msra.mxu0 %v3273_v18  ;;  %v3283_v26 = vld [vmem:[%s4699_s2 + $0x44] ss:$8 sps:$4 sm:$0xff]   ;;  %v3285_v27 = vld [vmem:[%s4699_s2 + $0x40] ss:$8 sps:$4 sm:$0xff]   ;;  %v3286_v28 = vld [vmem:[%s4699_s2 + $0x54] ss:$8 sps:$4 sm:$0xff]  }
  0x61   : > { %833 = vmatprep.subr.bf16.mxu0 %v3274_v20  ;;  %v3288_v29 = vld [vmem:[%s4699_s2 + $0x50] ss:$8 sps:$4 sm:$0xff]   ;;  %v3289_v30 = vld [vmem:[%s4699_s2 + $0x64] ss:$8 sps:$4 sm:$0xff]   ;;  %v3291_v31 = vld [vmem:[%s4699_s2 + $0x60] ss:$8 sps:$4 sm:$0xff]  }
  0x62   : > { %v3292_v32 = vld [vmem:[%s4699_s2 + $0x74] ss:$8 sps:$4 sm:$0xff]   ;;  %v3294_v33 = vld [vmem:[%s4699_s2 + $0x70] ss:$8 sps:$4 sm:$0xff]   ;;  %v3295_v34 = vld [vmem:[%s3861_s22] sm:$0xff]   ;;  %p2952_p6 = scmp.ne.s32.totalorder %s3637_s30, 1 }
  0x63   : > { %v3296_v35 = vld [vmem:[%s3861_s22 + $0x8] sm:$0xff]   ;;  %v3298_v37 = vld [vmem:[%s3861_s22 + $0x18] sm:$0xff]   ;;  %v3299_v38 = vld [vmem:[%s3861_s22 + $0x20] sm:$0xff]   ;;  %s4746_s6 = sld [smem:[#allocation23_spill]] (!%p2952_p6)  ;;  %s4747_s1 = sld [smem:[#allocation24_spill]] (!%p2952_p6) }
  0x64   : > { %834 = vmatpush1.bf16.msra.mxu0 %v3276_v21  ;;  %v3300_v39 = vld [vmem:[%s3861_s22 + $0x28] sm:$0xff]   ;;  %v3301_v40 = vld [vmem:[%s3861_s22 + $0x30] sm:$0xff]   ;;  %v3302_v41 = vld [vmem:[%s3861_s22 + $0x38] sm:$0xff]   ;;  %s4748_s29 = sld [smem:[#allocation25_spill]] (!%p2952_p6) }
  0x65   : > { %835 = vmatprep.subr.bf16.mxu0 %v3277_v22 }
  0x68   : > { %836 = vmatpush1.bf16.msra.mxu0 %v3279_v23 }
  0x69   : > { %837 = vmatprep.subr.bf16.mxu0 %v3280_v24 }
  0x6c   : > { %838 = vmatpush1.bf16.msra.mxu0 %v3282_v25 }
  0x6d   : > { %839 = vmatprep.subr.bf16.mxu0 %v3283_v26 }
  0x70   : > { %840 = vmatpush1.bf16.msra.mxu0 %v3285_v27  ;;  %v3303_v27 = vld [vmem:[%s3878_s20] sm:$0xff]  }
  0x71   : > { %841 = vmatprep.subr.bf16.mxu0 %v3286_v28  ;;  %v3304_v28 = vld [vmem:[%s3878_s20 + $0x8] sm:$0xff]  }
  0x74   : > { %842 = vmatpush1.bf16.msra.mxu0 %v3288_v29  ;;  %v3305_v29 = vld [vmem:[%s3878_s20 + $0x10] sm:$0xff]  }
  0x75   : > { %843 = vmatprep.subr.bf16.mxu0 %v3289_v30  ;;  %v3306_v30 = vld [vmem:[%s3878_s20 + $0x18] sm:$0xff]  }
  0x78   : > { %844 = vmatpush1.bf16.msra.mxu0 %v3291_v31  ;;  %v3307_v31 = vld [vmem:[%s3878_s20 + $0x20] sm:$0xff]  }
  0x79   : > { %845 = vmatprep.subr.bf16.mxu0 %v3292_v32  ;;  %v3308_v32 = vld [vmem:[%s3878_s20 + $0x28] sm:$0xff]  }
  0x7c   : > { %846 = vmatpush1.bf16.msra.mxu0 %v3294_v33  ;;  %v3309_v33 = vld [vmem:[%s3878_s20 + $0x30] sm:$0xff]  }
  0x7f   : > { %864 = vmatmul.mubr.bf16.vlgmr.msra.gmra.mrb[0].mxu0 %v3295_v34  ;;  %v3310_v34 = vld [vmem:[%s3878_s20 + $0x38] sm:$0xff]  }
  0x80   : > { %873 = vmatprep.mubr.bf16.mxu0 %v3656_v19 }
  0x87   : > { %874 = vmatmul.mubr.bf16.gmra.mrb[4].mxu0 %v3296_v35  ;;  %v944_v35 = vld [vmem:[#allocation2] sm:$0xff] }
  0x88   : > { %883 = vmatprep.mubr.bf16.mxu0 %v3656_v19 }
  0x8f   : > { %884 = vmatmul.mubr.bf16.gmra.mrb[8].mxu0 %v3297_v36  ;;  %v945_v36 = vld [vmem:[#allocation2 + $0x8] sm:$0xff] }
  0x90   : > { %893 = vmatprep.mubr.bf16.mxu0 %v3656_v19 }
  0x97   : > { %894 = vmatmul.mubr.bf16.gmra.mrb[12].mxu0 %v3298_v37 }
  0x98   : > { %903 = vmatprep.mubr.bf16.mxu0 %v3656_v19 }
  0x9f   : > { %904 = vmatmul.mubr.bf16.gmra.mrb[16].mxu0 %v3299_v38  ;;  %v946_v38 = vld [vmem:[#allocation2 + $0x10] sm:$0xff] }
  0xa0   : > { %913 = vmatprep.mubr.bf16.mxu0 %v3656_v19 }
  0xa7   : > { %914 = vmatmul.mubr.bf16.gmra.mrb[20].mxu0 %v3300_v39 }
  0xa8   : > { %923 = vmatprep.mubr.bf16.mxu0 %v3656_v19 }
  0xaf   : > { %924 = vmatmul.mubr.bf16.gmra.mrb[24].mxu0 %v3301_v40 }
  0xb0   : > { %933 = vmatprep.mubr.bf16.mxu0 %v3656_v19 }
  0xb7   : > { %934 = vmatmul.mubr.bf16.gmra.mrb[28].mxu0 %v3302_v41  ;;  %v947_v41 = vld [vmem:[#allocation2 + $0x18] sm:$0xff] }
 0x152   : > { %v865_v42 = vpop.f32.mrb[0].mxu0 }
 0x153   : > { %v867_v43 = vpop.f32.mrb[1].mxu0 }
 0x154   : > { %v869_v44 = vpop.f32.mrb[2].mxu0 }
 0x155   : > { %v992_v45 = vpack.c.bf16 %v869_v44, %v865_v42  ;;  %v871_v46 = vpop.f32.mrb[3].mxu0 }
 0x156   : > { %v993_v47 = vpack.c.bf16 %v871_v46, %v867_v43 }
 0x158   : > { %1056 = vmatprep.subr.bf16.mxu1 %v993_v47  ;;  %v948_v47 = vld [vmem:[#allocation2 + $0x20] sm:$0xff] }
 0x159   : > { %1057 = vmatpush1.bf16.msra.mxu1 %v992_v45 }
 0x15a   : > { %v875_v48 = vpop.f32.mrb[4].mxu0 }
 0x15b   : > { %v877_v49 = vpop.f32.mrb[5].mxu0 }
 0x15c   : > { %v879_v50 = vpop.f32.mrb[6].mxu0 }
 0x15d   : > { %v994_v51 = vpack.c.bf16 %v879_v50, %v875_v48  ;;  %v881_v52 = vpop.f32.mrb[7].mxu0 }
 0x15e   : > { %v995_v53 = vpack.c.bf16 %v881_v52, %v877_v49  ;;  %v950_v49 = vld [vmem:[#allocation2 + $0x30] sm:$0xff]  ;;  %v951_v52 = vld [vmem:[#allocation2 + $0x38] sm:$0xff] }
 0x160   : > { %1058 = vmatprep.subr.bf16.mxu1 %v995_v53 }
 0x161   : > { %1059 = vmatpush1.bf16.msra.mxu1 %v994_v51 }
 0x162   : > { %v885_v54 = vpop.f32.mrb[8].mxu0 }
 0x163   : > { %v887_v55 = vpop.f32.mrb[9].mxu0 }
 0x164   : > { %v889_v56 = vpop.f32.mrb[10].mxu0 }
 0x165   : > { %v996_v57 = vpack.c.bf16 %v889_v56, %v885_v54  ;;  %v891_v58 = vpop.f32.mrb[11].mxu0 }
 0x166   : > { %v997_v59 = vpack.c.bf16 %v891_v58, %v887_v55  ;;  %v952_v58 = vld [vmem:[#allocation2 + $0x40] sm:$0xff] }
 0x168   : > { %1060 = vmatprep.subr.bf16.mxu1 %v997_v59  ;;  %v953_v59 = vld [vmem:[#allocation2 + $0x48] sm:$0xff] }
 0x169   : > { %1061 = vmatpush1.bf16.msra.mxu1 %v996_v57 }
 0x16a   : > { %v895_v60 = vpop.f32.mrb[12].mxu0 }
 0x16b   : > { %v897_v61 = vpop.f32.mrb[13].mxu0 }
 0x16c   : > { %v899_v62 = vpop.f32.mrb[14].mxu0 }
 0x16d   : > { %v998_v63 = vpack.c.bf16 %v899_v62, %v895_v60  ;;  %v901_v0 = vpop.f32.mrb[15].mxu0 }
 0x16e   : > { %v999_v1 = vpack.c.bf16 %v901_v0, %v897_v61  ;;  %v954_v61 = vld [vmem:[#allocation2 + $0x50] sm:$0xff]  ;;  %v955_v0 = vld [vmem:[#allocation2 + $0x58] sm:$0xff] }
 0x170   : > { %1062 = vmatprep.subr.bf16.mxu1 %v999_v1 }
 0x171   : > { %1063 = vmatpush1.bf16.msra.mxu1 %v998_v63 }
 0x172   : > { %v905_v2 = vpop.f32.mrb[16].mxu0 }
 0x173   : > { %v907_v3 = vpop.f32.mrb[17].mxu0 }
 0x174   : > { %v909_v4 = vpop.f32.mrb[18].mxu0 }
 0x175   : > { %v1000_v5 = vpack.c.bf16 %v909_v4, %v905_v2  ;;  %v911_v6 = vpop.f32.mrb[19].mxu0 }
 0x176   : > { %v1001_v7 = vpack.c.bf16 %v911_v6, %v907_v3  ;;  %v956_v6 = vld [vmem:[#allocation2 + $0x60] sm:$0xff] }
 0x178   : > { %1064 = vmatprep.subr.bf16.mxu1 %v1001_v7  ;;  %v957_v7 = vld [vmem:[#allocation2 + $0x68] sm:$0xff] }
 0x179   : > { %1065 = vmatpush1.bf16.msra.mxu1 %v1000_v5 }
 0x17a   : > { %v915_v8 = vpop.f32.mrb[20].mxu0 }
 0x17b   : > { %v917_v9 = vpop.f32.mrb[21].mxu0 }
 0x17c   : > { %v919_v10 = vpop.f32.mrb[22].mxu0 }
 0x17d   : > { %v1002_v11 = vpack.c.bf16 %v919_v10, %v915_v8  ;;  %v921_v12 = vpop.f32.mrb[23].mxu0 }
 0x17e   : > { %v1003_v13 = vpack.c.bf16 %v921_v12, %v917_v9  ;;  %v958_v9 = vld [vmem:[#allocation2 + $0x70] sm:$0xff]  ;;  %v959_v12 = vld [vmem:[#allocation2 + $0x78] sm:$0xff] }
 0x180   : > { %1066 = vmatprep.subr.bf16.mxu1 %v1003_v13 }
 0x181   : > { %1067 = vmatpush1.bf16.msra.mxu1 %v1002_v11 }
 0x182   : > { %v925_v14 = vpop.f32.mrb[24].mxu0 }
 0x183   : > { %v927_v15 = vpop.f32.mrb[25].mxu0 }
 0x184   : > { %v929_v16 = vpop.f32.mrb[26].mxu0 }
 0x185   : > { %v1004_v17 = vpack.c.bf16 %v929_v16, %v925_v14  ;;  %v931_v18 = vpop.f32.mrb[27].mxu0 }
 0x186   : > { %v1005_v20 = vpack.c.bf16 %v931_v18, %v927_v15  ;;  %v960_v18 = vld [vmem:[#allocation2 + $0x80] sm:$0xff] }
 0x188   : > { %1068 = vmatprep.subr.bf16.mxu1 %v1005_v20  ;;  %v961_v20 = vld [vmem:[#allocation2 + $0x88] sm:$0xff] }
 0x189   : > { %1069 = vmatpush1.bf16.msra.mxu1 %v1004_v17 }
 0x18a   : > { %v935_v21 = vpop.f32.mrb[28].mxu0 }
 0x18b   : > { %v937_v22 = vpop.f32.mrb[29].mxu0 }
 0x18c   : > { %v939_v23 = vpop.f32.mrb[30].mxu0 }
 0x18d   : > { %v1006_v24 = vpack.c.bf16 %v939_v23, %v935_v21  ;;  %v941_v25 = vpop.f32.mrb[31].mxu0 }
 0x18e   : > { %v1007_v26 = vpack.c.bf16 %v941_v25, %v937_v22  ;;  %v962_v22 = vld [vmem:[#allocation2 + $0x90] sm:$0xff]  ;;  %v963_v25 = vld [vmem:[#allocation2 + $0x98] sm:$0xff] }
 0x190   : > { %1070 = vmatprep.subr.bf16.mxu1 %v1007_v26 }
 0x191   : > { %1071 = vmatpush1.bf16.msra.mxu1 %v1006_v24 }
 0x194   : > { %1089 = vmatmul.mubr.bf16.vlgmr.msra.gmra.mrb[0].mxu1 %v3303_v27 }
 0x195   : > { %1098 = vmatprep.mubr.bf16.mxu1 %v3656_v19 }
 0x19c   : > { %1099 = vmatmul.mubr.bf16.gmra.mrb[4].mxu1 %v3304_v28 }
 0x19d   : > { %1108 = vmatprep.mubr.bf16.mxu1 %v3656_v19 }
 0x1a4   : > { %1109 = vmatmul.mubr.bf16.gmra.mrb[8].mxu1 %v3305_v29 }
 0x1a5   : > { %1118 = vmatprep.mubr.bf16.mxu1 %v3656_v19 }
 0x1ac   : > { %1119 = vmatmul.mubr.bf16.gmra.mrb[12].mxu1 %v3306_v30 }
 0x1ad   : > { %1128 = vmatprep.mubr.bf16.mxu1 %v3656_v19 }
 0x1b4   : > { %1129 = vmatmul.mubr.bf16.gmra.mrb[16].mxu1 %v3307_v31  ;;  %v964_v31 = vld [vmem:[#allocation2 + $0xa0] sm:$0xff] }
 0x1b5   : > { %1138 = vmatprep.mubr.bf16.mxu1 %v3656_v19 }
 0x1bc   : > { %1139 = vmatmul.mubr.bf16.gmra.mrb[20].mxu1 %v3308_v32  ;;  %v965_v32 = vld [vmem:[#allocation2 + $0xa8] sm:$0xff] }
 0x1bd   : > { %1148 = vmatprep.mubr.bf16.mxu1 %v3656_v19 }
 0x1c4   : > { %1149 = vmatmul.mubr.bf16.gmra.mrb[24].mxu1 %v3309_v33 }
 0x1c5   : > { %1158 = vmatprep.mubr.bf16.mxu1 %v3656_v19  ;;  %v949_v19 = vld [vmem:[#allocation2 + $0x28] sm:$0xff] }
 0x1cc   : > { %1159 = vmatmul.mubr.bf16.gmra.mrb[28].mxu1 %v3310_v34  ;;  %v966_v34 = vld [vmem:[#allocation2 + $0xb0] sm:$0xff] }
 0x267   : > { %v1090_v37 = vpop.f32.mrb[0].mxu1 }
 0x268   : > { %v1169_v39 = vadd.f32 %v1090_v37, %v944_v35  ;;  %v1092_v40 = vpop.f32.mrb[1].mxu1  ;;  %v967_v37 = vld [vmem:[#allocation2 + $0xb8] sm:$0xff] }
 0x269   : > { %v1170_v42 = vadd.f32 %v1092_v40, %v945_v36  ;;  %v1094_v43 = vpop.f32.mrb[2].mxu1 }
 0x26a   : > { %1201 = vst [vmem:[#allocation2] sm:$0xff] %v1169_v39  ;;  %v1171_v44 = vadd.f32 %v1094_v43, %v946_v38  ;;  %v1096_v45 = vpop.f32.mrb[3].mxu1  ;;  %v968_v43 = vld [vmem:[#allocation2 + $0xc0] sm:$0xff] }
 0x26b   : > { %1202 = vst [vmem:[#allocation2 + $0x8] sm:$0xff] %v1170_v42  ;;  %v1172_v46 = vadd.f32 %v1096_v45, %v947_v41 }
 0x26c   : > { %1203 = vst [vmem:[#allocation2 + $0x10] sm:$0xff] %v1171_v44  ;;  %v969_v44 = vld [vmem:[#allocation2 + $0xc8] sm:$0xff] }
 0x26d   : > { %1204 = vst [vmem:[#allocation2 + $0x18] sm:$0xff] %v1172_v46  ;;  %v970_v46 = vld [vmem:[#allocation2 + $0xd0] sm:$0xff] }
 0x26f   : > { %v1100_v48 = vpop.f32.mrb[4].mxu1 }
 0x270   : > { %v1173_v50 = vadd.f32 %v1100_v48, %v948_v47  ;;  %v1102_v51 = vpop.f32.mrb[5].mxu1  ;;  %v971_v48 = vld [vmem:[#allocation2 + $0xd8] sm:$0xff] }
 0x271   : > { %v1174_v53 = vadd.f32 %v1102_v51, %v949_v19  ;;  %v1104_v54 = vpop.f32.mrb[6].mxu1 }
 0x272   : > { %1205 = vst [vmem:[#allocation2 + $0x20] sm:$0xff] %v1173_v50  ;;  %v1175_v55 = vadd.f32 %v1104_v54, %v950_v49  ;;  %v1106_v56 = vpop.f32.mrb[7].mxu1  ;;  %v972_v54 = vld [vmem:[#allocation2 + $0xe0] sm:$0xff] }
 0x273   : > { %1206 = vst [vmem:[#allocation2 + $0x28] sm:$0xff] %v1174_v53  ;;  %v1176_v57 = vadd.f32 %v1106_v56, %v951_v52 }
 0x274   : > { %1207 = vst [vmem:[#allocation2 + $0x30] sm:$0xff] %v1175_v55  ;;  %v973_v55 = vld [vmem:[#allocation2 + $0xe8] sm:$0xff] }
 0x275   : > { %1208 = vst [vmem:[#allocation2 + $0x38] sm:$0xff] %v1176_v57  ;;  %v974_v57 = vld [vmem:[#allocation2 + $0xf0] sm:$0xff] }
 0x277   : > { %v1110_v60 = vpop.f32.mrb[8].mxu1 }
 0x278   : > { %v1177_v62 = vadd.f32 %v1110_v60, %v952_v58  ;;  %v1112_v63 = vpop.f32.mrb[9].mxu1  ;;  %v975_v60 = vld [vmem:[#allocation2 + $0xf8] sm:$0xff] }
 0x279   : > { %v1178_v1 = vadd.f32 %v1112_v63, %v953_v59  ;;  %v1114_v2 = vpop.f32.mrb[10].mxu1 }
 0x27a   : > { %1209 = vst [vmem:[#allocation2 + $0x40] sm:$0xff] %v1177_v62  ;;  %v1179_v3 = vadd.f32 %v1114_v2, %v954_v61  ;;  %v1116_v4 = vpop.f32.mrb[11].mxu1  ;;  %v3311_v2 = vld [vmem:[%s4701_s4] sm:$0xff] (!%p2952_p6)  }
 0x27b   : > { %1210 = vst [vmem:[#allocation2 + $0x48] sm:$0xff] %v1178_v1  ;;  %v1180_v5 = vadd.f32 %v1116_v4, %v955_v0  ;;  %v3312_v4 = vld [vmem:[%s4701_s4 + $0x8] sm:$0xff] (!%p2952_p6)   ;;  %3109 = vmatprep.subr.bf16.mxu0 (!%p2952_p6), %v3311_v2 }
 0x27c   : > { %1211 = vst [vmem:[#allocation2 + $0x50] sm:$0xff] %v1179_v3  ;;  %v1271_v3 = vlaneseq (!%p2952_p6)  ;;  %3110 = vmatpush3.bf16.msra.mxu0 (!%p2952_p6), %v3311_v2 }
 0x27d   : > { %1212 = vst [vmem:[#allocation2 + $0x58] sm:$0xff] %v1180_v5  ;;  %3111 = vmatprep.subr.bf16.mxu0 (!%p2952_p6), %v3312_v4 }
 0x27e   : > { %v3972_v5 = vshrl.u32 (!%p2952_p6), %v1271_v3, 7  ;;  %v3318_v3 = vld [vmem:[%s4701_s4 + $0x38] sm:$0xff] (!%p2952_p6)  }
 0x27f   : > { %v1120_v8 = vpop.f32.mrb[12].mxu1 }
 0x280   : > { %v1181_v10 = vadd.f32 %v1120_v8, %v956_v6  ;;  %v1122_v11 = vpop.f32.mrb[13].mxu1  ;;  %v3313_v6 = vld [vmem:[%s4701_s4 + $0x10] sm:$0xff] (!%p2952_p6)   ;;  %3112 = vmatpush3.bf16.msra.mxu0 (!%p2952_p6), %v3312_v4  ;;  %v3314_v8 = vld [vmem:[%s4701_s4 + $0x18] sm:$0xff] (!%p2952_p6)  }
 0x281   : > { %v1182_v13 = vadd.f32 %v1122_v11, %v957_v7  ;;  %v1124_v14 = vpop.f32.mrb[14].mxu1  ;;  %v1273_v7 = vsub.s32 (!%p2952_p6), 0, %v3972_v5  ;;  %3113 = vmatprep.subr.bf16.mxu0 (!%p2952_p6), %v3313_v6  ;;  %v3984_v11 = vld [vmem:[%s4700_s3] sm:$0x3] (!%p2952_p6) }
 0x282   : > { %1213 = vst [vmem:[#allocation2 + $0x60] sm:$0xff] %v1181_v10  ;;  %v1183_v15 = vadd.f32 %v1124_v14, %v958_v9  ;;  %v1126_v16 = vpop.f32.mrb[15].mxu1  ;;  %v1237_v9 = vld [vmem:[#allocation2] sm:$0xff] (!%p2952_p6)  ;;  %v1239_v10 = vld [vmem:[#allocation2 + $0x10] sm:$0xff] (!%p2952_p6) }
 0x283   : > { %1214 = vst [vmem:[#allocation2 + $0x68] sm:$0xff] %v1182_v13  ;;  %v1184_v17 = vadd.f32 %v1126_v16, %v959_v12  ;;  %v3989_v12 = vrot.slane (!%p2952_p6), %v3984_v11, %v1273_v7  ;;  %v1241_v13 = vld [vmem:[#allocation2 + $0x20] sm:$0xff] (!%p2952_p6)  ;;  %v1243_v14 = vld [vmem:[#allocation2 + $0x30] sm:$0xff] (!%p2952_p6) }
 0x284   : > { %1215 = vst [vmem:[#allocation2 + $0x70] sm:$0xff] %v1183_v15  ;;  %v1245_v15 = vld [vmem:[#allocation2 + $0x40] sm:$0xff] (!%p2952_p6)  ;;  %v1247_v16 = vld [vmem:[#allocation2 + $0x50] sm:$0xff] (!%p2952_p6)  ;;  %3114 = vmatpush3.bf16.msra.mxu0 (!%p2952_p6), %v3313_v6 }
 0x285   : > { %1216 = vst [vmem:[#allocation2 + $0x78] sm:$0xff] %v1184_v17  ;;  %3115 = vmatprep.subr.bf16.mxu0 (!%p2952_p6), %v3314_v8 }
 0x287   : > { %v1130_v21 = vpop.f32.mrb[16].mxu1 }
 0x288   : > { %v1185_v23 = vadd.f32 %v1130_v21, %v960_v18  ;;  %v1132_v24 = vpop.f32.mrb[17].mxu1  ;;  %v1283_v21 = vadd.f32 (!%p2952_p6), %v3989_v12, %v1239_v10  ;;  %3116 = vmatpush3.bf16.msra.mxu0 (!%p2952_p6), %v3314_v8 }
 0x289   : > { %v1186_v26 = vadd.f32 %v1132_v24, %v961_v20  ;;  %v1134_v27 = vpop.f32.mrb[18].mxu1  ;;  %v1249_v17 = vld [vmem:[#allocation2 + $0x60] sm:$0xff] (!%p2952_p6)  ;;  %v1281_v20 = vadd.f32 (!%p2952_p6), %v3989_v12, %v1237_v9 }
 0x28a   : > { %1217 = vst [vmem:[#allocation2 + $0x80] sm:$0xff] %v1185_v23  ;;  %v1187_v28 = vadd.f32 %v1134_v27, %v962_v22  ;;  %v1136_v29 = vpop.f32.mrb[19].mxu1  ;;  %v1285_v22 = vadd.f32 (!%p2952_p6), %v3989_v12, %v1241_v13  ;;  %v1287_v23 = vadd.f32 (!%p2952_p6), %v3989_v12, %v1243_v14  ;;  %v3315_v24 = vld [vmem:[%s4701_s4 + $0x20] sm:$0xff] (!%p2952_p6)   ;;  %v1293_v27 = vadd.f32 (!%p2952_p6), %v3989_v12, %v1249_v17 }
 0x28b   : > { %1218 = vst [vmem:[#allocation2 + $0x88] sm:$0xff] %v1186_v26  ;;  %v1188_v30 = vadd.f32 %v1136_v29, %v963_v25  ;;  %v1251_v18 = vld [vmem:[#allocation2 + $0x70] sm:$0xff] (!%p2952_p6)  ;;  %v1289_v25 = vadd.f32 (!%p2952_p6), %v3989_v12, %v1245_v15  ;;  %v1291_v26 = vadd.f32 (!%p2952_p6), %v3989_v12, %v1247_v16  ;;  %vm1313_vm0 = vcmp.ge.f32.partialorder (!%p2952_p6), %v1281_v20, 0.0  ;;  %3117 = vmatprep.subr.bf16.mxu0 (!%p2952_p6), %v3315_v24 }
 0x28c   : > { %1219 = vst [vmem:[#allocation2 + $0x90] sm:$0xff] %v1187_v28  ;;  %v1295_v28 = vadd.f32 (!%p2952_p6), %v3989_v12, %v1251_v18  ;;  %vm1315_vm1 = vcmp.ge.f32.partialorder (!%p2952_p6), %v1283_v21, 0.0  ;;  %v1345_v29 = vmul.f32 (!%p2952_p6), 0.01, %v1281_v20  ;;  %vm1317_vm2 = vcmp.ge.f32.partialorder (!%p2952_p6), %v1285_v22, 0.0  ;;  %3118 = vmatpush3.bf16.msra.mxu0 (!%p2952_p6), %v3315_v24 }
 0x28d   : > { %1220 = vst [vmem:[#allocation2 + $0x98] sm:$0xff] %v1188_v30  ;;  %v1347_v30 = vmul.f32 (!%p2952_p6), 0.01, %v1283_v21  ;;  %vm1319_vm3 = vcmp.ge.f32.partialorder (!%p2952_p6), %v1287_v23, 0.0  ;;  %vm1321_vm4 = vcmp.ge.f32.partialorder (!%p2952_p6), %v1289_v25, 0.0  ;;  %vm1323_vm5 = vcmp.ge.f32.partialorder (!%p2952_p6), %v1291_v26, 0.0 }
 0x28e   : > { %vm1325_vm6 = vcmp.ge.f32.partialorder (!%p2952_p6), %v1293_v27, 0.0  ;;  %vm1327_vm7 = vcmp.ge.f32.partialorder (!%p2952_p6), %v1295_v28, 0.0 }
 0x28f   : > { %v1140_v33 = vpop.f32.mrb[20].mxu1 }
 0x290   : > { %v1189_v35 = vadd.f32 %v1140_v33, %v964_v31  ;;  %v1142_v36 = vpop.f32.mrb[21].mxu1  ;;  %v1349_v33 = vmul.f32 (!%p2952_p6), 0.01, %v1285_v22 }
 0x291   : > { %v1190_v38 = vadd.f32 %v1142_v36, %v965_v32  ;;  %v1144_v39 = vpop.f32.mrb[22].mxu1  ;;  %v1253_v31 = vld [vmem:[#allocation2 + $0x80] sm:$0xff] (!%p2952_p6)  ;;  %v4005_v32 = vld [vmem:[%s4701_s4 + $0x28] sm:$0xff] (!%p2952_p6)   ;;  %v1377_v36 = vsel (!%p2952_p6), %vm1313_vm0, %v1281_v20, %v1345_v29 }
 0x292   : > { %1221 = vst [vmem:[#allocation2 + $0xa0] sm:$0xff] %v1189_v35  ;;  %v1191_v40 = vadd.f32 %v1144_v39, %v966_v34  ;;  %v1146_v41 = vpop.f32.mrb[23].mxu1  ;;  %v1351_v34 = vmul.f32 (!%p2952_p6), 0.01, %v1287_v23  ;;  %1409 = vst [vmem:[%s3866_s15] sm:$0xff] (!%p2952_p6), %v1377_v36  ;;  %3119 = vmatprep.subr.bf16.mxu0 (!%p2952_p6), %v4005_v32  ;;  %v3327_v20 = vld [vmem:[%s4704_s7 + $0x34] ss:$12 sps:$4 sm:$0xff] (!%p2952_p6)  }
 0x293   : > { %1222 = vst [vmem:[#allocation2 + $0xa8] sm:$0xff] %v1190_v38  ;;  %v1192_v42 = vadd.f32 %v1146_v41, %v967_v37  ;;  %v1255_v35 = vld [vmem:[#allocation2 + $0x90] sm:$0xff] (!%p2952_p6)  ;;  %v1379_v37 = vsel (!%p2952_p6), %vm1315_vm1, %v1283_v21, %v1347_v30  ;;  %v1381_v41 = vsel (!%p2952_p6), %vm1317_vm2, %v1285_v22, %v1349_v33  ;;  %3120 = vmatpush3.bf16.msra.mxu0 (!%p2952_p6), %v4005_v32 }
 0x294   : > { %1223 = vst [vmem:[#allocation2 + $0xb0] sm:$0xff] %v1191_v40  ;;  %1410 = vst [vmem:[%s3866_s15 + $0x8] sm:$0xff] (!%p2952_p6), %v1379_v37  ;;  %v1441_v40 = vpack.c.bf16 (!%p2952_p6), %v1379_v37, %v1377_v36  ;;  %v3329_v21 = vld [vmem:[%s4704_s7 + $0x30] ss:$12 sps:$4 sm:$0xff] (!%p2952_p6)   ;;  %v3333_v33 = vld [vmem:[%s4704_s7 + $0x48] ss:$12 sps:$4 sm:$0xff] (!%p2952_p6)  }
 0x295   : > { %1224 = vst [vmem:[#allocation2 + $0xb8] sm:$0xff] %v1192_v42  ;;  %v1383_v42 = vsel (!%p2952_p6), %vm1319_vm3, %v1287_v23, %v1351_v34  ;;  %1411 = vst [vmem:[%s3866_s15 + $0x10] sm:$0xff] (!%p2952_p6), %v1381_v41  ;;  %v3335_v36 = vld [vmem:[%s4704_s7 + $0x64] ss:$12 sps:$4 sm:$0xff] (!%p2952_p6)  }
 0x296   : > { %1412 = vst [vmem:[%s3866_s15 + $0x18] sm:$0xff] (!%p2952_p6), %v1383_v42  ;;  %3034 = vst [vmem:[%s3871_s5] sm:$0xff] (!%p2952_p6), %v1441_v40   ;;  %3125 = vmatprep.mubr.bf16.mxu0 (!%p2952_p6), %v1441_v40  ;;  %v3334_v40 = vld [vmem:[%s4704_s7 + $0x50] ss:$12 sps:$4 sm:$0xff] (!%p2952_p6)  }
 0x297   : > { %v1150_v45 = vpop.f32.mrb[24].mxu1 }
 0x298   : > { %v1193_v47 = vadd.f32 %v1150_v45, %v968_v43  ;;  %v1152_v19 = vpop.f32.mrb[25].mxu1  ;;  %v1353_v43 = vmul.f32 (!%p2952_p6), 0.01, %v1289_v25  ;;  %v4016_v45 = vpack.c.bf16 (!%p2952_p6), %v1383_v42, %v1381_v41  ;;  %v3338_v41 = vld [vmem:[%s4704_s7 + $0x68] ss:$12 sps:$4 sm:$0xff] (!%p2952_p6)  }
 0x299   : > { %v1194_v49 = vadd.f32 %v1152_v19, %v969_v44  ;;  %v1154_v50 = vpop.f32.mrb[26].mxu1  ;;  %v1257_v38 = vld [vmem:[#allocation2 + $0xa0] sm:$0xff] (!%p2952_p6)  ;;  %v4024_v19 = vld [vmem:[%s4701_s4 + $0x30] sm:$0xff] (!%p2952_p6)   ;;  %v3339_v42 = vld [vmem:[%s4704_s7 + $0x7c] ss:$12 sps:$4 sm:$0xff] (!%p2952_p6)  }
 0x29a   : > { %1225 = vst [vmem:[#allocation2 + $0xc0] sm:$0xff] %v1193_v47  ;;  %v1195_v51 = vadd.f32 %v1154_v50, %v970_v46  ;;  %v1156_v52 = vpop.f32.mrb[27].mxu1  ;;  %v3319_v44 = vld [vmem:[%s4704_s7 + $0x4] ss:$12 sps:$4 sm:$0xff] (!%p2952_p6)   ;;  %v1355_v46 = vmul.f32 (!%p2952_p6), 0.01, %v1291_v26  ;;  %3121 = vmatprep.subr.bf16.mxu0 (!%p2952_p6), %v4024_v19 }
 0x29b   : > { %1226 = vst [vmem:[#allocation2 + $0xc8] sm:$0xff] %v1194_v49  ;;  %v1196_v53 = vadd.f32 %v1156_v52, %v971_v48  ;;  %v1259_v39 = vld [vmem:[#allocation2 + $0xb0] sm:$0xff] (!%p2952_p6)  ;;  %v3321_v47 = vld [vmem:[%s4704_s7] ss:$12 sps:$4 sm:$0xff] (!%p2952_p6)   ;;  %v1385_v48 = vsel (!%p2952_p6), %vm1321_vm4, %v1289_v25, %v1353_v43  ;;  %v1357_v49 = vmul.f32 (!%p2952_p6), 0.01, %v1293_v27  ;;  %1977 = vmatprep.subr.bf16.mxu1 (!%p2952_p6), %v3319_v44  ;;  %3122 = vmatpush3.bf16.msra.mxu0 (!%p2952_p6), %v4024_v19 }
 0x29c   : > { %1227 = vst [vmem:[#allocation2 + $0xd0] sm:$0xff] %v1195_v51  ;;  %v1359_v50 = vmul.f32 (!%p2952_p6), 0.01, %v1295_v28  ;;  %v1297_v51 = vadd.f32 (!%p2952_p6), %v3989_v12, %v1253_v31  ;;  %3070 = vst [vmem:[%s3871_s5 + $0x8] sm:$0xff] (!%p2952_p6), %v4016_v45   ;;  %1978 = vmatpush1.bf16.msra.mxu1 (!%p2952_p6), %v3321_v47  ;;  %3123 = vmatprep.subr.bf16.mxu0 (!%p2952_p6), %v3318_v3  ;;  %v3322_v31 = vld [vmem:[%s4704_s7 + $0x8] ss:$12 sps:$4 sm:$0xff] (!%p2952_p6)  }
 0x29d   : > { %1228 = vst [vmem:[#allocation2 + $0xd8] sm:$0xff] %v1196_v53  ;;  %1413 = vst [vmem:[%s3866_s15 + $0x20] sm:$0xff] (!%p2952_p6), %v1385_v48  ;;  %v3341_v43 = vld [vmem:[%s4704_s7 + $0x78] ss:$12 sps:$4 sm:$0xff] (!%p2952_p6)   ;;  %v3342_v44 = vld [vmem:[%s4704_s7 + $0x80] ss:$12 sps:$4 sm:$0xff] (!%p2952_p6)  }
 0x29e   : > { %vm1329_vm8 = vcmp.ge.f32.partialorder (!%p2952_p6), %v1297_v51, 0.0  ;;  %v3346_v47 = vld [vmem:[%s4704_s7 + $0x98] ss:$12 sps:$4 sm:$0xff] (!%p2952_p6)  }
 0x29f   : > { %v1160_v56 = vpop.f32.mrb[28].mxu1  ;;  %1236 = sbr.rel (%p2952_p6) target bundleno = 1249 (0x4e1), region = 105  ;;  %3124 = vmatpush3.bf16.msra.mxu0 (!%p2952_p6), %v3318_v3  ;;  %v3347_v19 = vld [vmem:[%s4704_s7 + $0xac] ss:$12 sps:$4 sm:$0xff] (!%p2952_p6)  }
 0x2a0   : > { %v1197_v58 = vadd.f32 %v1160_v56, %v972_v54  ;;  %v1162_v59 = vpop.f32.mrb[29].mxu1  ;;  %v1387_v54 = vsel (!%p2952_p6), %vm1323_vm5, %v1291_v26, %v1355_v46  ;;  %v1301_v56 = vadd.f32 (!%p2952_p6), %v3989_v12, %v1257_v38  ;;  %v3337_v38 = vld [vmem:[%s4704_s7 + $0x60] ss:$12 sps:$4 sm:$0xff] (!%p2952_p6)   ;;  %3141 = vmatprep.subr.bf16.mxu0 (!%p2952_p6), %v3322_v31  ;;  %v3345_v46 = vld [vmem:[%s4704_s7 + $0x90] ss:$12 sps:$4 sm:$0xff] (!%p2952_p6)  }
 0x2a1   : > { %v1198_v61 = vadd.f32 %v1162_v59, %v973_v55  ;;  %v1164_v62 = vpop.f32.mrb[30].mxu1  ;;  %v1261_v52 = vld [vmem:[#allocation2 + $0xc0] sm:$0xff] (!%p2952_p6)  ;;  %v1299_v55 = vadd.f32 (!%p2952_p6), %v3989_v12, %v1255_v35  ;;  %1414 = vst [vmem:[%s3866_s15 + $0x28] sm:$0xff] (!%p2952_p6), %v1387_v54  ;;  %v4038_v59 = vpack.c.bf16 (!%p2952_p6), %v1387_v54, %v1385_v48  ;;  %v3349_v48 = vld [vmem:[%s4704_s7 + $0xa8] ss:$12 sps:$4 sm:$0xff] (!%p2952_p6)  }
 0x2a2   : > { %1229 = vst [vmem:[#allocation2 + $0xe0] sm:$0xff] %v1197_v58  ;;  %v1199_v63 = vadd.f32 %v1164_v62, %v974_v57  ;;  %v1166_v0 = vpop.f32.mrb[31].mxu1  ;;  %v1303_v57 = vadd.f32 (!%p2952_p6), %v3989_v12, %v1259_v39  ;;  %v3323_v62 = vld [vmem:[%s4704_s7 + $0x1c] ss:$12 sps:$4 sm:$0xff] (!%p2952_p6)   ;;  %vm1333_vm10 = vcmp.ge.f32.partialorder (!%p2952_p6), %v1301_v56, 0.0  ;;  %v1305_v10 = vadd.f32 (!%p2952_p6), %v3989_v12, %v1261_v52  ;;  %3126 = vmatmul.mubr.bf16.vlgmr.msra.gmra.mrb[0].mxu0 (!%p2952_p6), %v4016_v45 }
 0x2a3   : > { %1230 = vst [vmem:[#allocation2 + $0xe8] sm:$0xff] %v1198_v61  ;;  %v1200_v1 = vadd.f32 %v1166_v0, %v975_v60  ;;  %v1263_v53 = vld [vmem:[#allocation2 + $0xd0] sm:$0xff] (!%p2952_p6)  ;;  %v1389_v60 = vsel (!%p2952_p6), %vm1325_vm6, %v1293_v27, %v1357_v49  ;;  %v1391_v61 = vsel (!%p2952_p6), %vm1327_vm7, %v1295_v28, %v1359_v50  ;;  %vm1331_vm9 = vcmp.ge.f32.partialorder (!%p2952_p6), %v1299_v55, 0.0  ;;  %3071 = vst [vmem:[%s3871_s5 + $0x10] sm:$0xff] (!%p2952_p6), %v4038_v59   ;;  %v3331_v28 = vld [vmem:[%s4704_s7 + $0x4c] ss:$12 sps:$4 sm:$0xff] (!%p2952_p6)  }
 0x2a4   : > { %1231 = vst [vmem:[#allocation2 + $0xf0] sm:$0xff] %v1199_v63  ;;  %v3325_v63 = vld [vmem:[%s4704_s7 + $0x18] ss:$12 sps:$4 sm:$0xff] (!%p2952_p6)   ;;  %1415 = vst [vmem:[%s3866_s15 + $0x30] sm:$0xff] (!%p2952_p6), %v1389_v60  ;;  %v4050_v0 = vpack.c.bf16 (!%p2952_p6), %v1391_v61, %v1389_v60  ;;  %v1363_v2 = vmul.f32 (!%p2952_p6), 0.01, %v1299_v55  ;;  %1979 = vmatprep.subr.bf16.mxu1 (!%p2952_p6), %v3323_v62  ;;  %v1307_v13 = vadd.f32 (!%p2952_p6), %v3989_v12, %v1263_v53  ;;  %3129 = vmatprep.mubr.bf16.mxu0 (!%p2952_p6), %v4038_v59 }
 0x2a5   : > { %1232 = vst [vmem:[#allocation2 + $0xf8] sm:$0xff] %v1200_v1  ;;  %1416 = vst [vmem:[%s3866_s15 + $0x38] sm:$0xff] (!%p2952_p6), %v1391_v61  ;;  %v1361_v1 = vmul.f32 (!%p2952_p6), 0.01, %v1297_v51  ;;  %vm1335_vm11 = vcmp.ge.f32.partialorder (!%p2952_p6), %v1303_v57, 0.0  ;;  %vm1337_vm12 = vcmp.ge.f32.partialorder (!%p2952_p6), %v1305_v10, 0.0  ;;  %1980 = vmatpush1.bf16.msra.mxu1 (!%p2952_p6), %v3325_v63  ;;  %3142 = vmatpush3.bf16.msra.mxu0 (!%p2952_p6), %v3322_v31 }
 0x2a6   : > { %v1365_v4 = vmul.f32 0.01, %v1301_v56  ;;  %v1367_v6 = vmul.f32 0.01, %v1303_v57  ;;  %3072 = vst [vmem:[%s3871_s5 + $0x18] sm:$0xff] %v4050_v0   ;;  %v1395_v9 = vsel %vm1331_vm9, %v1299_v55, %v1363_v2  ;;  %vm1339_vm13 = vcmp.ge.f32.partialorder %v1307_v13, 0.0  ;;  %1981 = vmatprep.subr.bf16.mxu1 %v3327_v20 }
 0x2a7   : > { %v1393_v8 = vsel %vm1329_vm8, %v1297_v51, %v1361_v1  ;;  %1418 = vst [vmem:[%s3866_s15 + $0x48] sm:$0xff] %v1395_v9  ;;  %v1369_v23 = vmul.f32 0.01, %v1305_v10  ;;  %v1371_v24 = vmul.f32 0.01, %v1307_v13  ;;  %v3657_v50 = vmov 0  }
 0x2a8   : > { %1417 = vst [vmem:[%s3866_s15 + $0x40] sm:$0xff] %v1393_v8  ;;  %v1445_v15 = vpack.c.bf16 %v1395_v9, %v1393_v8  ;;  %v1397_v16 = vsel %vm1333_vm10, %v1301_v56, %v1365_v4  ;;  %v1399_v17 = vsel %vm1335_vm11, %v1303_v57, %v1367_v6  ;;  %v3326_v35 = vld [vmem:[%s4704_s7 + $0x20] ss:$12 sps:$4 sm:$0xff]   ;;  %v3330_v39 = vld [vmem:[%s4704_s7 + $0x38] ss:$12 sps:$4 sm:$0xff]   ;;  %2009 = vmatprep.mubr.bf16.mxu1 %v3657_v50 }
 0x2a9   : > { %v1265_v58 = vld [vmem:[#allocation2 + $0xe0] sm:$0xff]  ;;  %1419 = vst [vmem:[%s3866_s15 + $0x50] sm:$0xff] %v1397_v16  ;;  %1420 = vst [vmem:[%s3866_s15 + $0x58] sm:$0xff] %v1399_v17  ;;  %v1446_v22 = vpack.c.bf16 %v1399_v17, %v1397_v16  ;;  %v1401_v27 = vsel %vm1337_vm12, %v1305_v10, %v1369_v23  ;;  %v1403_v29 = vsel %vm1339_vm13, %v1307_v13, %v1371_v24  ;;  %1982 = vmatpush1.bf16.msra.mxu1 %v3329_v21  ;;  %v3350_v49 = vld [vmem:[%s4704_s7 + $0xb0] ss:$12 sps:$4 sm:$0xff]  }
 0x2aa   : > { %v1309_v18 = vadd.f32 %v3989_v12, %v1265_v58  ;;  %3073 = vst [vmem:[%s3871_s5 + $0x20] sm:$0xff] %v1445_v15   ;;  %1421 = vst [vmem:[%s3866_s15 + $0x60] sm:$0xff] %v1401_v27  ;;  %v1447_v32 = vpack.c.bf16 %v1403_v29, %v1401_v27  ;;  %1983 = vmatprep.subr.bf16.mxu1 %v3331_v28  ;;  %3143 = vmatprep.subr.bf16.mxu0 %v3326_v35  ;;  %v3343_v45 = vld [vmem:[%s4704_s7 + $0x94] ss:$12 sps:$4 sm:$0xff]  }
 0x2ab   : > { %v1267_v14 = vld [vmem:[#allocation2 + $0xf0] sm:$0xff]  ;;  %3074 = vst [vmem:[%s3871_s5 + $0x28] sm:$0xff] %v1446_v22   ;;  %1422 = vst [vmem:[%s3866_s15 + $0x68] sm:$0xff] %v1403_v29  ;;  %3144 = vmatpush3.bf16.msra.mxu0 %v3326_v35  ;;  %v4148_v51 = vld [vmem:[%s4746_s6] ss:$0 sm:$0xff] }
 0x2ac   : > { %v1311_v25 = vadd.f32 %v3989_v12, %v1267_v14  ;;  %vm1341_vm14 = vcmp.ge.f32.partialorder %v1309_v18, 0.0  ;;  %v1373_v26 = vmul.f32 0.01, %v1309_v18  ;;  %3075 = vst [vmem:[%s3871_s5 + $0x30] sm:$0xff] %v1447_v32   ;;  %3145 = vmatprep.subr.bf16.mxu0 %v3330_v39  ;;  %3130 = vmatmul.mubr.bf16.gmra.mrb[4].mxu0 %v4050_v0  ;;  %v4153_v53 = vld [vmem:[%s4747_s1] ss:$0 sm:$0xff] }
 0x2ad   : > { %1984 = vmatpush1.bf16.msra.mxu1 %v3333_v33  ;;  %3133 = vmatprep.mubr.bf16.mxu0 %v1445_v15 }
 0x2ae   : > { %vm1343_vm15 = vcmp.ge.f32.partialorder %v1311_v25, 0.0  ;;  %v1375_v30 = vmul.f32 0.01, %v1311_v25  ;;  %v1405_v12 = vsel %vm1341_vm14, %v1309_v18, %v1373_v26  ;;  %1985 = vmatprep.subr.bf16.mxu1 %v3335_v36 }
 0x2af   : > { %1423 = vst [vmem:[%s3866_s15 + $0x70] sm:$0xff] %v1405_v12  ;;  %3146 = vmatpush3.bf16.msra.mxu0 %v3330_v39 }
 0x2b0   : > { %v1407_v34 = vsel %vm1343_vm15, %v1311_v25, %v1375_v30  ;;  %3147 = vmatprep.subr.bf16.mxu0 %v3334_v40 }
 0x2b1   : > { %1424 = vst [vmem:[%s3866_s15 + $0x78] sm:$0xff] %v1407_v34  ;;  %v1448_v37 = vpack.c.bf16 %v1407_v34, %v1405_v12  ;;  %1986 = vmatpush1.bf16.msra.mxu1 %v3337_v38 }
 0x2b2   : > { %1987 = vmatprep.subr.bf16.mxu1 %v3339_v42 }
 0x2b3   : > { %3076 = vst [vmem:[%s3871_s5 + $0x38] sm:$0xff] %v1448_v37   ;;  %3148 = vmatpush3.bf16.msra.mxu0 %v3334_v40 }
 0x2b4   : > { %3149 = vmatprep.subr.bf16.mxu0 %v3338_v41  ;;  %3134 = vmatmul.mubr.bf16.gmra.mrb[8].mxu0 %v1446_v22 }
 0x2b5   : > { %3137 = vmatprep.mubr.bf16.mxu0 %v1447_v32  ;;  %1988 = vmatpush1.bf16.msra.mxu1 %v3341_v43 }
 0x2b6   : > { %1989 = vmatprep.subr.bf16.mxu1 %v3343_v45 }
 0x2b7   : > { %3150 = vmatpush3.bf16.msra.mxu0 %v3338_v41 }
 0x2b8   : > { %3151 = vmatprep.subr.bf16.mxu0 %v3342_v44 }
 0x2b9   : > { %1990 = vmatpush1.bf16.msra.mxu1 %v3345_v46 }
 0x2ba   : > { %1991 = vmatprep.subr.bf16.mxu1 %v3347_v19 }
 0x2bb   : > { %3152 = vmatpush3.bf16.msra.mxu0 %v3342_v44 }
 0x2bc   : > { %3138 = vmatmul.mubr.bf16.gmra.mrb[12].mxu0 %v1448_v37  ;;  %3153 = vmatprep.subr.bf16.mxu0 %v3346_v47 }
 0x2bd   : > { %1992 = vmatpush1.bf16.msra.mxu1 %v3349_v48 }
 0x2bf   : > { %3154 = vmatpush3.bf16.msra.mxu0 %v3346_v47 }
 0x2c0   : > { %3155 = vmatprep.subr.bf16.mxu0 %v3350_v49 }
 0x2c3   : > { %3156 = vmatpush3.bf16.msra.mxu0 %v3350_v49 }
 0x375   : > { %v3127_v52 = vpop.f32.mrb[0].mxu0 }
 0x376   : > { %v1691_v54 = vmul.f32 %v3127_v52, %v4148_v51  ;;  %v1619_v55 = vpop.f32.mrb[1].mxu0 }
 0x377   : > { %v1689_v56 = vmul.f32 %v4148_v51, %v1619_v55  ;;  %v3128_v57 = vpop.f32.mrb[2].mxu0 }
 0x378   : > { %v1714_v58 = vadd.f32 %v4153_v53, %v1691_v54  ;;  %v1692_v59 = vmul.f32 %v3128_v57, %v4148_v51  ;;  %v1622_v60 = vpop.f32.mrb[3].mxu0 }
 0x379   : > { %v1712_v61 = vadd.f32 %v4153_v53, %v1689_v56  ;;  %v1690_v62 = vmul.f32 %v4148_v51, %v1622_v60 }
 0x37a   : > { %vm1730_vm0 = vcmp.ge.f32.partialorder %v1714_v58, 0.0  ;;  %v1746_v63 = vmul.f32 0.01, %v1714_v58  ;;  %v1715_v0 = vadd.f32 %v4153_v53, %v1692_v59 }
 0x37b   : > { %vm1728_vm1 = vcmp.ge.f32.partialorder %v1712_v61, 0.0  ;;  %v1744_v1 = vmul.f32 0.01, %v1712_v61  ;;  %v1713_v2 = vadd.f32 %v4153_v53, %v1690_v62 }
 0x37c   : > { %v1762_v3 = vsel %vm1730_vm0, %v1714_v58, %v1746_v63  ;;  %vm1731_vm2 = vcmp.ge.f32.partialorder %v1715_v0, 0.0  ;;  %v1747_v4 = vmul.f32 0.01, %v1715_v0 }
 0x37d   : > { %1778 = vst [vmem:[%s3882_s12 + $0x10] sm:$0xff] %v1762_v3  ;;  %vm1729_vm3 = vcmp.ge.f32.partialorder %v1713_v2, 0.0  ;;  %v1745_v6 = vmul.f32 0.01, %v1713_v2  ;;  %v1760_v9 = vsel %vm1728_vm1, %v1712_v61, %v1744_v1 }
 0x37e   : > { %v1763_v10 = vsel %vm1731_vm2, %v1715_v0, %v1747_v4  ;;  %1776 = vst [vmem:[%s3882_s12] sm:$0xff] %v1760_v9 }
 0x37f   : > { %v3131_v8 = vpop.f32.mrb[4].mxu0  ;;  %1779 = vst [vmem:[%s3882_s12 + $0x18] sm:$0xff] %v1763_v10  ;;  %v1793_v15 = vpack.c.bf16 %v1763_v10, %v1762_v3  ;;  %v1761_v18 = vsel %vm1729_vm3, %v1713_v2, %v1745_v6 }
 0x380   : > { %v1695_v13 = vmul.f32 %v3131_v8, %v4148_v51  ;;  %v1635_v14 = vpop.f32.mrb[5].mxu0  ;;  %1777 = vst [vmem:[%s3882_s12 + $0x8] sm:$0xff] %v1761_v18  ;;  %v1792_v23 = vpack.c.bf16 %v1761_v18, %v1760_v9 }
 0x381   : > { %v1693_v16 = vmul.f32 %v4148_v51, %v1635_v14  ;;  %v3132_v17 = vpop.f32.mrb[6].mxu0 }
 0x382   : > { %v1718_v20 = vadd.f32 %v4153_v53, %v1695_v13  ;;  %v1696_v21 = vmul.f32 %v3132_v17, %v4148_v51  ;;  %v1638_v22 = vpop.f32.mrb[7].mxu0  ;;  %2010 = vmatmul.mubr.bf16.vlgmr.msra.gmra.mrb[0].mxu1 %v1792_v23  ;;  %3157 = vmatprep.mubr.bf16.mxu0 %v1792_v23  ;;  %v1238_v23 = vld [vmem:[#allocation2 + $0x8] sm:$0xff] }
 0x383   : > { %v1716_v24 = vadd.f32 %v4153_v53, %v1693_v16  ;;  %v1694_v25 = vmul.f32 %v4148_v51, %v1638_v22  ;;  %3158 = vmatmul.mubr.bf16.vlgmr.msra.gmra.mrb[16].mxu0 %v1793_v15  ;;  %2019 = vmatprep.mubr.bf16.mxu1 %v3657_v50 }
 0x384   : > { %vm1734_vm4 = vcmp.ge.f32.partialorder %v1718_v20, 0.0  ;;  %v1750_v26 = vmul.f32 0.01, %v1718_v20  ;;  %v1719_v27 = vadd.f32 %v4153_v53, %v1696_v21 }
 0x385   : > { %vm1732_vm5 = vcmp.ge.f32.partialorder %v1716_v24, 0.0  ;;  %v1748_v28 = vmul.f32 0.01, %v1716_v24  ;;  %v1717_v29 = vadd.f32 %v4153_v53, %v1694_v25  ;;  %v1242_v25 = vld [vmem:[#allocation2 + $0x28] sm:$0xff] }
 0x386   : > { %vm1735_vm6 = vcmp.ge.f32.partialorder %v1719_v27, 0.0  ;;  %v1751_v30 = vmul.f32 0.01, %v1719_v27  ;;  %v1766_v12 = vsel %vm1734_vm4, %v1718_v20, %v1750_v26 }
 0x387   : > { %vm1733_vm7 = vcmp.ge.f32.partialorder %v1717_v29, 0.0  ;;  %v1749_v31 = vmul.f32 0.01, %v1717_v29  ;;  %v1764_v32 = vsel %vm1732_vm5, %v1716_v24, %v1748_v28  ;;  %1782 = vst [vmem:[%s3882_s12 + $0x30] sm:$0xff] %v1766_v12  ;;  %v3135_v33 = vpop.f32.mrb[8].mxu0  ;;  %v1240_v24 = vld [vmem:[#allocation2 + $0x18] sm:$0xff] }
 0x388   : > { %1780 = vst [vmem:[%s3882_s12 + $0x20] sm:$0xff] %v1764_v32  ;;  %v1767_v34 = vsel %vm1735_vm6, %v1719_v27, %v1751_v30  ;;  %v1699_v35 = vmul.f32 %v3135_v33, %v4148_v51  ;;  %v1651_v36 = vpop.f32.mrb[9].mxu0  ;;  %v1244_v27 = vld [vmem:[#allocation2 + $0x38] sm:$0xff]  ;;  %v1246_v28 = vld [vmem:[#allocation2 + $0x48] sm:$0xff] }
 0x389   : > { %v1765_v37 = vsel %vm1733_vm7, %v1717_v29, %v1749_v31  ;;  %1783 = vst [vmem:[%s3882_s12 + $0x38] sm:$0xff] %v1767_v34  ;;  %v4180_v38 = vpack.c.bf16 %v1767_v34, %v1766_v12  ;;  %v1697_v39 = vmul.f32 %v4148_v51, %v1651_v36  ;;  %v3136_v40 = vpop.f32.mrb[10].mxu0  ;;  %v1248_v29 = vld [vmem:[#allocation2 + $0x58] sm:$0xff]  ;;  %v1250_v30 = vld [vmem:[#allocation2 + $0x68] sm:$0xff] }
 0x38a   : > { %1781 = vst [vmem:[%s3882_s12 + $0x28] sm:$0xff] %v1765_v37  ;;  %v1794_v41 = vpack.c.bf16 %v1765_v37, %v1764_v32  ;;  %v1722_v42 = vadd.f32 %v4153_v53, %v1699_v35  ;;  %v1700_v43 = vmul.f32 %v3136_v40, %v4148_v51  ;;  %v1654_v44 = vpop.f32.mrb[11].mxu0  ;;  %2020 = vmatmul.mubr.bf16.gmra.mrb[4].mxu1 %v1793_v15  ;;  %v1252_v12 = vld [vmem:[#allocation2 + $0x78] sm:$0xff]  ;;  %v1254_v31 = vld [vmem:[#allocation2 + $0x88] sm:$0xff] }
 0x38b   : > { %v1720_v45 = vadd.f32 %v4153_v53, %v1697_v39  ;;  %v1698_v46 = vmul.f32 %v4148_v51, %v1654_v44  ;;  %2029 = vmatprep.mubr.bf16.mxu1 %v3657_v50  ;;  %v1256_v35 = vld [vmem:[#allocation2 + $0x98] sm:$0xff]  ;;  %v1258_v36 = vld [vmem:[#allocation2 + $0xa8] sm:$0xff] }
 0x38c   : > { %3161 = vmatprep.mubr.bf16.mxu0 %v1794_v41  ;;  %vm1738_vm8 = vcmp.ge.f32.partialorder %v1722_v42, 0.0  ;;  %v1754_v47 = vmul.f32 0.01, %v1722_v42  ;;  %v1723_v19 = vadd.f32 %v4153_v53, %v1700_v43  ;;  %v1260_v37 = vld [vmem:[#allocation2 + $0xb8] sm:$0xff] }
 0x38d   : > { %3162 = vmatmul.mubr.bf16.gmra.mrb[20].mxu0 %v4180_v38  ;;  %vm1736_vm9 = vcmp.ge.f32.partialorder %v1720_v45, 0.0  ;;  %v1752_v48 = vmul.f32 0.01, %v1720_v45  ;;  %v1721_v49 = vadd.f32 %v4153_v53, %v1698_v46  ;;  %v1264_v43 = vld [vmem:[#allocation2 + $0xd8] sm:$0xff] }
 0x38e   : > { %vm1739_vm10 = vcmp.ge.f32.partialorder %v1723_v19, 0.0  ;;  %v1755_v52 = vmul.f32 0.01, %v1723_v19  ;;  %v1770_v54 = vsel %vm1738_vm8, %v1722_v42, %v1754_v47  ;;  %v1262_v42 = vld [vmem:[#allocation2 + $0xc8] sm:$0xff] }
 0x38f   : > { %vm1737_vm11 = vcmp.ge.f32.partialorder %v1721_v49, 0.0  ;;  %v1753_v55 = vmul.f32 0.01, %v1721_v49  ;;  %v1768_v56 = vsel %vm1736_vm9, %v1720_v45, %v1752_v48  ;;  %1786 = vst [vmem:[%s3882_s12 + $0x50] sm:$0xff] %v1770_v54  ;;  %v3139_v57 = vpop.f32.mrb[12].mxu0 }
 0x390   : > { %1784 = vst [vmem:[%s3882_s12 + $0x40] sm:$0xff] %v1768_v56  ;;  %v1771_v58 = vsel %vm1739_vm10, %v1723_v19, %v1755_v52  ;;  %v1703_v59 = vmul.f32 %v3139_v57, %v4148_v51  ;;  %v1667_v60 = vpop.f32.mrb[13].mxu0  ;;  %v1268_v19 = vld [vmem:[#allocation2 + $0xf8] sm:$0xff] }
 0x391   : > { %v1769_v61 = vsel %vm1737_vm11, %v1721_v49, %v1753_v55  ;;  %1787 = vst [vmem:[%s3882_s12 + $0x58] sm:$0xff] %v1771_v58  ;;  %v1797_v62 = vpack.c.bf16 %v1771_v58, %v1770_v54  ;;  %v1701_v63 = vmul.f32 %v4148_v51, %v1667_v60  ;;  %v3140_v0 = vpop.f32.mrb[14].mxu0 }
 0x392   : > { %1785 = vst [vmem:[%s3882_s12 + $0x48] sm:$0xff] %v1769_v61  ;;  %v1796_v1 = vpack.c.bf16 %v1769_v61, %v1768_v56  ;;  %v1726_v2 = vadd.f32 %v4153_v53, %v1703_v59  ;;  %v1704_v3 = vmul.f32 %v3140_v0, %v4148_v51  ;;  %v1670_v4 = vpop.f32.mrb[15].mxu0  ;;  %2030 = vmatmul.mubr.bf16.gmra.mrb[8].mxu1 %v1794_v41 }
 0x393   : > { %v1724_v6 = vadd.f32 %v4153_v53, %v1701_v63  ;;  %v1702_v8 = vmul.f32 %v4148_v51, %v1670_v4  ;;  %2039 = vmatprep.mubr.bf16.mxu1 %v3657_v50 }
 0x394   : > { %3165 = vmatprep.mubr.bf16.mxu0 %v1796_v1  ;;  %vm1742_vm12 = vcmp.ge.f32.partialorder %v1726_v2, 0.0  ;;  %v1758_v9 = vmul.f32 0.01, %v1726_v2  ;;  %v1727_v10 = vadd.f32 %v4153_v53, %v1704_v3 }
 0x395   : > { %3166 = vmatmul.mubr.bf16.gmra.mrb[24].mxu0 %v1797_v62  ;;  %vm1740_vm13 = vcmp.ge.f32.partialorder %v1724_v6, 0.0  ;;  %v1756_v13 = vmul.f32 0.01, %v1724_v6  ;;  %v1725_v14 = vadd.f32 %v4153_v53, %v1702_v8  ;;  %v1277_v53 = vsub.s32 1, %v3972_v5 }
 0x396   : > { %vm1743_vm14 = vcmp.ge.f32.partialorder %v1727_v10, 0.0  ;;  %v1759_v15 = vmul.f32 0.01, %v1727_v10  ;;  %v1774_v51 = vsel %vm1742_vm12, %v1726_v2, %v1758_v9 }
 0x397   : > { %vm1741_vm15 = vcmp.ge.f32.partialorder %v1725_v14, 0.0  ;;  %v1757_v16 = vmul.f32 0.01, %v1725_v14  ;;  %v1772_v17 = vsel %vm1740_vm13, %v1724_v6, %v1756_v13  ;;  %1790 = vst [vmem:[%s3882_s12 + $0x70] sm:$0xff] %v1774_v51  ;;  %v1278_v26 = vrot.slane %v3984_v11, %v1277_v53  ;;  %v1266_v11 = vld [vmem:[#allocation2 + $0xe8] sm:$0xff] }
 0x398   : > { %1788 = vst [vmem:[%s3882_s12 + $0x60] sm:$0xff] %v1772_v17  ;;  %v1775_v18 = vsel %vm1743_vm14, %v1727_v10, %v1759_v15 }
 0x399   : > { %v1773_v20 = vsel %vm1741_vm15, %v1725_v14, %v1757_v16  ;;  %1791 = vst [vmem:[%s3882_s12 + $0x78] sm:$0xff] %v1775_v18  ;;  %v1799_v21 = vpack.c.bf16 %v1775_v18, %v1774_v51  ;;  %v1282_v32 = vadd.f32 %v1278_v26, %v1238_v23  ;;  %v1284_v33 = vadd.f32 %v1278_v26, %v1240_v24 }
 0x39a   : > { %1789 = vst [vmem:[%s3882_s12 + $0x68] sm:$0xff] %v1773_v20  ;;  %v1798_v22 = vpack.c.bf16 %v1773_v20, %v1772_v17  ;;  %2040 = vmatmul.mubr.bf16.gmra.mrb[12].mxu1 %v4180_v38  ;;  %v1286_v34 = vadd.f32 %v1278_v26, %v1242_v25  ;;  %v1290_v38 = vadd.f32 %v1278_v26, %v1246_v28  ;;  %v1844_v28 = vsub.s32 2, %v3972_v5 }
 0x39b   : > { %2049 = vmatprep.mubr.bf16.mxu1 %v3657_v50  ;;  %v1292_v39 = vadd.f32 %v1278_v26, %v1248_v29  ;;  %v1294_v40 = vadd.f32 %v1278_v26, %v1250_v30  ;;  %v1296_v41 = vadd.f32 %v1278_v26, %v1252_v12  ;;  %v1298_v44 = vadd.f32 %v1278_v26, %v1254_v31 }
 0x39c   : > { %3169 = vmatprep.mubr.bf16.mxu0 %v1798_v22  ;;  %v1300_v45 = vadd.f32 %v1278_v26, %v1256_v35  ;;  %v1302_v46 = vadd.f32 %v1278_v26, %v1258_v36  ;;  %v1304_v47 = vadd.f32 %v1278_v26, %v1260_v37  ;;  %v1306_v48 = vadd.f32 %v1278_v26, %v1262_v42 }
 0x39d   : > { %3170 = vmatmul.mubr.bf16.gmra.mrb[28].mxu0 %v1799_v21  ;;  %v1308_v49 = vadd.f32 %v1278_v26, %v1264_v43  ;;  %v1310_v52 = vadd.f32 %v1278_v26, %v1266_v11  ;;  %vm1314_vm0 = vcmp.ge.f32.partialorder %v1282_v32, 0.0  ;;  %v1312_v54 = vadd.f32 %v1278_v26, %v1268_v19 }
 0x39e   : > { %vm1316_vm1 = vcmp.ge.f32.partialorder %v1284_v33, 0.0  ;;  %vm1318_vm2 = vcmp.ge.f32.partialorder %v1286_v34, 0.0  ;;  %vm1322_vm4 = vcmp.ge.f32.partialorder %v1290_v38, 0.0  ;;  %vm1324_vm5 = vcmp.ge.f32.partialorder %v1292_v39, 0.0 }
 0x39f   : > { %vm1326_vm6 = vcmp.ge.f32.partialorder %v1294_v40, 0.0  ;;  %vm1328_vm7 = vcmp.ge.f32.partialorder %v1296_v41, 0.0  ;;  %vm1330_vm8 = vcmp.ge.f32.partialorder %v1298_v44, 0.0  ;;  %vm1332_vm9 = vcmp.ge.f32.partialorder %v1300_v45, 0.0 }
 0x3a0   : > { %vm1334_vm10 = vcmp.ge.f32.partialorder %v1302_v46, 0.0  ;;  %vm1336_vm11 = vcmp.ge.f32.partialorder %v1304_v47, 0.0  ;;  %vm1338_vm12 = vcmp.ge.f32.partialorder %v1306_v48, 0.0  ;;  %vm1340_vm13 = vcmp.ge.f32.partialorder %v1308_v49, 0.0 }
 0x3a1   : > { %vm1342_vm14 = vcmp.ge.f32.partialorder %v1310_v52, 0.0  ;;  %vm1344_vm15 = vcmp.ge.f32.partialorder %v1312_v54, 0.0  ;;  %v1346_v55 = vmul.f32 0.01, %v1282_v32  ;;  %v1348_v56 = vmul.f32 0.01, %v1284_v33 }
 0x3a2   : > { %2050 = vmatmul.mubr.bf16.gmra.mrb[16].mxu1 %v1796_v1  ;;  %v1350_v57 = vmul.f32 0.01, %v1286_v34  ;;  %v1354_v59 = vmul.f32 0.01, %v1290_v38  ;;  %v1356_v60 = vmul.f32 0.01, %v1292_v39 }
 0x3a3   : > { %2059 = vmatprep.mubr.bf16.mxu1 %v3657_v50  ;;  %v1358_v61 = vmul.f32 0.01, %v1294_v40  ;;  %v1362_v63 = vmul.f32 0.01, %v1298_v44  ;;  %v1378_v0 = vsel %vm1314_vm0, %v1282_v32, %v1346_v55  ;;  %v1364_v1 = vmul.f32 0.01, %v1300_v45 }
 0x3a4   : > { %v1366_v2 = vmul.f32 0.01, %v1302_v46  ;;  %v1368_v3 = vmul.f32 0.01, %v1304_v47  ;;  %v1380_v4 = vsel %vm1316_vm1, %v1284_v33, %v1348_v56  ;;  %1425 = vst [vmem:[%s3880_s23] sm:$0xff] %v1378_v0  ;;  %v1370_v6 = vmul.f32 0.01, %v1306_v48 }
 0x3a5   : > { %v1372_v8 = vmul.f32 0.01, %v1308_v49  ;;  %v1374_v9 = vmul.f32 0.01, %v1310_v52  ;;  %v1382_v10 = vsel %vm1318_vm2, %v1286_v34, %v1350_v57  ;;  %1426 = vst [vmem:[%s3880_s23 + $0x8] sm:$0xff] %v1380_v4  ;;  %v1386_v15 = vsel %vm1322_vm4, %v1290_v38, %v1354_v59 }
 0x3a6   : > { %v1376_v13 = vmul.f32 0.01, %v1312_v54  ;;  %v1388_v51 = vsel %vm1324_vm5, %v1292_v39, %v1356_v60  ;;  %1427 = vst [vmem:[%s3880_s23 + $0x10] sm:$0xff] %v1382_v10  ;;  %v1390_v16 = vsel %vm1326_vm6, %v1294_v40, %v1358_v61  ;;  %v1394_v18 = vsel %vm1330_vm8, %v1298_v44, %v1362_v63  ;;  %1429 = vst [vmem:[%s3880_s23 + $0x20] sm:$0xff] %v1386_v15 }
 0x3a7   : > { %v1396_v20 = vsel %vm1332_vm9, %v1300_v45, %v1364_v1  ;;  %1430 = vst [vmem:[%s3880_s23 + $0x28] sm:$0xff] %v1388_v51  ;;  %v1402_v23 = vsel %vm1338_vm12, %v1306_v48, %v1370_v6  ;;  %v1404_v24 = vsel %vm1340_vm13, %v1308_v49, %v1372_v8  ;;  %1431 = vst [vmem:[%s3880_s23 + $0x30] sm:$0xff] %v1390_v16 }
 0x3a8   : > { %1433 = vst [vmem:[%s3880_s23 + $0x40] sm:$0xff] %v1394_v18  ;;  %1434 = vst [vmem:[%s3880_s23 + $0x48] sm:$0xff] %v1396_v20  ;;  %v1406_v25 = vsel %vm1342_vm14, %v1310_v52, %v1374_v9 }
 0x3a9   : > { %1437 = vst [vmem:[%s3880_s23 + $0x60] sm:$0xff] %v1402_v23  ;;  %1438 = vst [vmem:[%s3880_s23 + $0x68] sm:$0xff] %v1404_v24 }
 0x3aa   : > { %2060 = vmatmul.mubr.bf16.gmra.mrb[20].mxu1 %v1797_v62  ;;  %v1360_v62 = vmul.f32 0.01, %v1296_v41  ;;  %1439 = vst [vmem:[%s3880_s23 + $0x70] sm:$0xff] %v1406_v25 }
 0x3ab   : > { %2069 = vmatprep.mubr.bf16.mxu1 %v3657_v50 }
 0x3ac   : > { %v1392_v17 = vsel %vm1328_vm7, %v1296_v41, %v1360_v62 }
 0x3ad   : > { %1432 = vst [vmem:[%s3880_s23 + $0x38] sm:$0xff] %v1392_v17 }
 0x3b2   : > { %2070 = vmatmul.mubr.bf16.gmra.mrb[24].mxu1 %v1798_v22  ;;  %v1400_v22 = vsel %vm1336_vm11, %v1304_v47, %v1368_v3 }
 0x3b3   : > { %2079 = vmatprep.mubr.bf16.mxu1 %v3657_v50  ;;  %v1288_v50 = vadd.f32 %v1278_v26, %v1244_v27  ;;  %v1408_v26 = vsel %vm1344_vm15, %v1312_v54, %v1376_v13  ;;  %1436 = vst [vmem:[%s3880_s23 + $0x58] sm:$0xff] %v1400_v22  ;;  %v1832_v27 = vld [vmem:[%s4748_s29] sm:$0x7] }
 0x3b4   : > { %1440 = vst [vmem:[%s3880_s23 + $0x78] sm:$0xff] %v1408_v26  ;;  %v4256_v29 = vrot.slane %v1832_v27, %v1273_v7  ;;  %v4260_v30 = vrot.slane %v1832_v27, %v1277_v53  ;;  %v4262_v12 = vrot.slane %v1832_v27, %v1844_v28 }
 0x3b5   : > { %vm1320_vm3 = vcmp.ge.f32.partialorder %v1288_v50, 0.0  ;;  %v1352_v58 = vmul.f32 0.01, %v1288_v50 }
 0x3b7   : > { %v1384_v14 = vsel %vm1320_vm3, %v1288_v50, %v1352_v58 }
 0x3b8   : > { %1428 = vst [vmem:[%s3880_s23 + $0x18] sm:$0xff] %v1384_v14 }
 0x3ba   : > { %2080 = vmatmul.mubr.bf16.gmra.mrb[28].mxu1 %v1799_v21  ;;  %v1398_v21 = vsel %vm1334_vm10, %v1302_v46, %v1366_v2 }
 0x3bb   : > { %1435 = vst [vmem:[%s3880_s23 + $0x50] sm:$0xff] %v1398_v21 }
 0x455   : > { %v2011_v31 = vpop.f32.mrb[0].mxu1 }
 0x456   : > { %v4265_v32 = vadd.f32 %v2011_v31, %v4256_v29  ;;  %v2013_v33 = vpop.f32.mrb[1].mxu1  ;;  %v3159_v34 = vpop.f32.mrb[16].mxu0 }
 0x457   : > { %v4268_v50 = vadd.f32 %v2013_v33, %v4260_v30  ;;  %v2133_v35 = vadd.f32 %v3159_v34, %v4262_v12  ;;  %v2015_v36 = vpop.f32.mrb[2].mxu1  ;;  %v2124_v7 = vpop.f32.mrb[17].mxu0 }
 0x458   : > { %v2187_v37 = vand.u32 2147483647, %v4265_v32  ;;  %v4273_v5 = vadd.f32 %v2015_v36, %v4256_v29  ;;  %v2125_v53 = vadd.f32 %v2124_v7, %v4262_v12  ;;  %v2017_v38 = vpop.f32.mrb[3].mxu1  ;;  %v3160_v39 = vpop.f32.mrb[18].mxu0  ;;  %vm2283_vm0 = vcmp.ge.f32.partialorder %v4265_v32, 0.0 }
 0x459   : > { %v2363_v40 = vand.u32 2147483647, %v4268_v50  ;;  %v2541_v41 = vmin.f32 %v2133_v35, 14.815511  ;;  %v4278_v42 = vadd.f32 %v2017_v38, %v4260_v30  ;;  %v2127_v43 = vpop.f32.mrb[19].mxu0  ;;  %v2136_v54 = vadd.f32 %v3160_v39, %v4262_v12 }
 0x45a   : > { %v2203_v11 = vsub.f32 0.0, %v2187_v37  ;;  %v2188_v44 = vand.u32 2147483647, %v4273_v5  ;;  %v2539_v45 = vmin.f32 %v2125_v53, 14.815511  ;;  %v2128_v57 = vadd.f32 %v2127_v43, %v4262_v12 }
 0x45b   : > { %v2379_v46 = vsub.f32 0.0, %v2363_v40  ;;  %v2559_v47 = vmul.f32 1.442695, %v2541_v41  ;;  %v2364_v19 = vand.u32 2147483647, %v4278_v42  ;;  %vm2284_vm1 = vcmp.ge.f32.partialorder %v4273_v5, 0.0 }
 0x45c   : > { %v2219_v48 = vmul.f32 1.442695, %v2203_v11  ;;  %v2204_v49 = vsub.f32 0.0, %v2188_v44  ;;  %v2555_v52 = vmul.f32 1.442695, %v2539_v45 }
 0x45d   : > { %v2395_v55 = vmul.f32 1.442695, %v2379_v46  ;;  %3351 = vpow2.f32 %v2559_v47  ;;  %v2380_v56 = vsub.f32 0.0, %v2364_v19  ;;  %v2021_v58 = vpop.f32.mrb[4].mxu1  ;;  %v2542_v60 = vmin.f32 %v2136_v54, 14.815511 }
 0x45e   : > { %3353 = vpow2.f32 %v2219_v48  ;;  %v2221_v59 = vmul.f32 1.442695, %v2204_v49  ;;  %v4285_v61 = vadd.f32 %v2021_v58, %v4256_v29  ;;  %v2023_v62 = vpop.f32.mrb[5].mxu1  ;;  %v2540_v1 = vmin.f32 %v2128_v57, 14.815511 }
 0x45f   : > { %3355 = vpow2.f32 %v2395_v55  ;;  %v2397_v0 = vmul.f32 1.442695, %v2380_v56  ;;  %v4288_v2 = vadd.f32 %v2023_v62, %v4260_v30  ;;  %v2025_v3 = vpop.f32.mrb[6].mxu1  ;;  %v2561_v6 = vmul.f32 1.442695, %v2542_v60 }
 0x460   : > { %v3163_v63 = vpop.f32.mrb[20].mxu0  ;;  %3357 = vpow2.f32 %v2221_v59  ;;  %v2189_v8 = vand.u32 2147483647, %v4285_v61  ;;  %v2027_v9 = vpop.f32.mrb[7].mxu1  ;;  %v2557_v10 = vmul.f32 1.442695, %v2540_v1  ;;  %v4294_v16 = vadd.f32 %v2025_v3, %v4256_v29 }
 0x461   : > { %v2140_v4 = vpop.f32.mrb[21].mxu0  ;;  %3359 = vpow2.f32 %v2555_v52  ;;  %v2365_v13 = vand.u32 2147483647, %v4288_v2  ;;  %v2149_v51 = vadd.f32 %v3163_v63, %v4262_v12  ;;  %v4298_v21 = vadd.f32 %v2027_v9, %v4260_v30 }
 0x462   : > { %v3164_v14 = vpop.f32.mrb[22].mxu0  ;;  %3361 = vpow2.f32 %v2397_v0  ;;  %v2205_v15 = vsub.f32 0.0, %v2189_v8  ;;  %v2141_v20 = vadd.f32 %v2140_v4, %v4262_v12  ;;  %v2190_v24 = vand.u32 2147483647, %v4294_v16 }
 0x463   : > { %v2143_v17 = vpop.f32.mrb[23].mxu0  ;;  %3363 = vpow2.f32 %v2561_v6  ;;  %v2381_v18 = vsub.f32 0.0, %v2365_v13  ;;  %v2545_v23 = vmin.f32 %v2149_v51, 14.815511  ;;  %v2366_v31 = vand.u32 2147483647, %v4298_v21 }
 0x464   : > { %3365 = vpow2.f32 %v2557_v10  ;;  %v2223_v22 = vmul.f32 1.442695, %v2205_v15  ;;  %v2543_v26 = vmin.f32 %v2141_v20, 14.815511  ;;  %v2206_v28 = vsub.f32 0.0, %v2190_v24 }
 0x465   : > { %v2399_v25 = vmul.f32 1.442695, %v2381_v18  ;;  %v2567_v27 = vmul.f32 1.442695, %v2545_v23  ;;  %v2031_v33 = vpop.f32.mrb[8].mxu1  ;;  %v2152_v36 = vadd.f32 %v3164_v14, %v4262_v12  ;;  %v2144_v7 = vadd.f32 %v2143_v17, %v4262_v12 }
 0x466   : > { %3367 = vpow2.f32 %v2223_v22  ;;  %v2563_v35 = vmul.f32 1.442695, %v2543_v26  ;;  %v2033_v37 = vpop.f32.mrb[9].mxu1  ;;  %v2225_v40 = vmul.f32 1.442695, %v2206_v28  ;;  %v2382_v41 = vsub.f32 0.0, %v2366_v31 }
 0x467   : > { %v3352_v34 = vpop.eup %3351  ;;  %3369 = vpow2.f32 %v2399_v25  ;;  %v2035_v43 = vpop.f32.mrb[10].mxu1  ;;  %v2546_v45 = vmin.f32 %v2152_v36, 14.815511  ;;  %v2544_v46 = vmin.f32 %v2144_v7, 14.815511  ;;  %v4312_v62 = vadd.f32 %v2031_v33, %v4256_v29 }
 0x468   : > { %v4304_v53 = vpop.f32.mrb[24].mxu0  ;;  %v3354_v38 = vpop.eup %3353  ;;  %v2589_v39 = vmax.f32 %v3352_v34, 1e-05  ;;  %3371 = vpow2.f32 %v2567_v27  ;;  %v2401_v52 = vmul.f32 1.442695, %v2382_v41  ;;  %v4315_v63 = vadd.f32 %v2033_v37, %v4260_v30 }
 0x469   : > { %v3356_v11 = vpop.eup %3355  ;;  %v2251_v44 = vadd.f32 1.0, %v3354_v38  ;;  %3373 = vpow2.f32 %v2563_v35  ;;  %v2037_v47 = vpop.f32.mrb[11].mxu1  ;;  %v2569_v57 = vmul.f32 1.442695, %v2546_v45  ;;  %v2565_v4 = vmul.f32 1.442695, %v2544_v46 }
 0x46a   : > { %v3358_v19 = vpop.eup %3357  ;;  %v2427_v48 = vadd.f32 1.0, %v3356_v11  ;;  %v2605_v49 = vmin.f32 %v2589_v39, 1000000.0  ;;  %3375 = vpow2.f32 %v2225_v40  ;;  %v4306_v54 = vpop.f32.mrb[25].mxu0  ;;  %v4320_v6 = vadd.f32 %v2035_v43, %v4256_v29 }
 0x46b   : > { %v3360_v55 = vpop.eup %3359  ;;  %3377 = vrcp.f32 %v2251_v44  ;;  %v2252_v56 = vadd.f32 1.0, %v3358_v19  ;;  %v4308_v58 = vpop.f32.mrb[26].mxu0  ;;  %v2191_v14 = vand.u32 2147483647, %v4312_v62  ;;  %v2347_v15 = vmax.f32 %v4268_v50, 0.0 }
 0x46c   : > { %v3362_v59 = vpop.eup %3361  ;;  %3379 = vlog2.f32 %v2427_v48  ;;  %2621 = vst [vmem:[%s3876_s17 + $0x40] sm:$0xff] %v2605_v49  ;;  %v2587_v60 = vmax.f32 %v3360_v55, 1e-05  ;;  %v4317_v0 = vpop.f32.mrb[27].mxu0  ;;  %v4328_v17 = vadd.f32 %v2037_v47, %v4260_v30  ;;  %v2367_v25 = vand.u32 2147483647, %v4315_v63 }
 0x46d   : > { %v3364_v1 = vpop.eup %3363  ;;  %3381 = vrcp.f32 %v2252_v56  ;;  %v2428_v3 = vadd.f32 1.0, %v3362_v59  ;;  %v4322_v8 = vpop.f32.mrb[12].mxu1  ;;  %v2207_v24 = vsub.f32 0.0, %v2191_v14  ;;  %v2192_v33 = vand.u32 2147483647, %v4320_v6 }
 0x46e   : > { %v3366_v9 = vpop.eup %3365  ;;  %v2603_v10 = vmin.f32 %v2587_v60, 1000000.0  ;;  %v2590_v13 = vmax.f32 %v3364_v1, 1e-05  ;;  %3383 = vpow2.f32 %v2401_v52  ;;  %v4330_v18 = vpop.f32.mrb[13].mxu1  ;;  %v2383_v37 = vsub.f32 0.0, %v2367_v25 }
 0x46f   : > { %3385 = vlog2.f32 %v2428_v3  ;;  %v2588_v51 = vmax.f32 %v3366_v9, 1e-05  ;;  %v4336_v26 = vpop.f32.mrb[14].mxu1  ;;  %v2227_v7 = vmul.f32 1.442695, %v2207_v24  ;;  %v2348_v40 = vmax.f32 %v4278_v42, 0.0 }
 0x470   : > { %v4332_v20 = vpop.f32.mrb[28].mxu0  ;;  %v3368_v22 = vpop.eup %3367  ;;  %2619 = vst [vmem:[%s3876_s17 + $0x10] sm:$0xff] %v2603_v10  ;;  %v2606_v23 = vmin.f32 %v2590_v13, 1000000.0  ;;  %3387 = vpow2.f32 %v2569_v57  ;;  %v2208_v43 = vsub.f32 0.0, %v2192_v33  ;;  %vm2285_vm2 = vcmp.ge.f32.partialorder %v4285_v61, 0.0 }
 0x471   : > { %v3370_v27 = vpop.eup %3369  ;;  %v2604_v28 = vmin.f32 %v2588_v51, 1000000.0  ;;  %v2253_v31 = vadd.f32 1.0, %v3368_v22  ;;  %3389 = vpow2.f32 %v2565_v4  ;;  %v4339_v34 = vpop.f32.mrb[15].mxu1  ;;  %v2403_v46 = vmul.f32 1.442695, %v2383_v37 }
 0x472   : > { %v3372_v35 = vpop.eup %3371  ;;  %2622 = vst [vmem:[%s3876_s17 + $0x58] sm:$0xff] %v2606_v23  ;;  %v2429_v36 = vadd.f32 1.0, %v3370_v27  ;;  %v4343_v38 = vpop.f32.mrb[29].mxu0  ;;  %v2368_v47 = vand.u32 2147483647, %v4328_v17  ;;  %v4360_v9 = vadd.f32 %v4322_v8, %v4256_v29  ;;  %v2165_v10 = vadd.f32 %v4304_v53, %v4262_v12 }
 0x473   : > { %v3374_v39 = vpop.eup %3373  ;;  %2620 = vst [vmem:[%s3876_s17 + $0x28] sm:$0xff] %v2604_v28  ;;  %3391 = vrcp.f32 %v2253_v31  ;;  %v2593_v41 = vmax.f32 %v3372_v35, 1e-05  ;;  %v4347_v11 = vpop.f32.mrb[30].mxu0  ;;  %v2229_v52 = vmul.f32 1.442695, %v2208_v43 }
 0x474   : > { %v3376_v44 = vpop.eup %3375  ;;  %3393 = vlog2.f32 %v2429_v36  ;;  %v2591_v45 = vmax.f32 %v3374_v39, 1e-05  ;;  %v2384_v59 = vsub.f32 0.0, %v2368_v47  ;;  %v4354_v1 = vpop.f32.mrb[31].mxu0  ;;  %v2349_v53 = vmax.f32 %v4288_v2, 0.0 }
 0x475   : > { %v3378_v19 = vpop.eup %3377  ;;  %v2609_v48 = vmin.f32 %v2593_v41, 1000000.0  ;;  %v2254_v49 = vadd.f32 1.0, %v3376_v44  ;;  %3395 = vpow2.f32 %v2227_v7  ;;  %v4350_v55 = vpop.f32.mrb[16].mxu1  ;;  %v2193_v28 = vand.u32 2147483647, %v4360_v9 }
 0x476   : > { %v3380_v42 = vpop.eup %3379  ;;  %v2299_v56 = vsub.f32 1.0, %v3378_v19  ;;  %v2607_v57 = vmin.f32 %v2591_v45, 1000000.0  ;;  %3397 = vpow2.f32 %v2403_v46  ;;  %v4352_v60 = vpop.f32.mrb[17].mxu1  ;;  %v2405_v23 = vmul.f32 1.442695, %v2384_v59 }
 0x477   : > { %v3382_v3 = vpop.eup %3381  ;;  %v2444_v4 = vmul.f32 0.6931472, %v3380_v42  ;;  %2625 = vst [vmem:[%s3876_s17 + $0xa0] sm:$0xff] %v2609_v48  ;;  %3399 = vrcp.f32 %v2254_v49  ;;  %v4364_v13 = vpop.f32.mrb[18].mxu1  ;;  %v2549_v35 = vmin.f32 %v2165_v10, 14.815511  ;;  %v4381_v41 = vadd.f32 %v4330_v18, %v4260_v30 }
 0x478   : > { %v3384_v14 = vpop.eup %3383  ;;  %v2315_v51 = vsel %vm2283_vm0, %v3378_v19, %v2299_v56  ;;  %v2300_v22 = vsub.f32 1.0, %v3382_v3  ;;  %2623 = vst [vmem:[%s3876_s17 + $0x70] sm:$0xff] %v2607_v57  ;;  %3401 = vpow2.f32 %v2229_v52  ;;  %v4369_v24 = vpop.f32.mrb[19].mxu1  ;;  %v2209_v39 = vsub.f32 0.0, %v2193_v28 }
 0x479   : > { %v3386_v25 = vpop.eup %3385  ;;  %2331 = vst [vmem:[%s3876_s17] sm:$0xff] %v2315_v51  ;;  %v2475_v8 = vadd.f32 %v2444_v4, %v2347_v15  ;;  %v2430_v27 = vadd.f32 1.0, %v3384_v14  ;;  %3403 = vpow2.f32 %v2405_v23  ;;  %v2575_v2 = vmul.f32 1.442695, %v2549_v35 }
 0x47a   : > { %v3388_v31 = vpop.eup %3387  ;;  %v2316_v32 = vsel %vm2284_vm1, %v3382_v3, %v2300_v22  ;;  %v2446_v33 = vmul.f32 0.6931472, %v3386_v25  ;;  %v2231_v45 = vmul.f32 1.442695, %v2209_v39  ;;  %v2157_v46 = vadd.f32 %v4306_v54, %v4262_v12 }
 0x47b   : > { %v3390_v36 = vpop.eup %3389  ;;  %v2491_v7 = vmax.f32 %v2475_v8, 1e-05  ;;  %2332 = vst [vmem:[%s3876_s17 + $0x18] sm:$0xff] %v2316_v32  ;;  %3405 = vlog2.f32 %v2430_v27  ;;  %v2594_v37 = vmax.f32 %v3388_v31, 1e-05  ;;  %vm2286_vm3 = vcmp.ge.f32.partialorder %v4294_v16, 0.0 }
 0x47c   : > { %v2476_v50 = vadd.f32 %v2446_v33, %v2348_v40  ;;  %v2592_v15 = vmax.f32 %v3390_v36, 1e-05  ;;  %3407 = vpow2.f32 %v2575_v2  ;;  %v2369_v42 = vand.u32 2147483647, %v4381_v41 }
 0x47d   : > { %v3392_v5 = vpop.eup %3391  ;;  %v2507_v43 = vmin.f32 %v2491_v7, 1000000.0  ;;  %v2610_v44 = vmin.f32 %v2594_v37, 1000000.0  ;;  %v4385_v49 = vpop.f32.mrb[20].mxu1  ;;  %3409 = vpow2.f32 %v2231_v45  ;;  %v4401_v25 = vadd.f32 %v4336_v26, %v4256_v29 }
 0x47e   : > { %v3394_v47 = vpop.eup %3393  ;;  %v2492_v19 = vmax.f32 %v2476_v50, 1e-05  ;;  %v2301_v48 = vsub.f32 1.0, %v3392_v5  ;;  %v2608_v40 = vmin.f32 %v2592_v15, 1000000.0  ;;  %v4391_v56 = vpop.f32.mrb[21].mxu1  ;;  %v2168_v31 = vadd.f32 %v4308_v58, %v4262_v12 }
 0x47f   : > { %v3396_v52 = vpop.eup %3395  ;;  %2523 = vst [vmem:[%s3876_s17 + $0x8] sm:$0xff] %v2507_v43  ;;  %v2448_v18 = vmul.f32 0.6931472, %v3394_v47  ;;  %2626 = vst [vmem:[%s3876_s17 + $0xb8] sm:$0xff] %v2610_v44  ;;  %v2547_v4 = vmin.f32 %v2157_v46, 14.815511  ;;  %v4417_v16 = vadd.f32 %v4339_v34, %v4260_v30  ;;  %v2160_v44 = vadd.f32 %v4317_v0, %v4262_v12 }
 0x480   : > { %v3398_v54 = vpop.eup %3397  ;;  %v2508_v57 = vmin.f32 %v2492_v19, 1000000.0  ;;  %v2317_v59 = vsel %vm2285_vm2, %v3392_v5, %v2301_v48  ;;  %2624 = vst [vmem:[%s3876_s17 + $0x88] sm:$0xff] %v2608_v40  ;;  %v2255_v3 = vadd.f32 1.0, %v3396_v52  ;;  %v4396_v10 = vpop.f32.mrb[22].mxu1  ;;  %v2385_v23 = vsub.f32 0.0, %v2369_v42 }
 0x481   : > { %v3400_v14 = vpop.eup %3399  ;;  %2333 = vst [vmem:[%s3876_s17 + $0x30] sm:$0xff] %v2317_v59  ;;  %v2477_v51 = vadd.f32 %v2448_v18, %v2349_v53  ;;  %v2431_v22 = vadd.f32 1.0, %v3398_v54  ;;  %v4403_v8 = vpop.f32.mrb[23].mxu1  ;;  %v2571_v28 = vmul.f32 1.442695, %v2547_v4  ;;  %v2350_v36 = vmax.f32 %v4298_v21, 0.0 }
 0x482   : > { %v3402_v27 = vpop.eup %3401  ;;  %2524 = vst [vmem:[%s3876_s17 + $0x20] sm:$0xff] %v2508_v57  ;;  %v2302_v61 = vsub.f32 1.0, %v3400_v14  ;;  %3411 = vrcp.f32 %v2255_v3  ;;  %v2407_v33 = vmul.f32 1.442695, %v2385_v23  ;;  %v2194_v7 = vand.u32 2147483647, %v4401_v25 }
 0x483   : > { %v2493_v32 = vmax.f32 %v2477_v51, 1e-05  ;;  %3413 = vlog2.f32 %v2431_v22  ;;  %v2256_v53 = vadd.f32 1.0, %v3402_v27  ;;  %v3404_v35 = vpop.eup %3403  ;;  %v2550_v58 = vmin.f32 %v2168_v31, 14.815511 }
 0x484   : > { %v2318_v26 = vsel %vm2286_vm3, %v3400_v14, %v2302_v61  ;;  %3415 = vpow2.f32 %v2571_v28  ;;  %v2432_v50 = vadd.f32 1.0, %v3404_v35  ;;  %v2210_v5 = vsub.f32 0.0, %v2194_v7 }
 0x485   : > { %v3406_v37 = vpop.eup %3405  ;;  %v2509_v39 = vmin.f32 %v2493_v32, 1000000.0  ;;  %2334 = vst [vmem:[%s3876_s17 + $0x48] sm:$0xff] %v2318_v26  ;;  %3417 = vrcp.f32 %v2256_v53  ;;  %v4413_v15 = vpop.f32.mrb[24].mxu1  ;;  %v2577_v21 = vmul.f32 1.442695, %v2550_v58  ;;  %v4426_v45 = vadd.f32 %v4350_v55, %v4256_v29 }
 0x486   : > { %v2450_v2 = vmul.f32 0.6931472, %v3406_v37  ;;  %3419 = vpow2.f32 %v2407_v33  ;;  %v4419_v43 = vpop.f32.mrb[25].mxu1  ;;  %v3408_v47 = vpop.eup %3407  ;;  %vm2287_vm4 = vcmp.ge.f32.partialorder %v4312_v62, 0.0  ;;  %v2233_v34 = vmul.f32 1.442695, %v2210_v5 }
 0x487   : > { %2525 = vst [vmem:[%s3876_s17 + $0x38] sm:$0xff] %v2509_v39  ;;  %3421 = vlog2.f32 %v2432_v50  ;;  %v4428_v46 = vpop.f32.mrb[26].mxu1  ;;  %v2370_v48 = vand.u32 2147483647, %v4417_v16  ;;  %v3410_v52 = vpop.eup %3409  ;;  %v2597_v18 = vmax.f32 %v3408_v47, 1e-05  ;;  %v4438_v27 = vadd.f32 %v4352_v60, %v4260_v30 }
 0x488   : > { %v2478_v19 = vadd.f32 %v2450_v2, %v2350_v36  ;;  %v4432_v40 = vpop.f32.mrb[27].mxu1  ;;  %3423 = vpow2.f32 %v2577_v21  ;;  %v2548_v42 = vmin.f32 %v2160_v44, 14.815511  ;;  %v2195_v0 = vand.u32 2147483647, %v4426_v45 }
 0x489   : > { %v2257_v54 = vadd.f32 1.0, %v3410_v52  ;;  %3425 = vpow2.f32 %v2233_v34  ;;  %v2386_v57 = vsub.f32 0.0, %v2370_v48  ;;  %v2351_v59 = vmax.f32 %v4315_v63, 0.0 }
 0x48a   : > { %v2494_v55 = vmax.f32 %v2478_v19, 1e-05  ;;  %v2613_v3 = vmin.f32 %v2597_v18, 1000000.0  ;;  %v2573_v4 = vmul.f32 1.442695, %v2548_v42  ;;  %v4443_v63 = vadd.f32 %v4364_v13, %v4256_v29 }
 0x48b   : > { %v2211_v14 = vsub.f32 0.0, %v2195_v0  ;;  %3427 = vrcp.f32 %v2257_v54  ;;  %v2409_v23 = vmul.f32 1.442695, %v2386_v57  ;;  %vm2288_vm5 = vcmp.ge.f32.partialorder %v4320_v6, 0.0 }
 0x48c   : > { %v3412_v51 = vpop.eup %3411  ;;  %v2510_v22 = vmin.f32 %v2494_v55, 1000000.0  ;;  %2629 = vst [vmem:[%s3876_s17 + $0x100] sm:$0xff] %v2613_v3  ;;  %3429 = vpow2.f32 %v2573_v4  ;;  %v2371_v60 = vand.u32 2147483647, %v4438_v27  ;;  %v2352_v2 = vmax.f32 %v4328_v17, 0.0 }
 0x48d   : > { %v3414_v61 = vpop.eup %3413  ;;  %v2303_v28 = vsub.f32 1.0, %v3412_v51  ;;  %v2235_v31 = vmul.f32 1.442695, %v2211_v14  ;;  %v4445_v32 = vpop.f32.mrb[28].mxu1  ;;  %3431 = vpow2.f32 %v2409_v23  ;;  %v2196_v13 = vand.u32 2147483647, %v4443_v63 }
 0x48e   : > { %v3416_v53 = vpop.eup %3415  ;;  %2526 = vst [vmem:[%s3876_s17 + $0x50] sm:$0xff] %v2510_v22  ;;  %v2452_v33 = vmul.f32 0.6931472, %v3414_v61  ;;  %v4450_v35 = vpop.f32.mrb[29].mxu1  ;;  %v2387_v5 = vsub.f32 0.0, %v2371_v60  ;;  %v4463_v34 = vadd.f32 %v4369_v24, %v4260_v30  ;;  %v4472_v6 = vadd.f32 %v4385_v49, %v4256_v29 }
 0x48f   : > { %v3418_v26 = vpop.eup %3417  ;;  %v2319_v36 = vsel %vm2287_vm4, %v3412_v51, %v2303_v28  ;;  %v2595_v7 = vmax.f32 %v3416_v53, 1e-05  ;;  %3433 = vpow2.f32 %v2235_v31  ;;  %v4455_v37 = vpop.f32.mrb[30].mxu1  ;;  %v2212_v19 = vsub.f32 0.0, %v2196_v13 }
 0x490   : > { %v3420_v39 = vpop.eup %3419  ;;  %2335 = vst [vmem:[%s3876_s17 + $0x60] sm:$0xff] %v2319_v36  ;;  %v2479_v50 = vadd.f32 %v2452_v33, %v2351_v59  ;;  %v2304_v58 = vsub.f32 1.0, %v3418_v26  ;;  %v4459_v21 = vpop.f32.mrb[31].mxu1  ;;  %v2411_v42 = vmul.f32 1.442695, %v2387_v5  ;;  %v2181_v23 = vadd.f32 %v4332_v20, %v4262_v12 }
 0x491   : > { %v3422_v44 = vpop.eup %3421  ;;  %v2433_v62 = vadd.f32 1.0, %v3420_v39  ;;  %v2611_v47 = vmin.f32 %v2595_v7, 1000000.0  ;;  %v2237_v17 = vmul.f32 1.442695, %v2212_v19  ;;  %v4479_v61 = vadd.f32 %v4391_v56, %v4260_v30 }
 0x492   : > { %v2495_v48 = vmax.f32 %v2479_v50, 1e-05  ;;  %v2320_v52 = vsel %vm2288_vm5, %v3418_v26, %v2304_v58  ;;  %v2454_v18 = vmul.f32 0.6931472, %v3422_v44  ;;  %v3424_v0 = vpop.eup %3423  ;;  %v2372_v55 = vand.u32 2147483647, %v4463_v34 }
 0x493   : > { %2336 = vst [vmem:[%s3876_s17 + $0x78] sm:$0xff] %v2320_v52  ;;  %3435 = vlog2.f32 %v2433_v62  ;;  %2627 = vst [vmem:[%s3876_s17 + $0xd0] sm:$0xff] %v2611_v47  ;;  %v3426_v54 = vpop.eup %3425  ;;  %v2598_v3 = vmax.f32 %v3424_v0, 1e-05  ;;  %v2197_v49 = vand.u32 2147483647, %v4472_v6  ;;  %v2173_v58 = vadd.f32 %v4343_v38, %v4262_v12 }
 0x494   : > { %v2511_v57 = vmin.f32 %v2495_v48, 1000000.0  ;;  %v2480_v59 = vadd.f32 %v2454_v18, %v2352_v2  ;;  %3437 = vpow2.f32 %v2411_v42  ;;  %v2258_v24 = vadd.f32 1.0, %v3426_v54 }
 0x495   : > { %3439 = vpow2.f32 %v2237_v17  ;;  %v2388_v4 = vsub.f32 0.0, %v2372_v55  ;;  %v3428_v14 = vpop.eup %3427  ;;  %v2614_v22 = vmin.f32 %v2598_v3, 1000000.0  ;;  %vm2289_vm6 = vcmp.ge.f32.partialorder %v4360_v9, 0.0 }
 0x496   : > { %2527 = vst [vmem:[%s3876_s17 + $0x68] sm:$0xff] %v2511_v57  ;;  %v2496_v51 = vmax.f32 %v2480_v59, 1e-05  ;;  %v3430_v28 = vpop.eup %3429  ;;  %v2305_v31 = vsub.f32 1.0, %v3428_v14  ;;  %3441 = vrcp.f32 %v2258_v24  ;;  %v2213_v56 = vsub.f32 0.0, %v2197_v49 }
 0x497   : > { %v2413_v53 = vmul.f32 1.442695, %v2388_v4  ;;  %v3432_v33 = vpop.eup %3431  ;;  %2630 = vst [vmem:[%s3876_s17 + $0x118] sm:$0xff] %v2614_v22  ;;  %v2596_v26 = vmax.f32 %v3430_v28, 1e-05  ;;  %v4491_v5 = vadd.f32 %v4396_v10, %v4256_v29  ;;  %v2184_v47 = vadd.f32 %v4347_v11, %v4262_v12 }
 0x498   : > { %v2512_v60 = vmin.f32 %v2496_v51, 1000000.0  ;;  %v2321_v36 = vsel %vm2289_vm6, %v3428_v14, %v2305_v31  ;;  %v2434_v7 = vadd.f32 1.0, %v3432_v33  ;;  %v2553_v50 = vmin.f32 %v2181_v23, 14.815511 }
 0x499   : > { %v3434_v20 = vpop.eup %3433  ;;  %3443 = vpow2.f32 %v2413_v53  ;;  %2337 = vst [vmem:[%s3876_s17 + $0x90] sm:$0xff] %v2321_v36  ;;  %v2612_v13 = vmin.f32 %v2596_v26, 1000000.0  ;;  %v2239_v2 = vmul.f32 1.442695, %v2213_v56  ;;  %v2353_v48 = vmax.f32 %v4381_v41, 0.0 }
 0x49a   : > { %2528 = vst [vmem:[%s3876_s17 + $0x80] sm:$0xff] %v2512_v60  ;;  %v2259_v39 = vadd.f32 1.0, %v3434_v20  ;;  %3445 = vlog2.f32 %v2434_v7  ;;  %v2373_v9 = vand.u32 2147483647, %v4479_v61  ;;  %v2583_v44 = vmul.f32 1.442695, %v2553_v50 }
 0x49b   : > { %2628 = vst [vmem:[%s3876_s17 + $0xe8] sm:$0xff] %v2612_v13  ;;  %v2551_v62 = vmin.f32 %v2173_v58, 14.815511  ;;  %v2198_v52 = vand.u32 2147483647, %v4491_v5  ;;  %v4500_v59 = vadd.f32 %v4403_v8, %v4260_v30  ;;  %vm2290_vm7 = vcmp.ge.f32.partialorder %v4401_v25, 0.0 }
 0x49c   : > { %3447 = vrcp.f32 %v2259_v39  ;;  %v2389_v38 = vsub.f32 0.0, %v2373_v9  ;;  %v2554_v10 = vmin.f32 %v2184_v47, 14.815511  ;;  %v2176_v23 = vadd.f32 %v4354_v1, %v4262_v12 }
 0x49d   : > { %v3436_v19 = vpop.eup %3435  ;;  %3449 = vpow2.f32 %v2239_v2  ;;  %v2579_v0 = vmul.f32 1.442695, %v2551_v62  ;;  %v2214_v57 = vsub.f32 0.0, %v2198_v52  ;;  %v2374_v14 = vand.u32 2147483647, %v4500_v59 }
 0x49e   : > { %v3438_v18 = vpop.eup %3437  ;;  %v2456_v42 = vmul.f32 0.6931472, %v3436_v19  ;;  %3451 = vpow2.f32 %v2583_v44  ;;  %v2415_v54 = vmul.f32 1.442695, %v2389_v38  ;;  %v2585_v4 = vmul.f32 1.442695, %v2554_v10 }
 0x49f   : > { %v3440_v17 = vpop.eup %3439  ;;  %v2435_v55 = vadd.f32 1.0, %v3438_v18  ;;  %3453 = vpow2.f32 %v2579_v0  ;;  %v2241_v24 = vmul.f32 1.442695, %v2214_v57  ;;  %v2390_v28 = vsub.f32 0.0, %v2374_v14 }
 0x4a0   : > { %v2481_v11 = vadd.f32 %v2456_v42, %v2353_v48  ;;  %v2260_v41 = vadd.f32 1.0, %v3440_v17  ;;  %v3442_v3 = vpop.eup %3441  ;;  %v4508_v31 = vadd.f32 %v4413_v15, %v4256_v29  ;;  %v4512_v53 = vadd.f32 %v4419_v43, %v4260_v30 }
 0x4a1   : > { %3455 = vlog2.f32 %v2435_v55  ;;  %v2306_v22 = vsub.f32 1.0, %v3442_v3  ;;  %v2417_v12 = vmul.f32 1.442695, %v2390_v28  ;;  %v2552_v1 = vmin.f32 %v2176_v23, 14.815511 }
 0x4a2   : > { %v2497_v51 = vmax.f32 %v2481_v11, 1e-05  ;;  %3457 = vrcp.f32 %v2260_v41  ;;  %v2199_v20 = vand.u32 2147483647, %v4508_v31  ;;  %v2354_v15 = vmax.f32 %v4417_v16, 0.0 }
 0x4a3   : > { %v3444_v8 = vpop.eup %3443  ;;  %3459 = vpow2.f32 %v2415_v54  ;;  %v2322_v33 = vsel %vm2290_vm7, %v3442_v3, %v2306_v22  ;;  %vm2291_vm8 = vcmp.ge.f32.partialorder %v4426_v45, 0.0  ;;  %v2581_v56 = vmul.f32 1.442695, %v2552_v1 }
 0x4a4   : > { %v2513_v49 = vmin.f32 %v2497_v51, 1000000.0  ;;  %v2436_v60 = vadd.f32 1.0, %v3444_v8  ;;  %3461 = vpow2.f32 %v2241_v24  ;;  %v3446_v26 = vpop.eup %3445  ;;  %2338 = vst [vmem:[%s3876_s17 + $0xa8] sm:$0xff] %v2322_v33  ;;  %v2215_v13 = vsub.f32 0.0, %v2199_v20 }
 0x4a5   : > { %3463 = vpow2.f32 %v2585_v4  ;;  %v2458_v7 = vmul.f32 0.6931472, %v3446_v26  ;;  %v2375_v2 = vand.u32 2147483647, %v4512_v53  ;;  %v4524_v9 = vadd.f32 %v4428_v46, %v4256_v29 }
 0x4a6   : > { %v3448_v36 = vpop.eup %3447  ;;  %2529 = vst [vmem:[%s3876_s17 + $0x98] sm:$0xff] %v2513_v49  ;;  %3465 = vlog2.f32 %v2436_v60  ;;  %v2243_v45 = vmul.f32 1.442695, %v2215_v13  ;;  %v2355_v52 = vmax.f32 %v4438_v27, 0.0  ;;  %v4531_v55 = vadd.f32 %v4432_v40, %v4260_v30 }
 0x4a7   : > { %v3450_v43 = vpop.eup %3449  ;;  %v2307_v25 = vsub.f32 1.0, %v3448_v36  ;;  %3467 = vpow2.f32 %v2417_v12  ;;  %v2482_v50 = vadd.f32 %v2458_v7, %v2354_v15  ;;  %v2391_v19 = vsub.f32 0.0, %v2375_v2 }
 0x4a8   : > { %v3452_v39 = vpop.eup %3451  ;;  %v2261_v58 = vadd.f32 1.0, %v3450_v43  ;;  %3469 = vpow2.f32 %v2581_v56  ;;  %v2200_v48 = vand.u32 2147483647, %v4524_v9  ;;  %v4536_v27 = vadd.f32 %v4445_v32, %v4256_v29 }
 0x4a9   : > { %v2323_v16 = vsel %vm2291_vm8, %v3448_v36, %v2307_v25  ;;  %v2601_v44 = vmax.f32 %v3452_v39, 1e-05  ;;  %v3454_v62 = vpop.eup %3453  ;;  %v2498_v47 = vmax.f32 %v2482_v50, 1e-05  ;;  %v2419_v17 = vmul.f32 1.442695, %v2391_v19 }
 0x4aa   : > { %2339 = vst [vmem:[%s3876_s17 + $0xc0] sm:$0xff] %v2323_v16  ;;  %3471 = vrcp.f32 %v2261_v58  ;;  %v2599_v42 = vmax.f32 %v3454_v62, 1e-05  ;;  %v2216_v41 = vsub.f32 0.0, %v2200_v48  ;;  %vm2292_vm9 = vcmp.ge.f32.partialorder %v4443_v63, 0.0 }
 0x4ab   : > { %v3456_v38 = vpop.eup %3455  ;;  %v2617_v18 = vmin.f32 %v2601_v44, 1000000.0  ;;  %3473 = vpow2.f32 %v2243_v45  ;;  %v2514_v0 = vmin.f32 %v2498_v47, 1000000.0  ;;  %v2376_v23 = vand.u32 2147483647, %v4531_v55 }
 0x4ac   : > { %v3458_v46 = vpop.eup %3457  ;;  %v2460_v10 = vmul.f32 0.6931472, %v3456_v38  ;;  %v2615_v11 = vmin.f32 %v2599_v42, 1000000.0  ;;  %3475 = vpow2.f32 %v2419_v17  ;;  %v2245_v22 = vmul.f32 1.442695, %v2216_v41 }
 0x4ad   : > { %v3460_v54 = vpop.eup %3459  ;;  %v2308_v57 = vsub.f32 1.0, %v3458_v46  ;;  %2633 = vst [vmem:[%s3876_s17 + $0x160] sm:$0xff] %v2617_v18  ;;  %2530 = vst [vmem:[%s3876_s17 + $0xb0] sm:$0xff] %v2514_v0  ;;  %v2201_v49 = vand.u32 2147483647, %v4536_v27  ;;  %v2356_v63 = vmax.f32 %v4463_v34, 0.0  ;;  %v4547_v25 = vadd.f32 %v4450_v35, %v4260_v30 }
 0x4ae   : > { %v3462_v3 = vpop.eup %3461  ;;  %v2483_v24 = vadd.f32 %v2460_v10, %v2355_v52  ;;  %v2437_v4 = vadd.f32 1.0, %v3460_v54  ;;  %2631 = vst [vmem:[%s3876_s17 + $0x130] sm:$0xff] %v2615_v11  ;;  %v2392_v26 = vsub.f32 0.0, %v2376_v23  ;;  %v4553_v13 = vadd.f32 %v4455_v37, %v4256_v29 }
 0x4af   : > { %v3464_v14 = vpop.eup %3463  ;;  %v2324_v40 = vsel %vm2292_vm9, %v3458_v46, %v2308_v57  ;;  %v2262_v51 = vadd.f32 1.0, %v3462_v3  ;;  %v2217_v43 = vsub.f32 0.0, %v2201_v49  ;;  %v4557_v39 = vadd.f32 %v4459_v21, %v4260_v30 }
 0x4b0   : > { %v3466_v8 = vpop.eup %3465  ;;  %v2499_v28 = vmax.f32 %v2483_v24, 1e-05  ;;  %2340 = vst [vmem:[%s3876_s17 + $0xd8] sm:$0xff] %v2324_v40  ;;  %3477 = vlog2.f32 %v2437_v4  ;;  %v2602_v32 = vmax.f32 %v3464_v14, 1e-05  ;;  %vm2293_vm10 = vcmp.ge.f32.partialorder %v4472_v6, 0.0 }
 0x4b1   : > { %v3468_v33 = vpop.eup %3467  ;;  %v2462_v60 = vmul.f32 0.6931472, %v3466_v8  ;;  %3479 = vrcp.f32 %v2262_v51  ;;  %v2421_v7 = vmul.f32 1.442695, %v2392_v26  ;;  %v2247_v35 = vmul.f32 1.442695, %v2217_v43 }
 0x4b2   : > { %v2515_v12 = vmin.f32 %v2499_v28, 1000000.0  ;;  %v2618_v1 = vmin.f32 %v2602_v32, 1000000.0  ;;  %v2438_v20 = vadd.f32 1.0, %v3468_v33  ;;  %3481 = vpow2.f32 %v2245_v22  ;;  %v3470_v36 = vpop.eup %3469 }
 0x4b3   : > { %v2484_v15 = vadd.f32 %v2462_v60, %v2356_v63  ;;  %v2600_v34 = vmax.f32 %v3470_v36, 1e-05  ;;  %v2377_v45 = vand.u32 2147483647, %v4547_v25  ;;  %v2202_v62 = vand.u32 2147483647, %v4553_v13 }
 0x4b4   : > { %v3472_v56 = vpop.eup %3471  ;;  %2531 = vst [vmem:[%s3876_s17 + $0xc8] sm:$0xff] %v2515_v12  ;;  %2634 = vst [vmem:[%s3876_s17 + $0x178] sm:$0xff] %v2618_v1  ;;  %3483 = vlog2.f32 %v2438_v20  ;;  %v2378_v48 = vand.u32 2147483647, %v4557_v39  ;;  %v2357_v38 = vmax.f32 %v4479_v61, 0.0  ;;  %vm2294_vm11 = vcmp.ge.f32.partialorder %v4491_v5, 0.0 }
 0x4b5   : > { %v3474_v50 = vpop.eup %3473  ;;  %v2500_v58 = vmax.f32 %v2484_v15, 1e-05  ;;  %v2309_v2 = vsub.f32 1.0, %v3472_v56  ;;  %3485 = vpow2.f32 %v2421_v7  ;;  %v2616_v16 = vmin.f32 %v2600_v34, 1000000.0 }
 0x4b6   : > { %v2263_v44 = vadd.f32 1.0, %v3474_v50  ;;  %3487 = vpow2.f32 %v2247_v35  ;;  %v3476_v30 = vpop.eup %3475  ;;  %v2393_v21 = vsub.f32 0.0, %v2377_v45  ;;  %v2218_v19 = vsub.f32 0.0, %v2202_v62 }
 0x4b7   : > { %v2516_v29 = vmin.f32 %v2500_v58, 1000000.0  ;;  %v2325_v37 = vsel %vm2293_vm10, %v3472_v56, %v2309_v2  ;;  %2632 = vst [vmem:[%s3876_s17 + $0x148] sm:$0xff] %v2616_v16  ;;  %v2439_v47 = vadd.f32 1.0, %v3476_v30  ;;  %v2394_v0 = vsub.f32 0.0, %v2378_v48 }
 0x4b8   : > { %2341 = vst [vmem:[%s3876_s17 + $0xf0] sm:$0xff] %v2325_v37  ;;  %3489 = vrcp.f32 %v2263_v44  ;;  %v2423_v52 = vmul.f32 1.442695, %v2393_v21  ;;  %v2249_v46 = vmul.f32 1.442695, %v2218_v19  ;;  %v2358_v4 = vmax.f32 %v4500_v59, 0.0 }
 0x4b9   : > { %2532 = vst [vmem:[%s3876_s17 + $0xe0] sm:$0xff] %v2516_v29  ;;  %3491 = vlog2.f32 %v2439_v47  ;;  %v2425_v11 = vmul.f32 1.442695, %v2394_v0  ;;  %vm2295_vm12 = vcmp.ge.f32.partialorder %v4508_v31, 0.0  ;;  %v2359_v60 = vmax.f32 %v4512_v53, 0.0 }
 0x4ba   : > { %v3478_v6 = vpop.eup %3477  ;;  %3493 = vpow2.f32 %v2423_v52  ;;  %vm2296_vm13 = vcmp.ge.f32.partialorder %v4524_v9, 0.0  ;;  %v2360_v58 = vmax.f32 %v4531_v55, 0.0  ;;  %vm2297_vm14 = vcmp.ge.f32.partialorder %v4536_v27, 0.0 }
 0x4bb   : > { %v3480_v18 = vpop.eup %3479  ;;  %v2464_v42 = vmul.f32 0.6931472, %v3478_v6  ;;  %3495 = vpow2.f32 %v2249_v46  ;;  %v2361_v30 = vmax.f32 %v4547_v25, 0.0  ;;  %vm2298_vm15 = vcmp.ge.f32.partialorder %v4553_v13, 0.0 }
 0x4bc   : > { %v3482_v10 = vpop.eup %3481  ;;  %v2310_v17 = vsub.f32 1.0, %v3480_v18  ;;  %v2362_v6 = vmax.f32 %v4557_v39, 0.0 }
 0x4bd   : > { %v2485_v54 = vadd.f32 %v2464_v42, %v2357_v38  ;;  %v2264_v57 = vadd.f32 1.0, %v3482_v10 }
 0x4be   : > { %v3484_v41 = vpop.eup %3483  ;;  %v2326_v3 = vsel %vm2294_vm11, %v3480_v18, %v2310_v17 }
 0x4bf   : > { %v3486_v61 = vpop.eup %3485  ;;  %v2501_v24 = vmax.f32 %v2485_v54, 1e-05  ;;  %2342 = vst [vmem:[%s3876_s17 + $0x108] sm:$0xff] %v2326_v3  ;;  %v2466_v14 = vmul.f32 0.6931472, %v3484_v41  ;;  %3497 = vrcp.f32 %v2264_v57 }
 0x4c0   : > { %v2440_v40 = vadd.f32 1.0, %v3486_v61  ;;  %3499 = vpow2.f32 %v2425_v11  ;;  %v3488_v5 = vpop.eup %3487 }
 0x4c1   : > { %v2517_v51 = vmin.f32 %v2501_v24, 1000000.0  ;;  %v2486_v22 = vadd.f32 %v2466_v14, %v2358_v4  ;;  %v2265_v8 = vadd.f32 1.0, %v3488_v5 }
 0x4c2   : > { %v3490_v23 = vpop.eup %3489  ;;  %3501 = vlog2.f32 %v2440_v40 }
 0x4c3   : > { %2533 = vst [vmem:[%s3876_s17 + $0xf8] sm:$0xff] %v2517_v51  ;;  %v2502_v28 = vmax.f32 %v2486_v22, 1e-05  ;;  %v2311_v32 = vsub.f32 1.0, %v3490_v23  ;;  %3503 = vrcp.f32 %v2265_v8  ;;  %v3492_v49 = vpop.eup %3491 }
 0x4c4   : > { %v3494_v63 = vpop.eup %3493  ;;  %v2468_v26 = vmul.f32 0.6931472, %v3492_v49 }
 0x4c5   : > { %v2518_v59 = vmin.f32 %v2502_v28, 1000000.0  ;;  %v2327_v33 = vsel %vm2295_vm12, %v3490_v23, %v2311_v32  ;;  %v3496_v12 = vpop.eup %3495  ;;  %v2441_v1 = vadd.f32 1.0, %v3494_v63 }
 0x4c6   : > { %2343 = vst [vmem:[%s3876_s17 + $0x120] sm:$0xff] %v2327_v33  ;;  %v2487_v20 = vadd.f32 %v2468_v26, %v2359_v60  ;;  %v2266_v36 = vadd.f32 1.0, %v3496_v12 }
 0x4c7   : > { %2534 = vst [vmem:[%s3876_s17 + $0x110] sm:$0xff] %v2518_v59  ;;  %3505 = vlog2.f32 %v2441_v1 }
 0x4c8   : > { %v2503_v31 = vmax.f32 %v2487_v20, 1e-05  ;;  %3507 = vrcp.f32 %v2266_v36 }
 0x4c9   : > { %v3498_v15 = vpop.eup %3497 }
 0x4ca   : > { %v3500_v7 = vpop.eup %3499  ;;  %v2312_v43 = vsub.f32 1.0, %v3498_v15  ;;  %v2519_v53 = vmin.f32 %v2503_v31, 1000000.0 }
 0x4cb   : > { %v2442_v56 = vadd.f32 1.0, %v3500_v7 }
 0x4cc   : > { %v3502_v34 = vpop.eup %3501  ;;  %v2328_v50 = vsel %vm2296_vm13, %v3498_v15, %v2312_v43  ;;  %2535 = vst [vmem:[%s3876_s17 + $0x128] sm:$0xff] %v2519_v53 }
 0x4cd   : > { %2344 = vst [vmem:[%s3876_s17 + $0x138] sm:$0xff] %v2328_v50  ;;  %v2470_v2 = vmul.f32 0.6931472, %v3502_v34  ;;  %3509 = vlog2.f32 %v2442_v56  ;;  %v3504_v35 = vpop.eup %3503 }
 0x4ce   : > { %v2313_v44 = vsub.f32 1.0, %v3504_v35 }
 0x4cf   : > { %v2488_v16 = vadd.f32 %v2470_v2, %v2360_v58 }
 0x4d0   : > { %v2329_v9 = vsel %vm2297_vm14, %v3504_v35, %v2313_v44 }
 0x4d1   : > { %v2504_v45 = vmax.f32 %v2488_v16, 1e-05  ;;  %2345 = vst [vmem:[%s3876_s17 + $0x150] sm:$0xff] %v2329_v9  ;;  %v3506_v29 = vpop.eup %3505 }
 0x4d2   : > { %v3508_v62 = vpop.eup %3507  ;;  %v2472_v55 = vmul.f32 0.6931472, %v3506_v29 }
 0x4d3   : > { %v2520_v37 = vmin.f32 %v2504_v45, 1000000.0  ;;  %v2314_v21 = vsub.f32 1.0, %v3508_v62 }
 0x4d4   : > { %v2489_v47 = vadd.f32 %v2472_v55, %v2361_v30 }
 0x4d5   : > { %2536 = vst [vmem:[%s3876_s17 + $0x140] sm:$0xff] %v2520_v37  ;;  %v2330_v48 = vsel %vm2298_vm15, %v3508_v62, %v2314_v21 }
 0x4d6   : > { %v2505_v27 = vmax.f32 %v2489_v47, 1e-05  ;;  %2346 = vst [vmem:[%s3876_s17 + $0x168] sm:$0xff] %v2330_v48 }
 0x4d7   : > { %v3510_v19 = vpop.eup %3509 }
 0x4d8   : > { %v2474_v38 = vmul.f32 0.6931472, %v3510_v19  ;;  %v2521_v52 = vmin.f32 %v2505_v27, 1000000.0 }
 0x4da   : > { %v2490_v18 = vadd.f32 %v2474_v38, %v2362_v6  ;;  %2537 = vst [vmem:[%s3876_s17 + $0x158] sm:$0xff] %v2521_v52 }
 0x4dc   : > { %v2506_v42 = vmax.f32 %v2490_v18, 1e-05 }
 0x4de   : > { %v2522_v46 = vmin.f32 %v2506_v42, 1000000.0 }
 0x4e0   : > { %2538 = vst [vmem:[%s3876_s17 + $0x170] sm:$0xff] %v2522_v46 }
 0x4e1 PF: > { %s3028_s16 = sshll.u32 %s3641_s14, 11  ;;  %s4749_s15 = sld [smem:[#allocation26_spill]] }
 0x4e2   : > { %s2674_s22 = sshll.u32 %s3880_s23, 4  ;;  %s2641_s17 = scalar_lea.sflag [#allocation5], %s3853_s25  ;;  %s4597_s22 = int_to_ptr.vmem [resolvable:$true] %s2674_s22 }
 0x4e3   : > { %s3511_s20 = scalar_lea.vmem %s4597_s22, 2048  ;;  %s3658_s8 = smov [#allocation4]  }
 0x4e4   : > { %p3512_p8 = scmp.ne.s32.totalorder %s4597_s22, %s3511_s20  ;;  %s3515_s28 = sshll.u32 %s3658_s8, 4  ;;  %s3516_s28 = int_to_ptr.vmem [resolvable:$false] %s3515_s28 }
 0x4e5   : > { %s3517_s6 = scalar_lea.vmem %s3516_s28, 4096  ;;  %p3518_p11 = scmp.lt.s32.totalorder %s4597_s22, %s3516_s28 }
 0x4e6   : > { %p3513_p9 = pnand %p3512_p8, %p3804_p7  ;;  %p3519_p13 = scmp.lt.s32.totalorder %s3517_s6, %s3511_s20 }
 0x4e7   : > { %s4750_s24 = smov %s4749_s15  ;;  %s4594_s5 = scalar_lea.hbm %s4749_s15, %s3028_s16 }
 0x4e8   : > { %p3514_p10 = pneg %p3513_p9  ;;  %p3520_p0 = por %p3519_p13, %p3518_p11 }
 0x4ea   : > { %p3521_p1 = pnand %p3520_p0, %p3514_p10 }
 0x4ec   : > { %3524 = shalt.err (!%p3521_p1)
}
 0x4ed   : > { %s3525_s23 = scalar_lea.hbm %s4594_s5, 2048  ;;  %s3529_s1 = scalar_lea.hbm %s4750_s24, 4096 }
 0x4ee   : > { %p3526_p2 = scmp.ne.s32.totalorder %s4594_s5, %s3525_s23  ;;  %p3530_p5 = scmp.lt.u32.totalorder %s4594_s5, %s4750_s24 }
 0x4ef   : > { %p3531_p6 = scmp.lt.u32.totalorder %s3529_s1, %s3525_s23  ;;  %p3533_p9 = scmp.lt.u32.totalorder %s3525_s23, %s4594_s5 }
 0x4f0   : > { %p3527_p3 = pnand %p3526_p2, %p3804_p7 }
 0x4f1   : > { %p3532_p8 = por %p3531_p6, %p3530_p5 }
 0x4f2   : > { %p3528_p4 = pneg %p3527_p3 }
 0x4f3   : > { %p3534_p10 = por %p3533_p9, %p3532_p8 }
 0x4f5   : > { %p3535_p11 = pnand %p3534_p10, %p3528_p4 }
 0x4f7   : > { %3538 = shalt.err (!%p3535_p11)
}
 0x4f8   : > { %s3659_s29 = smov 128   ;;  %s3660_s18 = smov 8  }
 0x4f9   : > { %3174 = dma.vmem_to_hbm [thread:$0]  (%p3804_p7), %s4597_s22, 2048, %s4594_s5, %s2641_s17, %s3659_s29, %s3659_s29, %s3660_s18  }
 0x4fa   : > { %s4751_s20 = sld [smem:[#allocation27_spill]]  ;;  %s2694_s28 = sshll.u32 %s3882_s12, 4  ;;  %s4634_s28 = int_to_ptr.vmem [resolvable:$true] %s2694_s28 }
 0x4fb   : > { %s2651_s6 = scalar_lea.sflag [#allocation7], %s3853_s25  ;;  %s3539_s23 = scalar_lea.vmem %s4634_s28, 2048 }
 0x4fc   : > { %p3540_p13 = scmp.ne.s32.totalorder %s4634_s28, %s3539_s23  ;;  %s3661_s19 = smov [#allocation6]  }
 0x4fd   : > { %s3543_s5 = sshll.u32 %s3661_s19, 4  ;;  %s3544_s5 = int_to_ptr.vmem [resolvable:$false] %s3543_s5 }
 0x4fe   : > { %p3541_p0 = pnand %p3540_p13, %p3804_p7  ;;  %s3545_s14 = scalar_lea.vmem %s3544_s5, 4096 }
 0x4ff   : > { %p3546_p2 = scmp.lt.s32.totalorder %s4634_s28, %s3544_s5  ;;  %p3547_p3 = scmp.lt.s32.totalorder %s3545_s14, %s3539_s23 }
 0x500   : > { %s4631_s8 = scalar_lea.hbm %s4751_s20, %s3028_s16  ;;  %p3542_p1 = pneg %p3541_p0 }
 0x501   : > { %p3548_p4 = por %p3547_p3, %p3546_p2 }
 0x503   : > { %p3549_p5 = pnand %p3548_p4, %p3542_p1 }
 0x505   : > { %3552 = shalt.err (!%p3549_p5)
}
 0x506   : > { %s3553_s12 = scalar_lea.hbm %s4631_s8, 2048  ;;  %s3557_s17 = scalar_lea.hbm %s4751_s20, 4096 }
 0x507   : > { %p3554_p6 = scmp.ne.s32.totalorder %s4631_s8, %s3553_s12  ;;  %p3558_p10 = scmp.lt.u32.totalorder %s4631_s8, %s4751_s20 }
 0x508   : > { %p3559_p11 = scmp.lt.u32.totalorder %s3557_s17, %s3553_s12  ;;  %p3561_p0 = scmp.lt.u32.totalorder %s3553_s12, %s4631_s8 }
 0x509   : > { %p3555_p8 = pnand %p3554_p6, %p3804_p7 }
 0x50a   : > { %p3560_p13 = por %p3559_p11, %p3558_p10 }
 0x50b   : > { %p3556_p9 = pneg %p3555_p8 }
 0x50c   : > { %p3562_p1 = por %p3561_p0, %p3560_p13 }
 0x50e   : > { %p3563_p2 = pnand %p3562_p1, %p3556_p9 }
 0x510   : > { %3566 = shalt.err (!%p3563_p2)
}
 0x511   : > { %3175 = dma.vmem_to_hbm [thread:$0]  (%p3804_p7), %s4634_s28, 2048, %s4631_s8, %s2651_s6, %s3659_s29, %s3659_s29, %s3660_s18  }
 0x512 PF: > { %s4752_s26 = sld [smem:[#allocation16_spill]]  ;;  %s4753_s27 = sld [smem:[#allocation10_spill]] }
 0x518   : > { %p3185_p3 = scmp.ge.s32.totalorder %s4752_s26, 2  ;;  %s2721_s15 = sand.u32 1, %s4753_s27  }
 0x519   : > { %s2722_s23 = scalar_lea.sflag [#allocation5], %s2721_s15 }
 0x51a   : > { %p3179_p4 = pnand %p3185_p3, %p3812_p12 }
 0x51c   : > { %3608 = dma.done.wait (!%p3179_p4), %s2722_s23, 2048  }
 0x51d   : > { %3610 = vsyncadd (!%p3179_p4), %s2722_s23, 4294965248  ;;  %s2739_s10 = scalar_lea.sflag [#allocation7], %s2721_s15 }
 0x51e   : > { %3612 = dma.done.wait (!%p3179_p4), %s2739_s10, 2048  }
 0x51f   : > { %3614 = vsyncadd (!%p3179_p4), %s2739_s10, 4294965248  ;;  %s30_s17 = sadd.s32 1, %s4752_s26   ;;  %s4755_s25 = sld [smem:[#allocation11_spill]] }
 0x520   : > { %p27_p5 = scmp.ge.s32.totalorder %s30_s17, 6   ;;  %s4756_s26 = sld [smem:[#allocation12_spill]] }
 0x521   : > { %s4757_s27 = sld [smem:[#allocation20_spill]]  ;;  %s4758_s28 = sld [smem:[#allocation13_spill]] }
 0x522   : > { %s4759_s29 = sld [smem:[#allocation21_spill]]  ;;  %s4760_s30 = sld [smem:[#allocation14_spill]] }
 0x523   : > { %s4761_s14 = sld [smem:[#allocation15_spill]]  ;;  %s4762_s15 = sld [smem:[#allocation17_spill]] }
 0x524   : > { %s4763_s16 = sld [smem:[#allocation18_spill]]  ;;  %29 = sbr.rel (!%p27_p5) target bundleno = 15 (0xf), region = 201 }
 0x52b   :  { %2753 = vsyncpa [#allocation5], 1 }
 0x52c   :  { %2755 = vsyncpa [#allocation5 + $0x1], 1 }
 0x52d   :  { %2756 = vsyncpa [#allocation7], 1 }
 0x52e   :  { %2758 = vsyncpa [#allocation7 + $0x1], 1 }

</bundles_post_ra>
